<compile_context>
chip_gen: v7x
topology: tpu7x:2x2x1
jax: 0.10.0
libtpu: 0.0.40
codegen_flags: <defaults>
</compile_context>

<pallas_src>
import numpy as np
import jax
import jax.numpy as jnp
from jax import lax
from jax.experimental import pallas as pl
from jax.experimental.pallas import tpu as pltpu

FIG_SIZE = 16            # Fig_size
C_IN = 3
C_OUT = 3                # conv output channels -> 16*16*3 = 768 hidden state
HW = FIG_SIZE * FIG_SIZE  # 256
K = C_IN * 3 * 3         # im2col contraction size = 27
HIDDEN = C_OUT * HW      # 768
FFN_OUT = 8
OUT_DIM = 2


def _round_up(x, m):
    return (x + m - 1) // m * m


# ----------------------------- Pallas kernel ------------------------------- #
def comfort_kernel(wc_ref, bc_ref,            # SMEM: conv weight (3,27), bias (3,)
                   p1_ref, p2_ref,            # VMEM: (K, TB, HW) bf16 patch tiles
                   w1_ref, b1_ref,            # VMEM: fc1 (768,8), (1,8)
                   w2_ref, b2_ref,            # VMEM: fc2 (16,2), (1,2)
                   o_ref):                    # VMEM: (TB, 2) output block
    TB = p1_ref.shape[1]

    def branch(p_ref):
        # Conv2d(3,3,k=3,pad=1)+bias as 27 scalar-broadcast FMAs (VPU).  The
        # channel maps stay in (TB rows x 256 lanes) layout, which is exactly
        # what the FC1 matmul needs -> no relayout between conv and FC1.
        ch = [jnp.full((TB, HW), bc_ref[c], jnp.float32) for c in range(C_OUT)]
        for k in range(K):
            xk = p_ref[k].astype(jnp.float32)                  # (TB, 256)
            for c in range(C_OUT):
                ch[c] = ch[c] + xk * wc_ref[c, k]
        ch = [jnp.maximum(m, 0.0) for m in ch]                 # ReLU
        # hidden state in NCHW-flatten order: (TB, 768) = [ch0 | ch1 | ch2]
        h = jnp.concatenate(ch, axis=-1)                       # (TB, 768)
        # FFN(768 -> 8): single K=768 contraction on the MXU, M=TB rows.
        f = jnp.dot(h, w1_ref[...], preferred_element_type=jnp.float32)
        return jnp.maximum(f + b1_ref[...], 0.0)               # (TB, 8)

    f1 = branch(p1_ref)
    f2 = branch(p2_ref)

    # output FFN(16 -> 2): concat([f1, f2]) @ W2^T == f1 @ W2t[:8] + f2 @ W2t[8:]
    out = (jnp.dot(f1, w2_ref[0:FFN_OUT, :], preferred_element_type=jnp.float32)
           + jnp.dot(f2, w2_ref[FFN_OUT:2 * FFN_OUT, :],
                     preferred_element_type=jnp.float32)
           + b2_ref[...])
    o_ref[...] = jnp.maximum(out, 0.0)                         # (TB, 2)


# ------------------------------- JAX glue ----------------------------------- #
def _im2col_kmajor(x, b_pad):
    """x: (B, C, H, W) NCHW f32 -> bf16 patches of shape (K=27, B_pad, HW=256).

    patches[c*9 + kh*3 + kw, b, h*W + w] = xpad[b, c, h+kh, w+kw] (zero pad=1),
    matching conv_w.reshape(C_OUT, 27)'s (c_in, kh, kw) flattening order.
    """
    B, C, H, W = x.shape
    xp = jnp.pad(x, ((0, 0), (0, 0), (1, 1), (1, 1)))
    cols = []
    for c in range(C):
        for kh in range(3):
            for kw in range(3):
                cols.append(xp[:, c, kh:kh + H, kw:kw + W].reshape(B, H * W))
    p = jnp.stack(cols, axis=0)                                # (27, B, 256)
    if b_pad > B:
        p = jnp.pad(p, ((0, 0), (0, b_pad - B), (0, 0)))
    return p.astype(jnp.bfloat16)


def comfort_nn_forward(fig1, fig2, params, *, max_tile=128):
    B = fig1.shape[0]
    TB = min(max_tile, _round_up(B, 8))     # batch tile (multiple of 8, <=128)
    B_pad = _round_up(B, TB)
    n_tiles = B_pad // TB

    p1 = _im2col_kmajor(fig1, B_pad)                           # (27, B_pad, 256) bf16
    p2 = _im2col_kmajor(fig2, B_pad)

    wc = params["conv_w"].reshape(C_OUT, K).astype(jnp.float32)      # (3, 27)
    bc = params["conv_b"].reshape(C_OUT).astype(jnp.float32)         # (3,)
    w1t = params["fc1_w"].T.astype(jnp.float32)                      # (768, 8)
    b1 = params["fc1_b"].reshape(1, FFN_OUT).astype(jnp.float32)     # (1, 8)
    w2t = params["fc2_w"].T.astype(jnp.float32)                      # (16, 2)
    b2 = params["fc2_b"].reshape(1, OUT_DIM).astype(jnp.float32)     # (1, 2)

    in_specs = [
        pl.BlockSpec(memory_space=pltpu.MemorySpace.SMEM),           # conv weight
        pl.BlockSpec(memory_space=pltpu.MemorySpace.SMEM),           # conv bias
        pl.BlockSpec((K, TB, HW), lambda i: (0, i, 0)),              # patches fig1
        pl.BlockSpec((K, TB, HW), lambda i: (0, i, 0)),              # patches fig2
        pl.BlockSpec((HIDDEN, FFN_OUT), lambda i: (0, 0)),           # fc1 weight
        pl.BlockSpec((1, FFN_OUT), lambda i: (0, 0)),                # fc1 bias
        pl.BlockSpec((2 * FFN_OUT, OUT_DIM), lambda i: (0, 0)),      # fc2 weight
        pl.BlockSpec((1, OUT_DIM), lambda i: (0, 0)),                # fc2 bias
    ]
    out_specs = pl.BlockSpec((TB, OUT_DIM), lambda i: (i, 0))        # per-block out

    out = pl.pallas_call(
        comfort_kernel,
        out_shape=jax.ShapeDtypeStruct((B_pad, OUT_DIM), jnp.float32),
        grid=(n_tiles,),
        in_specs=in_specs,
        out_specs=out_specs,
        compiler_params=pltpu.CompilerParams(
            dimension_semantics=("parallel",),       # megacore-shardable batch axis
            vmem_limit_bytes=32 * 1024 * 1024),
    )(wc, bc, p1, p2, w1t, b1, w2t, b2)
    return out[:B]


# --------------------------- pure-JAX reference ----------------------------- #
def reference(fig1, fig2, params):
    def cnn(x):
        y = lax.conv_general_dilated(
            x, params["conv_w"], window_strides=(1, 1), padding="SAME",
            dimension_numbers=("NCHW", "OIHW", "NCHW"))
        y = y + params["conv_b"].reshape(1, C_OUT, 1, 1)
        y = jnp.maximum(y, 0.0)
        return y.reshape(x.shape[0], -1)                             # NCHW flatten

    def ffn1(h):
        return jnp.maximum(h @ params["fc1_w"].T + params["fc1_b"], 0.0)

    x1 = ffn1(cnn(fig1))
    x2 = ffn1(cnn(fig2))
    cat = jnp.concatenate([x1, x2], axis=-1)
    return jnp.maximum(cat @ params["fc2_w"].T + params["fc2_b"], 0.0)


if __name__ == "__main__":
    B = 2
    key = jax.random.PRNGKey(0)
    k_f1, k_f2 = jax.random.split(key, 2)
    fig1 = jax.random.normal(k_f1, (B, C_IN, FIG_SIZE, FIG_SIZE), jnp.float32)
    fig2 = jax.random.normal(k_f2, (B, C_IN, FIG_SIZE, FIG_SIZE), jnp.float32)

    # deterministic synthetic parameters (no checkpoint loading)
    kp = jax.random.PRNGKey(42)
    k1, k2, k3 = jax.random.split(kp, 3)
    params = {
        "conv_w": jax.random.normal(k1, (C_OUT, C_IN, 3, 3), jnp.float32) * 0.1,
        "conv_b": jnp.linspace(-0.1, 0.1, C_OUT).astype(jnp.float32),
        "fc1_w": jax.random.normal(k2, (FFN_OUT, HIDDEN), jnp.float32) * 0.05,
        "fc1_b": jnp.linspace(-0.1, 0.1, FFN_OUT).astype(jnp.float32),
        "fc2_w": jax.random.normal(k3, (OUT_DIM, 2 * FFN_OUT), jnp.float32) * 0.2,
        "fc2_b": jnp.zeros((OUT_DIM,), jnp.float32),
    }

    out = comfort_nn_forward(fig1, fig2, params)
    out = jax.block_until_ready(out)

    ref = jax.block_until_ready(reference(fig1, fig2, params))
    # activations travel to the kernel as bf16, so allow bf16-level error
    np.testing.assert_allclose(np.asarray(out), np.asarray(ref),
                               rtol=5e-2, atol=1e-2)

    print("KERNEL_OK")
</pallas_src>

<mosaic_0001>
module attributes {stable_mosaic.version = 11 : i64} {
  func.func @comfort_kernel(%arg0: i32, %arg1: memref<3x27xf32, #tpu.memory_space<smem>>, %arg2: memref<3xf32, #tpu.memory_space<smem>>, %arg3: memref<27x8x256xbf16, #tpu.memory_space<vmem>>, %arg4: memref<27x8x256xbf16, #tpu.memory_space<vmem>>, %arg5: memref<768x8xf32, #tpu.memory_space<vmem>>, %arg6: memref<1x8xf32, #tpu.memory_space<vmem>>, %arg7: memref<16x2xf32, #tpu.memory_space<vmem>>, %arg8: memref<1x2xf32, #tpu.memory_space<vmem>>, %arg9: memref<8x2xf32, #tpu.memory_space<vmem>>) attributes {dimension_semantics = [#tpu.dimension_semantics<parallel>], iteration_bounds = array<i64: 1>, scalar_prefetch = 0 : i64, scratch_operands = 0 : i64, tpu.core_type = #tpu.core_type<tc>, window_params = [{transform_indices = @transform_0, window_bounds = array<i64: 3, 27>}, {transform_indices = @transform_1, window_bounds = array<i64: 3>}, {transform_indices = @transform_2, window_bounds = array<i64: 27, 8, 256>}, {transform_indices = @transform_3, window_bounds = array<i64: 27, 8, 256>}, {pipeline_mode = #tpu.pipeline_mode<synchronous>, transform_indices = @transform_4, window_bounds = array<i64: 768, 8>}, {pipeline_mode = #tpu.pipeline_mode<synchronous>, transform_indices = @transform_5, window_bounds = array<i64: 1, 8>}, {pipeline_mode = #tpu.pipeline_mode<synchronous>, transform_indices = @transform_6, window_bounds = array<i64: 16, 2>}, {pipeline_mode = #tpu.pipeline_mode<synchronous>, transform_indices = @transform_7, window_bounds = array<i64: 1, 2>}, {transform_indices = @transform_8, window_bounds = array<i64: 8, 2>}]} {
    %c0 = arith.constant 0 : index
    %0 = memref.load %arg2[%c0] : memref<3xf32, #tpu.memory_space<smem>>
    %1 = vector.broadcast %0 : f32 to vector<8x256xf32>
    %c1 = arith.constant 1 : index
    %2 = memref.load %arg2[%c1] : memref<3xf32, #tpu.memory_space<smem>>
    %3 = vector.broadcast %2 : f32 to vector<8x256xf32>
    %c2 = arith.constant 2 : index
    %4 = memref.load %arg2[%c2] : memref<3xf32, #tpu.memory_space<smem>>
    %5 = vector.broadcast %4 : f32 to vector<8x256xf32>
    %c0_0 = arith.constant 0 : index
    %c0_1 = arith.constant 0 : index
    %c0_2 = arith.constant 0 : index
    %6 = vector.load %arg3[%c0_0, %c0_1, %c0_2] : memref<27x8x256xbf16, #tpu.memory_space<vmem>>, vector<1x8x256xbf16>
    %7 = vector.shape_cast %6 : vector<1x8x256xbf16> to vector<8x256xbf16>
    %8 = arith.extf %7 : vector<8x256xbf16> to vector<8x256xf32>
    %c0_3 = arith.constant 0 : index
    %c0_4 = arith.constant 0 : index
    %9 = memref.load %arg1[%c0_3, %c0_4] : memref<3x27xf32, #tpu.memory_space<smem>>
    %10 = vector.broadcast %9 : f32 to vector<8x256xf32>
    %11 = arith.mulf %8, %10 : vector<8x256xf32>
    %12 = arith.addf %1, %11 : vector<8x256xf32>
    %c1_5 = arith.constant 1 : index
    %c0_6 = arith.constant 0 : index
    %13 = memref.load %arg1[%c1_5, %c0_6] : memref<3x27xf32, #tpu.memory_space<smem>>
    %14 = vector.broadcast %13 : f32 to vector<8x256xf32>
    %15 = arith.mulf %8, %14 : vector<8x256xf32>
    %16 = arith.addf %3, %15 : vector<8x256xf32>
    %c2_7 = arith.constant 2 : index
    %c0_8 = arith.constant 0 : index
    %17 = memref.load %arg1[%c2_7, %c0_8] : memref<3x27xf32, #tpu.memory_space<smem>>
    %18 = vector.broadcast %17 : f32 to vector<8x256xf32>
    %19 = arith.mulf %8, %18 : vector<8x256xf32>
    %20 = arith.addf %5, %19 : vector<8x256xf32>
    %c1_9 = arith.constant 1 : index
    %c0_10 = arith.constant 0 : index
    %c0_11 = arith.constant 0 : index
    %21 = vector.load %arg3[%c1_9, %c0_10, %c0_11] : memref<27x8x256xbf16, #tpu.memory_space<vmem>>, vector<1x8x256xbf16>
    %22 = vector.shape_cast %21 : vector<1x8x256xbf16> to vector<8x256xbf16>
    %23 = arith.extf %22 : vector<8x256xbf16> to vector<8x256xf32>
    %c0_12 = arith.constant 0 : index
    %c1_13 = arith.constant 1 : index
    %24 = memref.load %arg1[%c0_12, %c1_13] : memref<3x27xf32, #tpu.memory_space<smem>>
    %25 = vector.broadcast %24 : f32 to vector<8x256xf32>
    %26 = arith.mulf %23, %25 : vector<8x256xf32>
    %27 = arith.addf %12, %26 : vector<8x256xf32>
    %c1_14 = arith.constant 1 : index
    %c1_15 = arith.constant 1 : index
    %28 = memref.load %arg1[%c1_14, %c1_15] : memref<3x27xf32, #tpu.memory_space<smem>>
    %29 = vector.broadcast %28 : f32 to vector<8x256xf32>
    %30 = arith.mulf %23, %29 : vector<8x256xf32>
    %31 = arith.addf %16, %30 : vector<8x256xf32>
    %c2_16 = arith.constant 2 : index
    %c1_17 = arith.constant 1 : index
    %32 = memref.load %arg1[%c2_16, %c1_17] : memref<3x27xf32, #tpu.memory_space<smem>>
    %33 = vector.broadcast %32 : f32 to vector<8x256xf32>
    %34 = arith.mulf %23, %33 : vector<8x256xf32>
    %35 = arith.addf %20, %34 : vector<8x256xf32>
    %c2_18 = arith.constant 2 : index
    %c0_19 = arith.constant 0 : index
    %c0_20 = arith.constant 0 : index
    %36 = vector.load %arg3[%c2_18, %c0_19, %c0_20] : memref<27x8x256xbf16, #tpu.memory_space<vmem>>, vector<1x8x256xbf16>
    %37 = vector.shape_cast %36 : vector<1x8x256xbf16> to vector<8x256xbf16>
    %38 = arith.extf %37 : vector<8x256xbf16> to vector<8x256xf32>
    %c0_21 = arith.constant 0 : index
    %c2_22 = arith.constant 2 : index
    %39 = memref.load %arg1[%c0_21, %c2_22] : memref<3x27xf32, #tpu.memory_space<smem>>
    %40 = vector.broadcast %39 : f32 to vector<8x256xf32>
    %41 = arith.mulf %38, %40 : vector<8x256xf32>
    %42 = arith.addf %27, %41 : vector<8x256xf32>
    %c1_23 = arith.constant 1 : index
    %c2_24 = arith.constant 2 : index
    %43 = memref.load %arg1[%c1_23, %c2_24] : memref<3x27xf32, #tpu.memory_space<smem>>
    %44 = vector.broadcast %43 : f32 to vector<8x256xf32>
    %45 = arith.mulf %38, %44 : vector<8x256xf32>
    %46 = arith.addf %31, %45 : vector<8x256xf32>
    %c2_25 = arith.constant 2 : index
    %c2_26 = arith.constant 2 : index
    %47 = memref.load %arg1[%c2_25, %c2_26] : memref<3x27xf32, #tpu.memory_space<smem>>
    %48 = vector.broadcast %47 : f32 to vector<8x256xf32>
    %49 = arith.mulf %38, %48 : vector<8x256xf32>
    %50 = arith.addf %35, %49 : vector<8x256xf32>
    %c3 = arith.constant 3 : index
    %c0_27 = arith.constant 0 : index
    %c0_28 = arith.constant 0 : index
    %51 = vector.load %arg3[%c3, %c0_27, %c0_28] : memref<27x8x256xbf16, #tpu.memory_space<vmem>>, vector<1x8x256xbf16>
    %52 = vector.shape_cast %51 : vector<1x8x256xbf16> to vector<8x256xbf16>
    %53 = arith.extf %52 : vector<8x256xbf16> to vector<8x256xf32>
    %c0_29 = arith.constant 0 : index
    %c3_30 = arith.constant 3 : index
    %54 = memref.load %arg1[%c0_29, %c3_30] : memref<3x27xf32, #tpu.memory_space<smem>>
    %55 = vector.broadcast %54 : f32 to vector<8x256xf32>
    %56 = arith.mulf %53, %55 : vector<8x256xf32>
    %57 = arith.addf %42, %56 : vector<8x256xf32>
    %c1_31 = arith.constant 1 : index
    %c3_32 = arith.constant 3 : index
    %58 = memref.load %arg1[%c1_31, %c3_32] : memref<3x27xf32, #tpu.memory_space<smem>>
    %59 = vector.broadcast %58 : f32 to vector<8x256xf32>
    %60 = arith.mulf %53, %59 : vector<8x256xf32>
    %61 = arith.addf %46, %60 : vector<8x256xf32>
    %c2_33 = arith.constant 2 : index
    %c3_34 = arith.constant 3 : index
    %62 = memref.load %arg1[%c2_33, %c3_34] : memref<3x27xf32, #tpu.memory_space<smem>>
    %63 = vector.broadcast %62 : f32 to vector<8x256xf32>
    %64 = arith.mulf %53, %63 : vector<8x256xf32>
    %65 = arith.addf %50, %64 : vector<8x256xf32>
    %c4 = arith.constant 4 : index
    %c0_35 = arith.constant 0 : index
    %c0_36 = arith.constant 0 : index
    %66 = vector.load %arg3[%c4, %c0_35, %c0_36] : memref<27x8x256xbf16, #tpu.memory_space<vmem>>, vector<1x8x256xbf16>
    %67 = vector.shape_cast %66 : vector<1x8x256xbf16> to vector<8x256xbf16>
    %68 = arith.extf %67 : vector<8x256xbf16> to vector<8x256xf32>
    %c0_37 = arith.constant 0 : index
    %c4_38 = arith.constant 4 : index
    %69 = memref.load %arg1[%c0_37, %c4_38] : memref<3x27xf32, #tpu.memory_space<smem>>
    %70 = vector.broadcast %69 : f32 to vector<8x256xf32>
    %71 = arith.mulf %68, %70 : vector<8x256xf32>
    %72 = arith.addf %57, %71 : vector<8x256xf32>
    %c1_39 = arith.constant 1 : index
    %c4_40 = arith.constant 4 : index
    %73 = memref.load %arg1[%c1_39, %c4_40] : memref<3x27xf32, #tpu.memory_space<smem>>
    %74 = vector.broadcast %73 : f32 to vector<8x256xf32>
    %75 = arith.mulf %68, %74 : vector<8x256xf32>
    %76 = arith.addf %61, %75 : vector<8x256xf32>
    %c2_41 = arith.constant 2 : index
    %c4_42 = arith.constant 4 : index
    %77 = memref.load %arg1[%c2_41, %c4_42] : memref<3x27xf32, #tpu.memory_space<smem>>
    %78 = vector.broadcast %77 : f32 to vector<8x256xf32>
    %79 = arith.mulf %68, %78 : vector<8x256xf32>
    %80 = arith.addf %65, %79 : vector<8x256xf32>
    %c5 = arith.constant 5 : index
    %c0_43 = arith.constant 0 : index
    %c0_44 = arith.constant 0 : index
    %81 = vector.load %arg3[%c5, %c0_43, %c0_44] : memref<27x8x256xbf16, #tpu.memory_space<vmem>>, vector<1x8x256xbf16>
    %82 = vector.shape_cast %81 : vector<1x8x256xbf16> to vector<8x256xbf16>
    %83 = arith.extf %82 : vector<8x256xbf16> to vector<8x256xf32>
    %c0_45 = arith.constant 0 : index
    %c5_46 = arith.constant 5 : index
    %84 = memref.load %arg1[%c0_45, %c5_46] : memref<3x27xf32, #tpu.memory_space<smem>>
    %85 = vector.broadcast %84 : f32 to vector<8x256xf32>
    %86 = arith.mulf %83, %85 : vector<8x256xf32>
    %87 = arith.addf %72, %86 : vector<8x256xf32>
    %c1_47 = arith.constant 1 : index
    %c5_48 = arith.constant 5 : index
    %88 = memref.load %arg1[%c1_47, %c5_48] : memref<3x27xf32, #tpu.memory_space<smem>>
    %89 = vector.broadcast %88 : f32 to vector<8x256xf32>
    %90 = arith.mulf %83, %89 : vector<8x256xf32>
    %91 = arith.addf %76, %90 : vector<8x256xf32>
    %c2_49 = arith.constant 2 : index
    %c5_50 = arith.constant 5 : index
    %92 = memref.load %arg1[%c2_49, %c5_50] : memref<3x27xf32, #tpu.memory_space<smem>>
    %93 = vector.broadcast %92 : f32 to vector<8x256xf32>
    %94 = arith.mulf %83, %93 : vector<8x256xf32>
    %95 = arith.addf %80, %94 : vector<8x256xf32>
    %c6 = arith.constant 6 : index
    %c0_51 = arith.constant 0 : index
    %c0_52 = arith.constant 0 : index
    %96 = vector.load %arg3[%c6, %c0_51, %c0_52] : memref<27x8x256xbf16, #tpu.memory_space<vmem>>, vector<1x8x256xbf16>
    %97 = vector.shape_cast %96 : vector<1x8x256xbf16> to vector<8x256xbf16>
    %98 = arith.extf %97 : vector<8x256xbf16> to vector<8x256xf32>
    %c0_53 = arith.constant 0 : index
    %c6_54 = arith.constant 6 : index
    %99 = memref.load %arg1[%c0_53, %c6_54] : memref<3x27xf32, #tpu.memory_space<smem>>
    %100 = vector.broadcast %99 : f32 to vector<8x256xf32>
    %101 = arith.mulf %98, %100 : vector<8x256xf32>
    %102 = arith.addf %87, %101 : vector<8x256xf32>
    %c1_55 = arith.constant 1 : index
    %c6_56 = arith.constant 6 : index
    %103 = memref.load %arg1[%c1_55, %c6_56] : memref<3x27xf32, #tpu.memory_space<smem>>
    %104 = vector.broadcast %103 : f32 to vector<8x256xf32>
    %105 = arith.mulf %98, %104 : vector<8x256xf32>
    %106 = arith.addf %91, %105 : vector<8x256xf32>
    %c2_57 = arith.constant 2 : index
    %c6_58 = arith.constant 6 : index
    %107 = memref.load %arg1[%c2_57, %c6_58] : memref<3x27xf32, #tpu.memory_space<smem>>
    %108 = vector.broadcast %107 : f32 to vector<8x256xf32>
    %109 = arith.mulf %98, %108 : vector<8x256xf32>
    %110 = arith.addf %95, %109 : vector<8x256xf32>
    %c7 = arith.constant 7 : index
    %c0_59 = arith.constant 0 : index
    %c0_60 = arith.constant 0 : index
    %111 = vector.load %arg3[%c7, %c0_59, %c0_60] : memref<27x8x256xbf16, #tpu.memory_space<vmem>>, vector<1x8x256xbf16>
    %112 = vector.shape_cast %111 : vector<1x8x256xbf16> to vector<8x256xbf16>
    %113 = arith.extf %112 : vector<8x256xbf16> to vector<8x256xf32>
    %c0_61 = arith.constant 0 : index
    %c7_62 = arith.constant 7 : index
    %114 = memref.load %arg1[%c0_61, %c7_62] : memref<3x27xf32, #tpu.memory_space<smem>>
    %115 = vector.broadcast %114 : f32 to vector<8x256xf32>
    %116 = arith.mulf %113, %115 : vector<8x256xf32>
    %117 = arith.addf %102, %116 : vector<8x256xf32>
    %c1_63 = arith.constant 1 : index
    %c7_64 = arith.constant 7 : index
    %118 = memref.load %arg1[%c1_63, %c7_64] : memref<3x27xf32, #tpu.memory_space<smem>>
    %119 = vector.broadcast %118 : f32 to vector<8x256xf32>
    %120 = arith.mulf %113, %119 : vector<8x256xf32>
    %121 = arith.addf %106, %120 : vector<8x256xf32>
    %c2_65 = arith.constant 2 : index
    %c7_66 = arith.constant 7 : index
    %122 = memref.load %arg1[%c2_65, %c7_66] : memref<3x27xf32, #tpu.memory_space<smem>>
    %123 = vector.broadcast %122 : f32 to vector<8x256xf32>
    %124 = arith.mulf %113, %123 : vector<8x256xf32>
    %125 = arith.addf %110, %124 : vector<8x256xf32>
    %c8 = arith.constant 8 : index
    %c0_67 = arith.constant 0 : index
    %c0_68 = arith.constant 0 : index
    %126 = vector.load %arg3[%c8, %c0_67, %c0_68] : memref<27x8x256xbf16, #tpu.memory_space<vmem>>, vector<1x8x256xbf16>
    %127 = vector.shape_cast %126 : vector<1x8x256xbf16> to vector<8x256xbf16>
    %128 = arith.extf %127 : vector<8x256xbf16> to vector<8x256xf32>
    %c0_69 = arith.constant 0 : index
    %c8_70 = arith.constant 8 : index
    %129 = memref.load %arg1[%c0_69, %c8_70] : memref<3x27xf32, #tpu.memory_space<smem>>
    %130 = vector.broadcast %129 : f32 to vector<8x256xf32>
    %131 = arith.mulf %128, %130 : vector<8x256xf32>
    %132 = arith.addf %117, %131 : vector<8x256xf32>
    %c1_71 = arith.constant 1 : index
    %c8_72 = arith.constant 8 : index
    %133 = memref.load %arg1[%c1_71, %c8_72] : memref<3x27xf32, #tpu.memory_space<smem>>
    %134 = vector.broadcast %133 : f32 to vector<8x256xf32>
    %135 = arith.mulf %128, %134 : vector<8x256xf32>
    %136 = arith.addf %121, %135 : vector<8x256xf32>
    %c2_73 = arith.constant 2 : index
    %c8_74 = arith.constant 8 : index
    %137 = memref.load %arg1[%c2_73, %c8_74] : memref<3x27xf32, #tpu.memory_space<smem>>
    %138 = vector.broadcast %137 : f32 to vector<8x256xf32>
    %139 = arith.mulf %128, %138 : vector<8x256xf32>
    %140 = arith.addf %125, %139 : vector<8x256xf32>
    %c9 = arith.constant 9 : index
    %c0_75 = arith.constant 0 : index
    %c0_76 = arith.constant 0 : index
    %141 = vector.load %arg3[%c9, %c0_75, %c0_76] : memref<27x8x256xbf16, #tpu.memory_space<vmem>>, vector<1x8x256xbf16>
    %142 = vector.shape_cast %141 : vector<1x8x256xbf16> to vector<8x256xbf16>
    %143 = arith.extf %142 : vector<8x256xbf16> to vector<8x256xf32>
    %c0_77 = arith.constant 0 : index
    %c9_78 = arith.constant 9 : index
    %144 = memref.load %arg1[%c0_77, %c9_78] : memref<3x27xf32, #tpu.memory_space<smem>>
    %145 = vector.broadcast %144 : f32 to vector<8x256xf32>
    %146 = arith.mulf %143, %145 : vector<8x256xf32>
    %147 = arith.addf %132, %146 : vector<8x256xf32>
    %c1_79 = arith.constant 1 : index
    %c9_80 = arith.constant 9 : index
    %148 = memref.load %arg1[%c1_79, %c9_80] : memref<3x27xf32, #tpu.memory_space<smem>>
    %149 = vector.broadcast %148 : f32 to vector<8x256xf32>
    %150 = arith.mulf %143, %149 : vector<8x256xf32>
    %151 = arith.addf %136, %150 : vector<8x256xf32>
    %c2_81 = arith.constant 2 : index
    %c9_82 = arith.constant 9 : index
    %152 = memref.load %arg1[%c2_81, %c9_82] : memref<3x27xf32, #tpu.memory_space<smem>>
    %153 = vector.broadcast %152 : f32 to vector<8x256xf32>
    %154 = arith.mulf %143, %153 : vector<8x256xf32>
    %155 = arith.addf %140, %154 : vector<8x256xf32>
    %c10 = arith.constant 10 : index
    %c0_83 = arith.constant 0 : index
    %c0_84 = arith.constant 0 : index
    %156 = vector.load %arg3[%c10, %c0_83, %c0_84] : memref<27x8x256xbf16, #tpu.memory_space<vmem>>, vector<1x8x256xbf16>
    %157 = vector.shape_cast %156 : vector<1x8x256xbf16> to vector<8x256xbf16>
    %158 = arith.extf %157 : vector<8x256xbf16> to vector<8x256xf32>
    %c0_85 = arith.constant 0 : index
    %c10_86 = arith.constant 10 : index
    %159 = memref.load %arg1[%c0_85, %c10_86] : memref<3x27xf32, #tpu.memory_space<smem>>
    %160 = vector.broadcast %159 : f32 to vector<8x256xf32>
    %161 = arith.mulf %158, %160 : vector<8x256xf32>
    %162 = arith.addf %147, %161 : vector<8x256xf32>
    %c1_87 = arith.constant 1 : index
    %c10_88 = arith.constant 10 : index
    %163 = memref.load %arg1[%c1_87, %c10_88] : memref<3x27xf32, #tpu.memory_space<smem>>
    %164 = vector.broadcast %163 : f32 to vector<8x256xf32>
    %165 = arith.mulf %158, %164 : vector<8x256xf32>
    %166 = arith.addf %151, %165 : vector<8x256xf32>
    %c2_89 = arith.constant 2 : index
    %c10_90 = arith.constant 10 : index
    %167 = memref.load %arg1[%c2_89, %c10_90] : memref<3x27xf32, #tpu.memory_space<smem>>
    %168 = vector.broadcast %167 : f32 to vector<8x256xf32>
    %169 = arith.mulf %158, %168 : vector<8x256xf32>
    %170 = arith.addf %155, %169 : vector<8x256xf32>
    %c11 = arith.constant 11 : index
    %c0_91 = arith.constant 0 : index
    %c0_92 = arith.constant 0 : index
    %171 = vector.load %arg3[%c11, %c0_91, %c0_92] : memref<27x8x256xbf16, #tpu.memory_space<vmem>>, vector<1x8x256xbf16>
    %172 = vector.shape_cast %171 : vector<1x8x256xbf16> to vector<8x256xbf16>
    %173 = arith.extf %172 : vector<8x256xbf16> to vector<8x256xf32>
    %c0_93 = arith.constant 0 : index
    %c11_94 = arith.constant 11 : index
    %174 = memref.load %arg1[%c0_93, %c11_94] : memref<3x27xf32, #tpu.memory_space<smem>>
    %175 = vector.broadcast %174 : f32 to vector<8x256xf32>
    %176 = arith.mulf %173, %175 : vector<8x256xf32>
    %177 = arith.addf %162, %176 : vector<8x256xf32>
    %c1_95 = arith.constant 1 : index
    %c11_96 = arith.constant 11 : index
    %178 = memref.load %arg1[%c1_95, %c11_96] : memref<3x27xf32, #tpu.memory_space<smem>>
    %179 = vector.broadcast %178 : f32 to vector<8x256xf32>
    %180 = arith.mulf %173, %179 : vector<8x256xf32>
    %181 = arith.addf %166, %180 : vector<8x256xf32>
    %c2_97 = arith.constant 2 : index
    %c11_98 = arith.constant 11 : index
    %182 = memref.load %arg1[%c2_97, %c11_98] : memref<3x27xf32, #tpu.memory_space<smem>>
    %183 = vector.broadcast %182 : f32 to vector<8x256xf32>
    %184 = arith.mulf %173, %183 : vector<8x256xf32>
    %185 = arith.addf %170, %184 : vector<8x256xf32>
    %c12 = arith.constant 12 : index
    %c0_99 = arith.constant 0 : index
    %c0_100 = arith.constant 0 : index
    %186 = vector.load %arg3[%c12, %c0_99, %c0_100] : memref<27x8x256xbf16, #tpu.memory_space<vmem>>, vector<1x8x256xbf16>
    %187 = vector.shape_cast %186 : vector<1x8x256xbf16> to vector<8x256xbf16>
    %188 = arith.extf %187 : vector<8x256xbf16> to vector<8x256xf32>
    %c0_101 = arith.constant 0 : index
    %c12_102 = arith.constant 12 : index
    %189 = memref.load %arg1[%c0_101, %c12_102] : memref<3x27xf32, #tpu.memory_space<smem>>
    %190 = vector.broadcast %189 : f32 to vector<8x256xf32>
    %191 = arith.mulf %188, %190 : vector<8x256xf32>
    %192 = arith.addf %177, %191 : vector<8x256xf32>
    %c1_103 = arith.constant 1 : index
    %c12_104 = arith.constant 12 : index
    %193 = memref.load %arg1[%c1_103, %c12_104] : memref<3x27xf32, #tpu.memory_space<smem>>
    %194 = vector.broadcast %193 : f32 to vector<8x256xf32>
    %195 = arith.mulf %188, %194 : vector<8x256xf32>
    %196 = arith.addf %181, %195 : vector<8x256xf32>
    %c2_105 = arith.constant 2 : index
    %c12_106 = arith.constant 12 : index
    %197 = memref.load %arg1[%c2_105, %c12_106] : memref<3x27xf32, #tpu.memory_space<smem>>
    %198 = vector.broadcast %197 : f32 to vector<8x256xf32>
    %199 = arith.mulf %188, %198 : vector<8x256xf32>
    %200 = arith.addf %185, %199 : vector<8x256xf32>
    %c13 = arith.constant 13 : index
    %c0_107 = arith.constant 0 : index
    %c0_108 = arith.constant 0 : index
    %201 = vector.load %arg3[%c13, %c0_107, %c0_108] : memref<27x8x256xbf16, #tpu.memory_space<vmem>>, vector<1x8x256xbf16>
    %202 = vector.shape_cast %201 : vector<1x8x256xbf16> to vector<8x256xbf16>
    %203 = arith.extf %202 : vector<8x256xbf16> to vector<8x256xf32>
    %c0_109 = arith.constant 0 : index
    %c13_110 = arith.constant 13 : index
    %204 = memref.load %arg1[%c0_109, %c13_110] : memref<3x27xf32, #tpu.memory_space<smem>>
    %205 = vector.broadcast %204 : f32 to vector<8x256xf32>
    %206 = arith.mulf %203, %205 : vector<8x256xf32>
    %207 = arith.addf %192, %206 : vector<8x256xf32>
    %c1_111 = arith.constant 1 : index
    %c13_112 = arith.constant 13 : index
    %208 = memref.load %arg1[%c1_111, %c13_112] : memref<3x27xf32, #tpu.memory_space<smem>>
    %209 = vector.broadcast %208 : f32 to vector<8x256xf32>
    %210 = arith.mulf %203, %209 : vector<8x256xf32>
    %211 = arith.addf %196, %210 : vector<8x256xf32>
    %c2_113 = arith.constant 2 : index
    %c13_114 = arith.constant 13 : index
    %212 = memref.load %arg1[%c2_113, %c13_114] : memref<3x27xf32, #tpu.memory_space<smem>>
    %213 = vector.broadcast %212 : f32 to vector<8x256xf32>
    %214 = arith.mulf %203, %213 : vector<8x256xf32>
    %215 = arith.addf %200, %214 : vector<8x256xf32>
    %c14 = arith.constant 14 : index
    %c0_115 = arith.constant 0 : index
    %c0_116 = arith.constant 0 : index
    %216 = vector.load %arg3[%c14, %c0_115, %c0_116] : memref<27x8x256xbf16, #tpu.memory_space<vmem>>, vector<1x8x256xbf16>
    %217 = vector.shape_cast %216 : vector<1x8x256xbf16> to vector<8x256xbf16>
    %218 = arith.extf %217 : vector<8x256xbf16> to vector<8x256xf32>
    %c0_117 = arith.constant 0 : index
    %c14_118 = arith.constant 14 : index
    %219 = memref.load %arg1[%c0_117, %c14_118] : memref<3x27xf32, #tpu.memory_space<smem>>
    %220 = vector.broadcast %219 : f32 to vector<8x256xf32>
    %221 = arith.mulf %218, %220 : vector<8x256xf32>
    %222 = arith.addf %207, %221 : vector<8x256xf32>
    %c1_119 = arith.constant 1 : index
    %c14_120 = arith.constant 14 : index
    %223 = memref.load %arg1[%c1_119, %c14_120] : memref<3x27xf32, #tpu.memory_space<smem>>
    %224 = vector.broadcast %223 : f32 to vector<8x256xf32>
    %225 = arith.mulf %218, %224 : vector<8x256xf32>
    %226 = arith.addf %211, %225 : vector<8x256xf32>
    %c2_121 = arith.constant 2 : index
    %c14_122 = arith.constant 14 : index
    %227 = memref.load %arg1[%c2_121, %c14_122] : memref<3x27xf32, #tpu.memory_space<smem>>
    %228 = vector.broadcast %227 : f32 to vector<8x256xf32>
    %229 = arith.mulf %218, %228 : vector<8x256xf32>
    %230 = arith.addf %215, %229 : vector<8x256xf32>
    %c15 = arith.constant 15 : index
    %c0_123 = arith.constant 0 : index
    %c0_124 = arith.constant 0 : index
    %231 = vector.load %arg3[%c15, %c0_123, %c0_124] : memref<27x8x256xbf16, #tpu.memory_space<vmem>>, vector<1x8x256xbf16>
    %232 = vector.shape_cast %231 : vector<1x8x256xbf16> to vector<8x256xbf16>
    %233 = arith.extf %232 : vector<8x256xbf16> to vector<8x256xf32>
    %c0_125 = arith.constant 0 : index
    %c15_126 = arith.constant 15 : index
    %234 = memref.load %arg1[%c0_125, %c15_126] : memref<3x27xf32, #tpu.memory_space<smem>>
    %235 = vector.broadcast %234 : f32 to vector<8x256xf32>
    %236 = arith.mulf %233, %235 : vector<8x256xf32>
    %237 = arith.addf %222, %236 : vector<8x256xf32>
    %c1_127 = arith.constant 1 : index
    %c15_128 = arith.constant 15 : index
    %238 = memref.load %arg1[%c1_127, %c15_128] : memref<3x27xf32, #tpu.memory_space<smem>>
    %239 = vector.broadcast %238 : f32 to vector<8x256xf32>
    %240 = arith.mulf %233, %239 : vector<8x256xf32>
    %241 = arith.addf %226, %240 : vector<8x256xf32>
    %c2_129 = arith.constant 2 : index
    %c15_130 = arith.constant 15 : index
    %242 = memref.load %arg1[%c2_129, %c15_130] : memref<3x27xf32, #tpu.memory_space<smem>>
    %243 = vector.broadcast %242 : f32 to vector<8x256xf32>
    %244 = arith.mulf %233, %243 : vector<8x256xf32>
    %245 = arith.addf %230, %244 : vector<8x256xf32>
    %c16 = arith.constant 16 : index
    %c0_131 = arith.constant 0 : index
    %c0_132 = arith.constant 0 : index
    %246 = vector.load %arg3[%c16, %c0_131, %c0_132] : memref<27x8x256xbf16, #tpu.memory_space<vmem>>, vector<1x8x256xbf16>
    %247 = vector.shape_cast %246 : vector<1x8x256xbf16> to vector<8x256xbf16>
    %248 = arith.extf %247 : vector<8x256xbf16> to vector<8x256xf32>
    %c0_133 = arith.constant 0 : index
    %c16_134 = arith.constant 16 : index
    %249 = memref.load %arg1[%c0_133, %c16_134] : memref<3x27xf32, #tpu.memory_space<smem>>
    %250 = vector.broadcast %249 : f32 to vector<8x256xf32>
    %251 = arith.mulf %248, %250 : vector<8x256xf32>
    %252 = arith.addf %237, %251 : vector<8x256xf32>
    %c1_135 = arith.constant 1 : index
    %c16_136 = arith.constant 16 : index
    %253 = memref.load %arg1[%c1_135, %c16_136] : memref<3x27xf32, #tpu.memory_space<smem>>
    %254 = vector.broadcast %253 : f32 to vector<8x256xf32>
    %255 = arith.mulf %248, %254 : vector<8x256xf32>
    %256 = arith.addf %241, %255 : vector<8x256xf32>
    %c2_137 = arith.constant 2 : index
    %c16_138 = arith.constant 16 : index
    %257 = memref.load %arg1[%c2_137, %c16_138] : memref<3x27xf32, #tpu.memory_space<smem>>
    %258 = vector.broadcast %257 : f32 to vector<8x256xf32>
    %259 = arith.mulf %248, %258 : vector<8x256xf32>
    %260 = arith.addf %245, %259 : vector<8x256xf32>
    %c17 = arith.constant 17 : index
    %c0_139 = arith.constant 0 : index
    %c0_140 = arith.constant 0 : index
    %261 = vector.load %arg3[%c17, %c0_139, %c0_140] : memref<27x8x256xbf16, #tpu.memory_space<vmem>>, vector<1x8x256xbf16>
    %262 = vector.shape_cast %261 : vector<1x8x256xbf16> to vector<8x256xbf16>
    %263 = arith.extf %262 : vector<8x256xbf16> to vector<8x256xf32>
    %c0_141 = arith.constant 0 : index
    %c17_142 = arith.constant 17 : index
    %264 = memref.load %arg1[%c0_141, %c17_142] : memref<3x27xf32, #tpu.memory_space<smem>>
    %265 = vector.broadcast %264 : f32 to vector<8x256xf32>
    %266 = arith.mulf %263, %265 : vector<8x256xf32>
    %267 = arith.addf %252, %266 : vector<8x256xf32>
    %c1_143 = arith.constant 1 : index
    %c17_144 = arith.constant 17 : index
    %268 = memref.load %arg1[%c1_143, %c17_144] : memref<3x27xf32, #tpu.memory_space<smem>>
    %269 = vector.broadcast %268 : f32 to vector<8x256xf32>
    %270 = arith.mulf %263, %269 : vector<8x256xf32>
    %271 = arith.addf %256, %270 : vector<8x256xf32>
    %c2_145 = arith.constant 2 : index
    %c17_146 = arith.constant 17 : index
    %272 = memref.load %arg1[%c2_145, %c17_146] : memref<3x27xf32, #tpu.memory_space<smem>>
    %273 = vector.broadcast %272 : f32 to vector<8x256xf32>
    %274 = arith.mulf %263, %273 : vector<8x256xf32>
    %275 = arith.addf %260, %274 : vector<8x256xf32>
    %c18 = arith.constant 18 : index
    %c0_147 = arith.constant 0 : index
    %c0_148 = arith.constant 0 : index
    %276 = vector.load %arg3[%c18, %c0_147, %c0_148] : memref<27x8x256xbf16, #tpu.memory_space<vmem>>, vector<1x8x256xbf16>
    %277 = vector.shape_cast %276 : vector<1x8x256xbf16> to vector<8x256xbf16>
    %278 = arith.extf %277 : vector<8x256xbf16> to vector<8x256xf32>
    %c0_149 = arith.constant 0 : index
    %c18_150 = arith.constant 18 : index
    %279 = memref.load %arg1[%c0_149, %c18_150] : memref<3x27xf32, #tpu.memory_space<smem>>
    %280 = vector.broadcast %279 : f32 to vector<8x256xf32>
    %281 = arith.mulf %278, %280 : vector<8x256xf32>
    %282 = arith.addf %267, %281 : vector<8x256xf32>
    %c1_151 = arith.constant 1 : index
    %c18_152 = arith.constant 18 : index
    %283 = memref.load %arg1[%c1_151, %c18_152] : memref<3x27xf32, #tpu.memory_space<smem>>
    %284 = vector.broadcast %283 : f32 to vector<8x256xf32>
    %285 = arith.mulf %278, %284 : vector<8x256xf32>
    %286 = arith.addf %271, %285 : vector<8x256xf32>
    %c2_153 = arith.constant 2 : index
    %c18_154 = arith.constant 18 : index
    %287 = memref.load %arg1[%c2_153, %c18_154] : memref<3x27xf32, #tpu.memory_space<smem>>
    %288 = vector.broadcast %287 : f32 to vector<8x256xf32>
    %289 = arith.mulf %278, %288 : vector<8x256xf32>
    %290 = arith.addf %275, %289 : vector<8x256xf32>
    %c19 = arith.constant 19 : index
    %c0_155 = arith.constant 0 : index
    %c0_156 = arith.constant 0 : index
    %291 = vector.load %arg3[%c19, %c0_155, %c0_156] : memref<27x8x256xbf16, #tpu.memory_space<vmem>>, vector<1x8x256xbf16>
    %292 = vector.shape_cast %291 : vector<1x8x256xbf16> to vector<8x256xbf16>
    %293 = arith.extf %292 : vector<8x256xbf16> to vector<8x256xf32>
    %c0_157 = arith.constant 0 : index
    %c19_158 = arith.constant 19 : index
    %294 = memref.load %arg1[%c0_157, %c19_158] : memref<3x27xf32, #tpu.memory_space<smem>>
    %295 = vector.broadcast %294 : f32 to vector<8x256xf32>
    %296 = arith.mulf %293, %295 : vector<8x256xf32>
    %297 = arith.addf %282, %296 : vector<8x256xf32>
    %c1_159 = arith.constant 1 : index
    %c19_160 = arith.constant 19 : index
    %298 = memref.load %arg1[%c1_159, %c19_160] : memref<3x27xf32, #tpu.memory_space<smem>>
    %299 = vector.broadcast %298 : f32 to vector<8x256xf32>
    %300 = arith.mulf %293, %299 : vector<8x256xf32>
    %301 = arith.addf %286, %300 : vector<8x256xf32>
    %c2_161 = arith.constant 2 : index
    %c19_162 = arith.constant 19 : index
    %302 = memref.load %arg1[%c2_161, %c19_162] : memref<3x27xf32, #tpu.memory_space<smem>>
    %303 = vector.broadcast %302 : f32 to vector<8x256xf32>
    %304 = arith.mulf %293, %303 : vector<8x256xf32>
    %305 = arith.addf %290, %304 : vector<8x256xf32>
    %c20 = arith.constant 20 : index
    %c0_163 = arith.constant 0 : index
    %c0_164 = arith.constant 0 : index
    %306 = vector.load %arg3[%c20, %c0_163, %c0_164] : memref<27x8x256xbf16, #tpu.memory_space<vmem>>, vector<1x8x256xbf16>
    %307 = vector.shape_cast %306 : vector<1x8x256xbf16> to vector<8x256xbf16>
    %308 = arith.extf %307 : vector<8x256xbf16> to vector<8x256xf32>
    %c0_165 = arith.constant 0 : index
    %c20_166 = arith.constant 20 : index
    %309 = memref.load %arg1[%c0_165, %c20_166] : memref<3x27xf32, #tpu.memory_space<smem>>
    %310 = vector.broadcast %309 : f32 to vector<8x256xf32>
    %311 = arith.mulf %308, %310 : vector<8x256xf32>
    %312 = arith.addf %297, %311 : vector<8x256xf32>
    %c1_167 = arith.constant 1 : index
    %c20_168 = arith.constant 20 : index
    %313 = memref.load %arg1[%c1_167, %c20_168] : memref<3x27xf32, #tpu.memory_space<smem>>
    %314 = vector.broadcast %313 : f32 to vector<8x256xf32>
    %315 = arith.mulf %308, %314 : vector<8x256xf32>
    %316 = arith.addf %301, %315 : vector<8x256xf32>
    %c2_169 = arith.constant 2 : index
    %c20_170 = arith.constant 20 : index
    %317 = memref.load %arg1[%c2_169, %c20_170] : memref<3x27xf32, #tpu.memory_space<smem>>
    %318 = vector.broadcast %317 : f32 to vector<8x256xf32>
    %319 = arith.mulf %308, %318 : vector<8x256xf32>
    %320 = arith.addf %305, %319 : vector<8x256xf32>
    %c21 = arith.constant 21 : index
    %c0_171 = arith.constant 0 : index
    %c0_172 = arith.constant 0 : index
    %321 = vector.load %arg3[%c21, %c0_171, %c0_172] : memref<27x8x256xbf16, #tpu.memory_space<vmem>>, vector<1x8x256xbf16>
    %322 = vector.shape_cast %321 : vector<1x8x256xbf16> to vector<8x256xbf16>
    %323 = arith.extf %322 : vector<8x256xbf16> to vector<8x256xf32>
    %c0_173 = arith.constant 0 : index
    %c21_174 = arith.constant 21 : index
    %324 = memref.load %arg1[%c0_173, %c21_174] : memref<3x27xf32, #tpu.memory_space<smem>>
    %325 = vector.broadcast %324 : f32 to vector<8x256xf32>
    %326 = arith.mulf %323, %325 : vector<8x256xf32>
    %327 = arith.addf %312, %326 : vector<8x256xf32>
    %c1_175 = arith.constant 1 : index
    %c21_176 = arith.constant 21 : index
    %328 = memref.load %arg1[%c1_175, %c21_176] : memref<3x27xf32, #tpu.memory_space<smem>>
    %329 = vector.broadcast %328 : f32 to vector<8x256xf32>
    %330 = arith.mulf %323, %329 : vector<8x256xf32>
    %331 = arith.addf %316, %330 : vector<8x256xf32>
    %c2_177 = arith.constant 2 : index
    %c21_178 = arith.constant 21 : index
    %332 = memref.load %arg1[%c2_177, %c21_178] : memref<3x27xf32, #tpu.memory_space<smem>>
    %333 = vector.broadcast %332 : f32 to vector<8x256xf32>
    %334 = arith.mulf %323, %333 : vector<8x256xf32>
    %335 = arith.addf %320, %334 : vector<8x256xf32>
    %c22 = arith.constant 22 : index
    %c0_179 = arith.constant 0 : index
    %c0_180 = arith.constant 0 : index
    %336 = vector.load %arg3[%c22, %c0_179, %c0_180] : memref<27x8x256xbf16, #tpu.memory_space<vmem>>, vector<1x8x256xbf16>
    %337 = vector.shape_cast %336 : vector<1x8x256xbf16> to vector<8x256xbf16>
    %338 = arith.extf %337 : vector<8x256xbf16> to vector<8x256xf32>
    %c0_181 = arith.constant 0 : index
    %c22_182 = arith.constant 22 : index
    %339 = memref.load %arg1[%c0_181, %c22_182] : memref<3x27xf32, #tpu.memory_space<smem>>
    %340 = vector.broadcast %339 : f32 to vector<8x256xf32>
    %341 = arith.mulf %338, %340 : vector<8x256xf32>
    %342 = arith.addf %327, %341 : vector<8x256xf32>
    %c1_183 = arith.constant 1 : index
    %c22_184 = arith.constant 22 : index
    %343 = memref.load %arg1[%c1_183, %c22_184] : memref<3x27xf32, #tpu.memory_space<smem>>
    %344 = vector.broadcast %343 : f32 to vector<8x256xf32>
    %345 = arith.mulf %338, %344 : vector<8x256xf32>
    %346 = arith.addf %331, %345 : vector<8x256xf32>
    %c2_185 = arith.constant 2 : index
    %c22_186 = arith.constant 22 : index
    %347 = memref.load %arg1[%c2_185, %c22_186] : memref<3x27xf32, #tpu.memory_space<smem>>
    %348 = vector.broadcast %347 : f32 to vector<8x256xf32>
    %349 = arith.mulf %338, %348 : vector<8x256xf32>
    %350 = arith.addf %335, %349 : vector<8x256xf32>
    %c23 = arith.constant 23 : index
    %c0_187 = arith.constant 0 : index
    %c0_188 = arith.constant 0 : index
    %351 = vector.load %arg3[%c23, %c0_187, %c0_188] : memref<27x8x256xbf16, #tpu.memory_space<vmem>>, vector<1x8x256xbf16>
    %352 = vector.shape_cast %351 : vector<1x8x256xbf16> to vector<8x256xbf16>
    %353 = arith.extf %352 : vector<8x256xbf16> to vector<8x256xf32>
    %c0_189 = arith.constant 0 : index
    %c23_190 = arith.constant 23 : index
    %354 = memref.load %arg1[%c0_189, %c23_190] : memref<3x27xf32, #tpu.memory_space<smem>>
    %355 = vector.broadcast %354 : f32 to vector<8x256xf32>
    %356 = arith.mulf %353, %355 : vector<8x256xf32>
    %357 = arith.addf %342, %356 : vector<8x256xf32>
    %c1_191 = arith.constant 1 : index
    %c23_192 = arith.constant 23 : index
    %358 = memref.load %arg1[%c1_191, %c23_192] : memref<3x27xf32, #tpu.memory_space<smem>>
    %359 = vector.broadcast %358 : f32 to vector<8x256xf32>
    %360 = arith.mulf %353, %359 : vector<8x256xf32>
    %361 = arith.addf %346, %360 : vector<8x256xf32>
    %c2_193 = arith.constant 2 : index
    %c23_194 = arith.constant 23 : index
    %362 = memref.load %arg1[%c2_193, %c23_194] : memref<3x27xf32, #tpu.memory_space<smem>>
    %363 = vector.broadcast %362 : f32 to vector<8x256xf32>
    %364 = arith.mulf %353, %363 : vector<8x256xf32>
    %365 = arith.addf %350, %364 : vector<8x256xf32>
    %c24 = arith.constant 24 : index
    %c0_195 = arith.constant 0 : index
    %c0_196 = arith.constant 0 : index
    %366 = vector.load %arg3[%c24, %c0_195, %c0_196] : memref<27x8x256xbf16, #tpu.memory_space<vmem>>, vector<1x8x256xbf16>
    %367 = vector.shape_cast %366 : vector<1x8x256xbf16> to vector<8x256xbf16>
    %368 = arith.extf %367 : vector<8x256xbf16> to vector<8x256xf32>
    %c0_197 = arith.constant 0 : index
    %c24_198 = arith.constant 24 : index
    %369 = memref.load %arg1[%c0_197, %c24_198] : memref<3x27xf32, #tpu.memory_space<smem>>
    %370 = vector.broadcast %369 : f32 to vector<8x256xf32>
    %371 = arith.mulf %368, %370 : vector<8x256xf32>
    %372 = arith.addf %357, %371 : vector<8x256xf32>
    %c1_199 = arith.constant 1 : index
    %c24_200 = arith.constant 24 : index
    %373 = memref.load %arg1[%c1_199, %c24_200] : memref<3x27xf32, #tpu.memory_space<smem>>
    %374 = vector.broadcast %373 : f32 to vector<8x256xf32>
    %375 = arith.mulf %368, %374 : vector<8x256xf32>
    %376 = arith.addf %361, %375 : vector<8x256xf32>
    %c2_201 = arith.constant 2 : index
    %c24_202 = arith.constant 24 : index
    %377 = memref.load %arg1[%c2_201, %c24_202] : memref<3x27xf32, #tpu.memory_space<smem>>
    %378 = vector.broadcast %377 : f32 to vector<8x256xf32>
    %379 = arith.mulf %368, %378 : vector<8x256xf32>
    %380 = arith.addf %365, %379 : vector<8x256xf32>
    %c25 = arith.constant 25 : index
    %c0_203 = arith.constant 0 : index
    %c0_204 = arith.constant 0 : index
    %381 = vector.load %arg3[%c25, %c0_203, %c0_204] : memref<27x8x256xbf16, #tpu.memory_space<vmem>>, vector<1x8x256xbf16>
    %382 = vector.shape_cast %381 : vector<1x8x256xbf16> to vector<8x256xbf16>
    %383 = arith.extf %382 : vector<8x256xbf16> to vector<8x256xf32>
    %c0_205 = arith.constant 0 : index
    %c25_206 = arith.constant 25 : index
    %384 = memref.load %arg1[%c0_205, %c25_206] : memref<3x27xf32, #tpu.memory_space<smem>>
    %385 = vector.broadcast %384 : f32 to vector<8x256xf32>
    %386 = arith.mulf %383, %385 : vector<8x256xf32>
    %387 = arith.addf %372, %386 : vector<8x256xf32>
    %c1_207 = arith.constant 1 : index
    %c25_208 = arith.constant 25 : index
    %388 = memref.load %arg1[%c1_207, %c25_208] : memref<3x27xf32, #tpu.memory_space<smem>>
    %389 = vector.broadcast %388 : f32 to vector<8x256xf32>
    %390 = arith.mulf %383, %389 : vector<8x256xf32>
    %391 = arith.addf %376, %390 : vector<8x256xf32>
    %c2_209 = arith.constant 2 : index
    %c25_210 = arith.constant 25 : index
    %392 = memref.load %arg1[%c2_209, %c25_210] : memref<3x27xf32, #tpu.memory_space<smem>>
    %393 = vector.broadcast %392 : f32 to vector<8x256xf32>
    %394 = arith.mulf %383, %393 : vector<8x256xf32>
    %395 = arith.addf %380, %394 : vector<8x256xf32>
    %c26 = arith.constant 26 : index
    %c0_211 = arith.constant 0 : index
    %c0_212 = arith.constant 0 : index
    %396 = vector.load %arg3[%c26, %c0_211, %c0_212] : memref<27x8x256xbf16, #tpu.memory_space<vmem>>, vector<1x8x256xbf16>
    %397 = vector.shape_cast %396 : vector<1x8x256xbf16> to vector<8x256xbf16>
    %398 = arith.extf %397 : vector<8x256xbf16> to vector<8x256xf32>
    %c0_213 = arith.constant 0 : index
    %c26_214 = arith.constant 26 : index
    %399 = memref.load %arg1[%c0_213, %c26_214] : memref<3x27xf32, #tpu.memory_space<smem>>
    %400 = vector.broadcast %399 : f32 to vector<8x256xf32>
    %401 = arith.mulf %398, %400 : vector<8x256xf32>
    %402 = arith.addf %387, %401 : vector<8x256xf32>
    %c1_215 = arith.constant 1 : index
    %c26_216 = arith.constant 26 : index
    %403 = memref.load %arg1[%c1_215, %c26_216] : memref<3x27xf32, #tpu.memory_space<smem>>
    %404 = vector.broadcast %403 : f32 to vector<8x256xf32>
    %405 = arith.mulf %398, %404 : vector<8x256xf32>
    %406 = arith.addf %391, %405 : vector<8x256xf32>
    %c2_217 = arith.constant 2 : index
    %c26_218 = arith.constant 26 : index
    %407 = memref.load %arg1[%c2_217, %c26_218] : memref<3x27xf32, #tpu.memory_space<smem>>
    %408 = vector.broadcast %407 : f32 to vector<8x256xf32>
    %409 = arith.mulf %398, %408 : vector<8x256xf32>
    %410 = arith.addf %395, %409 : vector<8x256xf32>
    %cst = arith.constant 0.000000e+00 : f32
    %411 = vector.broadcast %cst : f32 to vector<8x256xf32>
    %412 = arith.maximumf %402, %411 : vector<8x256xf32>
    %cst_219 = arith.constant 0.000000e+00 : f32
    %413 = vector.broadcast %cst_219 : f32 to vector<8x256xf32>
    %414 = arith.maximumf %406, %413 : vector<8x256xf32>
    %cst_220 = arith.constant 0.000000e+00 : f32
    %415 = vector.broadcast %cst_220 : f32 to vector<8x256xf32>
    %416 = arith.maximumf %410, %415 : vector<8x256xf32>
    %417 = tpu.concatenate %412, %414, %416 in 1 : vector<8x256xf32>, vector<8x256xf32>, vector<8x256xf32> -> vector<8x768xf32>
    %c0_221 = arith.constant 0 : index
    %c0_222 = arith.constant 0 : index
    %418 = vector.load %arg5[%c0_221, %c0_222] : memref<768x8xf32, #tpu.memory_space<vmem>>, vector<768x8xf32>
    %cst_223 = arith.constant dense<0.000000e+00> : vector<8x8xf32>
    %419 = tpu.matmul %417, %418, %cst_223 {dimension_numbers = #tpu.dot_dimension_numbers<[1], [0], [0], [1], [0, 0, 1, 1], [], []>} : vector<8x768xf32>, vector<768x8xf32>, vector<8x8xf32> -> vector<8x8xf32>
    %c0_224 = arith.constant 0 : index
    %c0_225 = arith.constant 0 : index
    %420 = vector.load %arg6[%c0_224, %c0_225] : memref<1x8xf32, #tpu.memory_space<vmem>>, vector<1x8xf32>
    %421 = vector.broadcast %420 : vector<1x8xf32> to vector<8x8xf32>
    %422 = arith.addf %419, %421 : vector<8x8xf32>
    %cst_226 = arith.constant 0.000000e+00 : f32
    %423 = vector.broadcast %cst_226 : f32 to vector<8x8xf32>
    %424 = arith.maximumf %422, %423 : vector<8x8xf32>
    %c0_227 = arith.constant 0 : index
    %425 = memref.load %arg2[%c0_227] : memref<3xf32, #tpu.memory_space<smem>>
    %426 = vector.broadcast %425 : f32 to vector<8x256xf32>
    %c1_228 = arith.constant 1 : index
    %427 = memref.load %arg2[%c1_228] : memref<3xf32, #tpu.memory_space<smem>>
    %428 = vector.broadcast %427 : f32 to vector<8x256xf32>
    %c2_229 = arith.constant 2 : index
    %429 = memref.load %arg2[%c2_229] : memref<3xf32, #tpu.memory_space<smem>>
    %430 = vector.broadcast %429 : f32 to vector<8x256xf32>
    %c0_230 = arith.constant 0 : index
    %c0_231 = arith.constant 0 : index
    %c0_232 = arith.constant 0 : index
    %431 = vector.load %arg4[%c0_230, %c0_231, %c0_232] : memref<27x8x256xbf16, #tpu.memory_space<vmem>>, vector<1x8x256xbf16>
    %432 = vector.shape_cast %431 : vector<1x8x256xbf16> to vector<8x256xbf16>
    %433 = arith.extf %432 : vector<8x256xbf16> to vector<8x256xf32>
    %c0_233 = arith.constant 0 : index
    %c0_234 = arith.constant 0 : index
    %434 = memref.load %arg1[%c0_233, %c0_234] : memref<3x27xf32, #tpu.memory_space<smem>>
    %435 = vector.broadcast %434 : f32 to vector<8x256xf32>
    %436 = arith.mulf %433, %435 : vector<8x256xf32>
    %437 = arith.addf %426, %436 : vector<8x256xf32>
    %c1_235 = arith.constant 1 : index
    %c0_236 = arith.constant 0 : index
    %438 = memref.load %arg1[%c1_235, %c0_236] : memref<3x27xf32, #tpu.memory_space<smem>>
    %439 = vector.broadcast %438 : f32 to vector<8x256xf32>
    %440 = arith.mulf %433, %439 : vector<8x256xf32>
    %441 = arith.addf %428, %440 : vector<8x256xf32>
    %c2_237 = arith.constant 2 : index
    %c0_238 = arith.constant 0 : index
    %442 = memref.load %arg1[%c2_237, %c0_238] : memref<3x27xf32, #tpu.memory_space<smem>>
    %443 = vector.broadcast %442 : f32 to vector<8x256xf32>
    %444 = arith.mulf %433, %443 : vector<8x256xf32>
    %445 = arith.addf %430, %444 : vector<8x256xf32>
    %c1_239 = arith.constant 1 : index
    %c0_240 = arith.constant 0 : index
    %c0_241 = arith.constant 0 : index
    %446 = vector.load %arg4[%c1_239, %c0_240, %c0_241] : memref<27x8x256xbf16, #tpu.memory_space<vmem>>, vector<1x8x256xbf16>
    %447 = vector.shape_cast %446 : vector<1x8x256xbf16> to vector<8x256xbf16>
    %448 = arith.extf %447 : vector<8x256xbf16> to vector<8x256xf32>
    %c0_242 = arith.constant 0 : index
    %c1_243 = arith.constant 1 : index
    %449 = memref.load %arg1[%c0_242, %c1_243] : memref<3x27xf32, #tpu.memory_space<smem>>
    %450 = vector.broadcast %449 : f32 to vector<8x256xf32>
    %451 = arith.mulf %448, %450 : vector<8x256xf32>
    %452 = arith.addf %437, %451 : vector<8x256xf32>
    %c1_244 = arith.constant 1 : index
    %c1_245 = arith.constant 1 : index
    %453 = memref.load %arg1[%c1_244, %c1_245] : memref<3x27xf32, #tpu.memory_space<smem>>
    %454 = vector.broadcast %453 : f32 to vector<8x256xf32>
    %455 = arith.mulf %448, %454 : vector<8x256xf32>
    %456 = arith.addf %441, %455 : vector<8x256xf32>
    %c2_246 = arith.constant 2 : index
    %c1_247 = arith.constant 1 : index
    %457 = memref.load %arg1[%c2_246, %c1_247] : memref<3x27xf32, #tpu.memory_space<smem>>
    %458 = vector.broadcast %457 : f32 to vector<8x256xf32>
    %459 = arith.mulf %448, %458 : vector<8x256xf32>
    %460 = arith.addf %445, %459 : vector<8x256xf32>
    %c2_248 = arith.constant 2 : index
    %c0_249 = arith.constant 0 : index
    %c0_250 = arith.constant 0 : index
    %461 = vector.load %arg4[%c2_248, %c0_249, %c0_250] : memref<27x8x256xbf16, #tpu.memory_space<vmem>>, vector<1x8x256xbf16>
    %462 = vector.shape_cast %461 : vector<1x8x256xbf16> to vector<8x256xbf16>
    %463 = arith.extf %462 : vector<8x256xbf16> to vector<8x256xf32>
    %c0_251 = arith.constant 0 : index
    %c2_252 = arith.constant 2 : index
    %464 = memref.load %arg1[%c0_251, %c2_252] : memref<3x27xf32, #tpu.memory_space<smem>>
    %465 = vector.broadcast %464 : f32 to vector<8x256xf32>
    %466 = arith.mulf %463, %465 : vector<8x256xf32>
    %467 = arith.addf %452, %466 : vector<8x256xf32>
    %c1_253 = arith.constant 1 : index
    %c2_254 = arith.constant 2 : index
    %468 = memref.load %arg1[%c1_253, %c2_254] : memref<3x27xf32, #tpu.memory_space<smem>>
    %469 = vector.broadcast %468 : f32 to vector<8x256xf32>
    %470 = arith.mulf %463, %469 : vector<8x256xf32>
    %471 = arith.addf %456, %470 : vector<8x256xf32>
    %c2_255 = arith.constant 2 : index
    %c2_256 = arith.constant 2 : index
    %472 = memref.load %arg1[%c2_255, %c2_256] : memref<3x27xf32, #tpu.memory_space<smem>>
    %473 = vector.broadcast %472 : f32 to vector<8x256xf32>
    %474 = arith.mulf %463, %473 : vector<8x256xf32>
    %475 = arith.addf %460, %474 : vector<8x256xf32>
    %c3_257 = arith.constant 3 : index
    %c0_258 = arith.constant 0 : index
    %c0_259 = arith.constant 0 : index
    %476 = vector.load %arg4[%c3_257, %c0_258, %c0_259] : memref<27x8x256xbf16, #tpu.memory_space<vmem>>, vector<1x8x256xbf16>
    %477 = vector.shape_cast %476 : vector<1x8x256xbf16> to vector<8x256xbf16>
    %478 = arith.extf %477 : vector<8x256xbf16> to vector<8x256xf32>
    %c0_260 = arith.constant 0 : index
    %c3_261 = arith.constant 3 : index
    %479 = memref.load %arg1[%c0_260, %c3_261] : memref<3x27xf32, #tpu.memory_space<smem>>
    %480 = vector.broadcast %479 : f32 to vector<8x256xf32>
    %481 = arith.mulf %478, %480 : vector<8x256xf32>
    %482 = arith.addf %467, %481 : vector<8x256xf32>
    %c1_262 = arith.constant 1 : index
    %c3_263 = arith.constant 3 : index
    %483 = memref.load %arg1[%c1_262, %c3_263] : memref<3x27xf32, #tpu.memory_space<smem>>
    %484 = vector.broadcast %483 : f32 to vector<8x256xf32>
    %485 = arith.mulf %478, %484 : vector<8x256xf32>
    %486 = arith.addf %471, %485 : vector<8x256xf32>
    %c2_264 = arith.constant 2 : index
    %c3_265 = arith.constant 3 : index
    %487 = memref.load %arg1[%c2_264, %c3_265] : memref<3x27xf32, #tpu.memory_space<smem>>
    %488 = vector.broadcast %487 : f32 to vector<8x256xf32>
    %489 = arith.mulf %478, %488 : vector<8x256xf32>
    %490 = arith.addf %475, %489 : vector<8x256xf32>
    %c4_266 = arith.constant 4 : index
    %c0_267 = arith.constant 0 : index
    %c0_268 = arith.constant 0 : index
    %491 = vector.load %arg4[%c4_266, %c0_267, %c0_268] : memref<27x8x256xbf16, #tpu.memory_space<vmem>>, vector<1x8x256xbf16>
    %492 = vector.shape_cast %491 : vector<1x8x256xbf16> to vector<8x256xbf16>
    %493 = arith.extf %492 : vector<8x256xbf16> to vector<8x256xf32>
    %c0_269 = arith.constant 0 : index
    %c4_270 = arith.constant 4 : index
    %494 = memref.load %arg1[%c0_269, %c4_270] : memref<3x27xf32, #tpu.memory_space<smem>>
    %495 = vector.broadcast %494 : f32 to vector<8x256xf32>
    %496 = arith.mulf %493, %495 : vector<8x256xf32>
    %497 = arith.addf %482, %496 : vector<8x256xf32>
    %c1_271 = arith.constant 1 : index
    %c4_272 = arith.constant 4 : index
    %498 = memref.load %arg1[%c1_271, %c4_272] : memref<3x27xf32, #tpu.memory_space<smem>>
    %499 = vector.broadcast %498 : f32 to vector<8x256xf32>
    %500 = arith.mulf %493, %499 : vector<8x256xf32>
    %501 = arith.addf %486, %500 : vector<8x256xf32>
    %c2_273 = arith.constant 2 : index
    %c4_274 = arith.constant 4 : index
    %502 = memref.load %arg1[%c2_273, %c4_274] : memref<3x27xf32, #tpu.memory_space<smem>>
    %503 = vector.broadcast %502 : f32 to vector<8x256xf32>
    %504 = arith.mulf %493, %503 : vector<8x256xf32>
    %505 = arith.addf %490, %504 : vector<8x256xf32>
    %c5_275 = arith.constant 5 : index
    %c0_276 = arith.constant 0 : index
    %c0_277 = arith.constant 0 : index
    %506 = vector.load %arg4[%c5_275, %c0_276, %c0_277] : memref<27x8x256xbf16, #tpu.memory_space<vmem>>, vector<1x8x256xbf16>
    %507 = vector.shape_cast %506 : vector<1x8x256xbf16> to vector<8x256xbf16>
    %508 = arith.extf %507 : vector<8x256xbf16> to vector<8x256xf32>
    %c0_278 = arith.constant 0 : index
    %c5_279 = arith.constant 5 : index
    %509 = memref.load %arg1[%c0_278, %c5_279] : memref<3x27xf32, #tpu.memory_space<smem>>
    %510 = vector.broadcast %509 : f32 to vector<8x256xf32>
    %511 = arith.mulf %508, %510 : vector<8x256xf32>
    %512 = arith.addf %497, %511 : vector<8x256xf32>
    %c1_280 = arith.constant 1 : index
    %c5_281 = arith.constant 5 : index
    %513 = memref.load %arg1[%c1_280, %c5_281] : memref<3x27xf32, #tpu.memory_space<smem>>
    %514 = vector.broadcast %513 : f32 to vector<8x256xf32>
    %515 = arith.mulf %508, %514 : vector<8x256xf32>
    %516 = arith.addf %501, %515 : vector<8x256xf32>
    %c2_282 = arith.constant 2 : index
    %c5_283 = arith.constant 5 : index
    %517 = memref.load %arg1[%c2_282, %c5_283] : memref<3x27xf32, #tpu.memory_space<smem>>
    %518 = vector.broadcast %517 : f32 to vector<8x256xf32>
    %519 = arith.mulf %508, %518 : vector<8x256xf32>
    %520 = arith.addf %505, %519 : vector<8x256xf32>
    %c6_284 = arith.constant 6 : index
    %c0_285 = arith.constant 0 : index
    %c0_286 = arith.constant 0 : index
    %521 = vector.load %arg4[%c6_284, %c0_285, %c0_286] : memref<27x8x256xbf16, #tpu.memory_space<vmem>>, vector<1x8x256xbf16>
    %522 = vector.shape_cast %521 : vector<1x8x256xbf16> to vector<8x256xbf16>
    %523 = arith.extf %522 : vector<8x256xbf16> to vector<8x256xf32>
    %c0_287 = arith.constant 0 : index
    %c6_288 = arith.constant 6 : index
    %524 = memref.load %arg1[%c0_287, %c6_288] : memref<3x27xf32, #tpu.memory_space<smem>>
    %525 = vector.broadcast %524 : f32 to vector<8x256xf32>
    %526 = arith.mulf %523, %525 : vector<8x256xf32>
    %527 = arith.addf %512, %526 : vector<8x256xf32>
    %c1_289 = arith.constant 1 : index
    %c6_290 = arith.constant 6 : index
    %528 = memref.load %arg1[%c1_289, %c6_290] : memref<3x27xf32, #tpu.memory_space<smem>>
    %529 = vector.broadcast %528 : f32 to vector<8x256xf32>
    %530 = arith.mulf %523, %529 : vector<8x256xf32>
    %531 = arith.addf %516, %530 : vector<8x256xf32>
    %c2_291 = arith.constant 2 : index
    %c6_292 = arith.constant 6 : index
    %532 = memref.load %arg1[%c2_291, %c6_292] : memref<3x27xf32, #tpu.memory_space<smem>>
    %533 = vector.broadcast %532 : f32 to vector<8x256xf32>
    %534 = arith.mulf %523, %533 : vector<8x256xf32>
    %535 = arith.addf %520, %534 : vector<8x256xf32>
    %c7_293 = arith.constant 7 : index
    %c0_294 = arith.constant 0 : index
    %c0_295 = arith.constant 0 : index
    %536 = vector.load %arg4[%c7_293, %c0_294, %c0_295] : memref<27x8x256xbf16, #tpu.memory_space<vmem>>, vector<1x8x256xbf16>
    %537 = vector.shape_cast %536 : vector<1x8x256xbf16> to vector<8x256xbf16>
    %538 = arith.extf %537 : vector<8x256xbf16> to vector<8x256xf32>
    %c0_296 = arith.constant 0 : index
    %c7_297 = arith.constant 7 : index
    %539 = memref.load %arg1[%c0_296, %c7_297] : memref<3x27xf32, #tpu.memory_space<smem>>
    %540 = vector.broadcast %539 : f32 to vector<8x256xf32>
    %541 = arith.mulf %538, %540 : vector<8x256xf32>
    %542 = arith.addf %527, %541 : vector<8x256xf32>
    %c1_298 = arith.constant 1 : index
    %c7_299 = arith.constant 7 : index
    %543 = memref.load %arg1[%c1_298, %c7_299] : memref<3x27xf32, #tpu.memory_space<smem>>
    %544 = vector.broadcast %543 : f32 to vector<8x256xf32>
    %545 = arith.mulf %538, %544 : vector<8x256xf32>
    %546 = arith.addf %531, %545 : vector<8x256xf32>
    %c2_300 = arith.constant 2 : index
    %c7_301 = arith.constant 7 : index
    %547 = memref.load %arg1[%c2_300, %c7_301] : memref<3x27xf32, #tpu.memory_space<smem>>
    %548 = vector.broadcast %547 : f32 to vector<8x256xf32>
    %549 = arith.mulf %538, %548 : vector<8x256xf32>
    %550 = arith.addf %535, %549 : vector<8x256xf32>
    %c8_302 = arith.constant 8 : index
    %c0_303 = arith.constant 0 : index
    %c0_304 = arith.constant 0 : index
    %551 = vector.load %arg4[%c8_302, %c0_303, %c0_304] : memref<27x8x256xbf16, #tpu.memory_space<vmem>>, vector<1x8x256xbf16>
    %552 = vector.shape_cast %551 : vector<1x8x256xbf16> to vector<8x256xbf16>
    %553 = arith.extf %552 : vector<8x256xbf16> to vector<8x256xf32>
    %c0_305 = arith.constant 0 : index
    %c8_306 = arith.constant 8 : index
    %554 = memref.load %arg1[%c0_305, %c8_306] : memref<3x27xf32, #tpu.memory_space<smem>>
    %555 = vector.broadcast %554 : f32 to vector<8x256xf32>
    %556 = arith.mulf %553, %555 : vector<8x256xf32>
    %557 = arith.addf %542, %556 : vector<8x256xf32>
    %c1_307 = arith.constant 1 : index
    %c8_308 = arith.constant 8 : index
    %558 = memref.load %arg1[%c1_307, %c8_308] : memref<3x27xf32, #tpu.memory_space<smem>>
    %559 = vector.broadcast %558 : f32 to vector<8x256xf32>
    %560 = arith.mulf %553, %559 : vector<8x256xf32>
    %561 = arith.addf %546, %560 : vector<8x256xf32>
    %c2_309 = arith.constant 2 : index
    %c8_310 = arith.constant 8 : index
    %562 = memref.load %arg1[%c2_309, %c8_310] : memref<3x27xf32, #tpu.memory_space<smem>>
    %563 = vector.broadcast %562 : f32 to vector<8x256xf32>
    %564 = arith.mulf %553, %563 : vector<8x256xf32>
    %565 = arith.addf %550, %564 : vector<8x256xf32>
    %c9_311 = arith.constant 9 : index
    %c0_312 = arith.constant 0 : index
    %c0_313 = arith.constant 0 : index
    %566 = vector.load %arg4[%c9_311, %c0_312, %c0_313] : memref<27x8x256xbf16, #tpu.memory_space<vmem>>, vector<1x8x256xbf16>
    %567 = vector.shape_cast %566 : vector<1x8x256xbf16> to vector<8x256xbf16>
    %568 = arith.extf %567 : vector<8x256xbf16> to vector<8x256xf32>
    %c0_314 = arith.constant 0 : index
    %c9_315 = arith.constant 9 : index
    %569 = memref.load %arg1[%c0_314, %c9_315] : memref<3x27xf32, #tpu.memory_space<smem>>
    %570 = vector.broadcast %569 : f32 to vector<8x256xf32>
    %571 = arith.mulf %568, %570 : vector<8x256xf32>
    %572 = arith.addf %557, %571 : vector<8x256xf32>
    %c1_316 = arith.constant 1 : index
    %c9_317 = arith.constant 9 : index
    %573 = memref.load %arg1[%c1_316, %c9_317] : memref<3x27xf32, #tpu.memory_space<smem>>
    %574 = vector.broadcast %573 : f32 to vector<8x256xf32>
    %575 = arith.mulf %568, %574 : vector<8x256xf32>
    %576 = arith.addf %561, %575 : vector<8x256xf32>
    %c2_318 = arith.constant 2 : index
    %c9_319 = arith.constant 9 : index
    %577 = memref.load %arg1[%c2_318, %c9_319] : memref<3x27xf32, #tpu.memory_space<smem>>
    %578 = vector.broadcast %577 : f32 to vector<8x256xf32>
    %579 = arith.mulf %568, %578 : vector<8x256xf32>
    %580 = arith.addf %565, %579 : vector<8x256xf32>
    %c10_320 = arith.constant 10 : index
    %c0_321 = arith.constant 0 : index
    %c0_322 = arith.constant 0 : index
    %581 = vector.load %arg4[%c10_320, %c0_321, %c0_322] : memref<27x8x256xbf16, #tpu.memory_space<vmem>>, vector<1x8x256xbf16>
    %582 = vector.shape_cast %581 : vector<1x8x256xbf16> to vector<8x256xbf16>
    %583 = arith.extf %582 : vector<8x256xbf16> to vector<8x256xf32>
    %c0_323 = arith.constant 0 : index
    %c10_324 = arith.constant 10 : index
    %584 = memref.load %arg1[%c0_323, %c10_324] : memref<3x27xf32, #tpu.memory_space<smem>>
    %585 = vector.broadcast %584 : f32 to vector<8x256xf32>
    %586 = arith.mulf %583, %585 : vector<8x256xf32>
    %587 = arith.addf %572, %586 : vector<8x256xf32>
    %c1_325 = arith.constant 1 : index
    %c10_326 = arith.constant 10 : index
    %588 = memref.load %arg1[%c1_325, %c10_326] : memref<3x27xf32, #tpu.memory_space<smem>>
    %589 = vector.broadcast %588 : f32 to vector<8x256xf32>
    %590 = arith.mulf %583, %589 : vector<8x256xf32>
    %591 = arith.addf %576, %590 : vector<8x256xf32>
    %c2_327 = arith.constant 2 : index
    %c10_328 = arith.constant 10 : index
    %592 = memref.load %arg1[%c2_327, %c10_328] : memref<3x27xf32, #tpu.memory_space<smem>>
    %593 = vector.broadcast %592 : f32 to vector<8x256xf32>
    %594 = arith.mulf %583, %593 : vector<8x256xf32>
    %595 = arith.addf %580, %594 : vector<8x256xf32>
    %c11_329 = arith.constant 11 : index
    %c0_330 = arith.constant 0 : index
    %c0_331 = arith.constant 0 : index
    %596 = vector.load %arg4[%c11_329, %c0_330, %c0_331] : memref<27x8x256xbf16, #tpu.memory_space<vmem>>, vector<1x8x256xbf16>
    %597 = vector.shape_cast %596 : vector<1x8x256xbf16> to vector<8x256xbf16>
    %598 = arith.extf %597 : vector<8x256xbf16> to vector<8x256xf32>
    %c0_332 = arith.constant 0 : index
    %c11_333 = arith.constant 11 : index
    %599 = memref.load %arg1[%c0_332, %c11_333] : memref<3x27xf32, #tpu.memory_space<smem>>
    %600 = vector.broadcast %599 : f32 to vector<8x256xf32>
    %601 = arith.mulf %598, %600 : vector<8x256xf32>
    %602 = arith.addf %587, %601 : vector<8x256xf32>
    %c1_334 = arith.constant 1 : index
    %c11_335 = arith.constant 11 : index
    %603 = memref.load %arg1[%c1_334, %c11_335] : memref<3x27xf32, #tpu.memory_space<smem>>
    %604 = vector.broadcast %603 : f32 to vector<8x256xf32>
    %605 = arith.mulf %598, %604 : vector<8x256xf32>
    %606 = arith.addf %591, %605 : vector<8x256xf32>
    %c2_336 = arith.constant 2 : index
    %c11_337 = arith.constant 11 : index
    %607 = memref.load %arg1[%c2_336, %c11_337] : memref<3x27xf32, #tpu.memory_space<smem>>
    %608 = vector.broadcast %607 : f32 to vector<8x256xf32>
    %609 = arith.mulf %598, %608 : vector<8x256xf32>
    %610 = arith.addf %595, %609 : vector<8x256xf32>
    %c12_338 = arith.constant 12 : index
    %c0_339 = arith.constant 0 : index
    %c0_340 = arith.constant 0 : index
    %611 = vector.load %arg4[%c12_338, %c0_339, %c0_340] : memref<27x8x256xbf16, #tpu.memory_space<vmem>>, vector<1x8x256xbf16>
    %612 = vector.shape_cast %611 : vector<1x8x256xbf16> to vector<8x256xbf16>
    %613 = arith.extf %612 : vector<8x256xbf16> to vector<8x256xf32>
    %c0_341 = arith.constant 0 : index
    %c12_342 = arith.constant 12 : index
    %614 = memref.load %arg1[%c0_341, %c12_342] : memref<3x27xf32, #tpu.memory_space<smem>>
    %615 = vector.broadcast %614 : f32 to vector<8x256xf32>
    %616 = arith.mulf %613, %615 : vector<8x256xf32>
    %617 = arith.addf %602, %616 : vector<8x256xf32>
    %c1_343 = arith.constant 1 : index
    %c12_344 = arith.constant 12 : index
    %618 = memref.load %arg1[%c1_343, %c12_344] : memref<3x27xf32, #tpu.memory_space<smem>>
    %619 = vector.broadcast %618 : f32 to vector<8x256xf32>
    %620 = arith.mulf %613, %619 : vector<8x256xf32>
    %621 = arith.addf %606, %620 : vector<8x256xf32>
    %c2_345 = arith.constant 2 : index
    %c12_346 = arith.constant 12 : index
    %622 = memref.load %arg1[%c2_345, %c12_346] : memref<3x27xf32, #tpu.memory_space<smem>>
    %623 = vector.broadcast %622 : f32 to vector<8x256xf32>
    %624 = arith.mulf %613, %623 : vector<8x256xf32>
    %625 = arith.addf %610, %624 : vector<8x256xf32>
    %c13_347 = arith.constant 13 : index
    %c0_348 = arith.constant 0 : index
    %c0_349 = arith.constant 0 : index
    %626 = vector.load %arg4[%c13_347, %c0_348, %c0_349] : memref<27x8x256xbf16, #tpu.memory_space<vmem>>, vector<1x8x256xbf16>
    %627 = vector.shape_cast %626 : vector<1x8x256xbf16> to vector<8x256xbf16>
    %628 = arith.extf %627 : vector<8x256xbf16> to vector<8x256xf32>
    %c0_350 = arith.constant 0 : index
    %c13_351 = arith.constant 13 : index
    %629 = memref.load %arg1[%c0_350, %c13_351] : memref<3x27xf32, #tpu.memory_space<smem>>
    %630 = vector.broadcast %629 : f32 to vector<8x256xf32>
    %631 = arith.mulf %628, %630 : vector<8x256xf32>
    %632 = arith.addf %617, %631 : vector<8x256xf32>
    %c1_352 = arith.constant 1 : index
    %c13_353 = arith.constant 13 : index
    %633 = memref.load %arg1[%c1_352, %c13_353] : memref<3x27xf32, #tpu.memory_space<smem>>
    %634 = vector.broadcast %633 : f32 to vector<8x256xf32>
    %635 = arith.mulf %628, %634 : vector<8x256xf32>
    %636 = arith.addf %621, %635 : vector<8x256xf32>
    %c2_354 = arith.constant 2 : index
    %c13_355 = arith.constant 13 : index
    %637 = memref.load %arg1[%c2_354, %c13_355] : memref<3x27xf32, #tpu.memory_space<smem>>
    %638 = vector.broadcast %637 : f32 to vector<8x256xf32>
    %639 = arith.mulf %628, %638 : vector<8x256xf32>
    %640 = arith.addf %625, %639 : vector<8x256xf32>
    %c14_356 = arith.constant 14 : index
    %c0_357 = arith.constant 0 : index
    %c0_358 = arith.constant 0 : index
    %641 = vector.load %arg4[%c14_356, %c0_357, %c0_358] : memref<27x8x256xbf16, #tpu.memory_space<vmem>>, vector<1x8x256xbf16>
    %642 = vector.shape_cast %641 : vector<1x8x256xbf16> to vector<8x256xbf16>
    %643 = arith.extf %642 : vector<8x256xbf16> to vector<8x256xf32>
    %c0_359 = arith.constant 0 : index
    %c14_360 = arith.constant 14 : index
    %644 = memref.load %arg1[%c0_359, %c14_360] : memref<3x27xf32, #tpu.memory_space<smem>>
    %645 = vector.broadcast %644 : f32 to vector<8x256xf32>
    %646 = arith.mulf %643, %645 : vector<8x256xf32>
    %647 = arith.addf %632, %646 : vector<8x256xf32>
    %c1_361 = arith.constant 1 : index
    %c14_362 = arith.constant 14 : index
    %648 = memref.load %arg1[%c1_361, %c14_362] : memref<3x27xf32, #tpu.memory_space<smem>>
    %649 = vector.broadcast %648 : f32 to vector<8x256xf32>
    %650 = arith.mulf %643, %649 : vector<8x256xf32>
    %651 = arith.addf %636, %650 : vector<8x256xf32>
    %c2_363 = arith.constant 2 : index
    %c14_364 = arith.constant 14 : index
    %652 = memref.load %arg1[%c2_363, %c14_364] : memref<3x27xf32, #tpu.memory_space<smem>>
    %653 = vector.broadcast %652 : f32 to vector<8x256xf32>
    %654 = arith.mulf %643, %653 : vector<8x256xf32>
    %655 = arith.addf %640, %654 : vector<8x256xf32>
    %c15_365 = arith.constant 15 : index
    %c0_366 = arith.constant 0 : index
    %c0_367 = arith.constant 0 : index
    %656 = vector.load %arg4[%c15_365, %c0_366, %c0_367] : memref<27x8x256xbf16, #tpu.memory_space<vmem>>, vector<1x8x256xbf16>
    %657 = vector.shape_cast %656 : vector<1x8x256xbf16> to vector<8x256xbf16>
    %658 = arith.extf %657 : vector<8x256xbf16> to vector<8x256xf32>
    %c0_368 = arith.constant 0 : index
    %c15_369 = arith.constant 15 : index
    %659 = memref.load %arg1[%c0_368, %c15_369] : memref<3x27xf32, #tpu.memory_space<smem>>
    %660 = vector.broadcast %659 : f32 to vector<8x256xf32>
    %661 = arith.mulf %658, %660 : vector<8x256xf32>
    %662 = arith.addf %647, %661 : vector<8x256xf32>
    %c1_370 = arith.constant 1 : index
    %c15_371 = arith.constant 15 : index
    %663 = memref.load %arg1[%c1_370, %c15_371] : memref<3x27xf32, #tpu.memory_space<smem>>
    %664 = vector.broadcast %663 : f32 to vector<8x256xf32>
    %665 = arith.mulf %658, %664 : vector<8x256xf32>
    %666 = arith.addf %651, %665 : vector<8x256xf32>
    %c2_372 = arith.constant 2 : index
    %c15_373 = arith.constant 15 : index
    %667 = memref.load %arg1[%c2_372, %c15_373] : memref<3x27xf32, #tpu.memory_space<smem>>
    %668 = vector.broadcast %667 : f32 to vector<8x256xf32>
    %669 = arith.mulf %658, %668 : vector<8x256xf32>
    %670 = arith.addf %655, %669 : vector<8x256xf32>
    %c16_374 = arith.constant 16 : index
    %c0_375 = arith.constant 0 : index
    %c0_376 = arith.constant 0 : index
    %671 = vector.load %arg4[%c16_374, %c0_375, %c0_376] : memref<27x8x256xbf16, #tpu.memory_space<vmem>>, vector<1x8x256xbf16>
    %672 = vector.shape_cast %671 : vector<1x8x256xbf16> to vector<8x256xbf16>
    %673 = arith.extf %672 : vector<8x256xbf16> to vector<8x256xf32>
    %c0_377 = arith.constant 0 : index
    %c16_378 = arith.constant 16 : index
    %674 = memref.load %arg1[%c0_377, %c16_378] : memref<3x27xf32, #tpu.memory_space<smem>>
    %675 = vector.broadcast %674 : f32 to vector<8x256xf32>
    %676 = arith.mulf %673, %675 : vector<8x256xf32>
    %677 = arith.addf %662, %676 : vector<8x256xf32>
    %c1_379 = arith.constant 1 : index
    %c16_380 = arith.constant 16 : index
    %678 = memref.load %arg1[%c1_379, %c16_380] : memref<3x27xf32, #tpu.memory_space<smem>>
    %679 = vector.broadcast %678 : f32 to vector<8x256xf32>
    %680 = arith.mulf %673, %679 : vector<8x256xf32>
    %681 = arith.addf %666, %680 : vector<8x256xf32>
    %c2_381 = arith.constant 2 : index
    %c16_382 = arith.constant 16 : index
    %682 = memref.load %arg1[%c2_381, %c16_382] : memref<3x27xf32, #tpu.memory_space<smem>>
    %683 = vector.broadcast %682 : f32 to vector<8x256xf32>
    %684 = arith.mulf %673, %683 : vector<8x256xf32>
    %685 = arith.addf %670, %684 : vector<8x256xf32>
    %c17_383 = arith.constant 17 : index
    %c0_384 = arith.constant 0 : index
    %c0_385 = arith.constant 0 : index
    %686 = vector.load %arg4[%c17_383, %c0_384, %c0_385] : memref<27x8x256xbf16, #tpu.memory_space<vmem>>, vector<1x8x256xbf16>
    %687 = vector.shape_cast %686 : vector<1x8x256xbf16> to vector<8x256xbf16>
    %688 = arith.extf %687 : vector<8x256xbf16> to vector<8x256xf32>
    %c0_386 = arith.constant 0 : index
    %c17_387 = arith.constant 17 : index
    %689 = memref.load %arg1[%c0_386, %c17_387] : memref<3x27xf32, #tpu.memory_space<smem>>
    %690 = vector.broadcast %689 : f32 to vector<8x256xf32>
    %691 = arith.mulf %688, %690 : vector<8x256xf32>
    %692 = arith.addf %677, %691 : vector<8x256xf32>
    %c1_388 = arith.constant 1 : index
    %c17_389 = arith.constant 17 : index
    %693 = memref.load %arg1[%c1_388, %c17_389] : memref<3x27xf32, #tpu.memory_space<smem>>
    %694 = vector.broadcast %693 : f32 to vector<8x256xf32>
    %695 = arith.mulf %688, %694 : vector<8x256xf32>
    %696 = arith.addf %681, %695 : vector<8x256xf32>
    %c2_390 = arith.constant 2 : index
    %c17_391 = arith.constant 17 : index
    %697 = memref.load %arg1[%c2_390, %c17_391] : memref<3x27xf32, #tpu.memory_space<smem>>
    %698 = vector.broadcast %697 : f32 to vector<8x256xf32>
    %699 = arith.mulf %688, %698 : vector<8x256xf32>
    %700 = arith.addf %685, %699 : vector<8x256xf32>
    %c18_392 = arith.constant 18 : index
    %c0_393 = arith.constant 0 : index
    %c0_394 = arith.constant 0 : index
    %701 = vector.load %arg4[%c18_392, %c0_393, %c0_394] : memref<27x8x256xbf16, #tpu.memory_space<vmem>>, vector<1x8x256xbf16>
    %702 = vector.shape_cast %701 : vector<1x8x256xbf16> to vector<8x256xbf16>
    %703 = arith.extf %702 : vector<8x256xbf16> to vector<8x256xf32>
    %c0_395 = arith.constant 0 : index
    %c18_396 = arith.constant 18 : index
    %704 = memref.load %arg1[%c0_395, %c18_396] : memref<3x27xf32, #tpu.memory_space<smem>>
    %705 = vector.broadcast %704 : f32 to vector<8x256xf32>
    %706 = arith.mulf %703, %705 : vector<8x256xf32>
    %707 = arith.addf %692, %706 : vector<8x256xf32>
    %c1_397 = arith.constant 1 : index
    %c18_398 = arith.constant 18 : index
    %708 = memref.load %arg1[%c1_397, %c18_398] : memref<3x27xf32, #tpu.memory_space<smem>>
    %709 = vector.broadcast %708 : f32 to vector<8x256xf32>
    %710 = arith.mulf %703, %709 : vector<8x256xf32>
    %711 = arith.addf %696, %710 : vector<8x256xf32>
    %c2_399 = arith.constant 2 : index
    %c18_400 = arith.constant 18 : index
    %712 = memref.load %arg1[%c2_399, %c18_400] : memref<3x27xf32, #tpu.memory_space<smem>>
    %713 = vector.broadcast %712 : f32 to vector<8x256xf32>
    %714 = arith.mulf %703, %713 : vector<8x256xf32>
    %715 = arith.addf %700, %714 : vector<8x256xf32>
    %c19_401 = arith.constant 19 : index
    %c0_402 = arith.constant 0 : index
    %c0_403 = arith.constant 0 : index
    %716 = vector.load %arg4[%c19_401, %c0_402, %c0_403] : memref<27x8x256xbf16, #tpu.memory_space<vmem>>, vector<1x8x256xbf16>
    %717 = vector.shape_cast %716 : vector<1x8x256xbf16> to vector<8x256xbf16>
    %718 = arith.extf %717 : vector<8x256xbf16> to vector<8x256xf32>
    %c0_404 = arith.constant 0 : index
    %c19_405 = arith.constant 19 : index
    %719 = memref.load %arg1[%c0_404, %c19_405] : memref<3x27xf32, #tpu.memory_space<smem>>
    %720 = vector.broadcast %719 : f32 to vector<8x256xf32>
    %721 = arith.mulf %718, %720 : vector<8x256xf32>
    %722 = arith.addf %707, %721 : vector<8x256xf32>
    %c1_406 = arith.constant 1 : index
    %c19_407 = arith.constant 19 : index
    %723 = memref.load %arg1[%c1_406, %c19_407] : memref<3x27xf32, #tpu.memory_space<smem>>
    %724 = vector.broadcast %723 : f32 to vector<8x256xf32>
    %725 = arith.mulf %718, %724 : vector<8x256xf32>
    %726 = arith.addf %711, %725 : vector<8x256xf32>
    %c2_408 = arith.constant 2 : index
    %c19_409 = arith.constant 19 : index
    %727 = memref.load %arg1[%c2_408, %c19_409] : memref<3x27xf32, #tpu.memory_space<smem>>
    %728 = vector.broadcast %727 : f32 to vector<8x256xf32>
    %729 = arith.mulf %718, %728 : vector<8x256xf32>
    %730 = arith.addf %715, %729 : vector<8x256xf32>
    %c20_410 = arith.constant 20 : index
    %c0_411 = arith.constant 0 : index
    %c0_412 = arith.constant 0 : index
    %731 = vector.load %arg4[%c20_410, %c0_411, %c0_412] : memref<27x8x256xbf16, #tpu.memory_space<vmem>>, vector<1x8x256xbf16>
    %732 = vector.shape_cast %731 : vector<1x8x256xbf16> to vector<8x256xbf16>
    %733 = arith.extf %732 : vector<8x256xbf16> to vector<8x256xf32>
    %c0_413 = arith.constant 0 : index
    %c20_414 = arith.constant 20 : index
    %734 = memref.load %arg1[%c0_413, %c20_414] : memref<3x27xf32, #tpu.memory_space<smem>>
    %735 = vector.broadcast %734 : f32 to vector<8x256xf32>
    %736 = arith.mulf %733, %735 : vector<8x256xf32>
    %737 = arith.addf %722, %736 : vector<8x256xf32>
    %c1_415 = arith.constant 1 : index
    %c20_416 = arith.constant 20 : index
    %738 = memref.load %arg1[%c1_415, %c20_416] : memref<3x27xf32, #tpu.memory_space<smem>>
    %739 = vector.broadcast %738 : f32 to vector<8x256xf32>
    %740 = arith.mulf %733, %739 : vector<8x256xf32>
    %741 = arith.addf %726, %740 : vector<8x256xf32>
    %c2_417 = arith.constant 2 : index
    %c20_418 = arith.constant 20 : index
    %742 = memref.load %arg1[%c2_417, %c20_418] : memref<3x27xf32, #tpu.memory_space<smem>>
    %743 = vector.broadcast %742 : f32 to vector<8x256xf32>
    %744 = arith.mulf %733, %743 : vector<8x256xf32>
    %745 = arith.addf %730, %744 : vector<8x256xf32>
    %c21_419 = arith.constant 21 : index
    %c0_420 = arith.constant 0 : index
    %c0_421 = arith.constant 0 : index
    %746 = vector.load %arg4[%c21_419, %c0_420, %c0_421] : memref<27x8x256xbf16, #tpu.memory_space<vmem>>, vector<1x8x256xbf16>
    %747 = vector.shape_cast %746 : vector<1x8x256xbf16> to vector<8x256xbf16>
    %748 = arith.extf %747 : vector<8x256xbf16> to vector<8x256xf32>
    %c0_422 = arith.constant 0 : index
    %c21_423 = arith.constant 21 : index
    %749 = memref.load %arg1[%c0_422, %c21_423] : memref<3x27xf32, #tpu.memory_space<smem>>
    %750 = vector.broadcast %749 : f32 to vector<8x256xf32>
    %751 = arith.mulf %748, %750 : vector<8x256xf32>
    %752 = arith.addf %737, %751 : vector<8x256xf32>
    %c1_424 = arith.constant 1 : index
    %c21_425 = arith.constant 21 : index
    %753 = memref.load %arg1[%c1_424, %c21_425] : memref<3x27xf32, #tpu.memory_space<smem>>
    %754 = vector.broadcast %753 : f32 to vector<8x256xf32>
    %755 = arith.mulf %748, %754 : vector<8x256xf32>
    %756 = arith.addf %741, %755 : vector<8x256xf32>
    %c2_426 = arith.constant 2 : index
    %c21_427 = arith.constant 21 : index
    %757 = memref.load %arg1[%c2_426, %c21_427] : memref<3x27xf32, #tpu.memory_space<smem>>
    %758 = vector.broadcast %757 : f32 to vector<8x256xf32>
    %759 = arith.mulf %748, %758 : vector<8x256xf32>
    %760 = arith.addf %745, %759 : vector<8x256xf32>
    %c22_428 = arith.constant 22 : index
    %c0_429 = arith.constant 0 : index
    %c0_430 = arith.constant 0 : index
    %761 = vector.load %arg4[%c22_428, %c0_429, %c0_430] : memref<27x8x256xbf16, #tpu.memory_space<vmem>>, vector<1x8x256xbf16>
    %762 = vector.shape_cast %761 : vector<1x8x256xbf16> to vector<8x256xbf16>
    %763 = arith.extf %762 : vector<8x256xbf16> to vector<8x256xf32>
    %c0_431 = arith.constant 0 : index
    %c22_432 = arith.constant 22 : index
    %764 = memref.load %arg1[%c0_431, %c22_432] : memref<3x27xf32, #tpu.memory_space<smem>>
    %765 = vector.broadcast %764 : f32 to vector<8x256xf32>
    %766 = arith.mulf %763, %765 : vector<8x256xf32>
    %767 = arith.addf %752, %766 : vector<8x256xf32>
    %c1_433 = arith.constant 1 : index
    %c22_434 = arith.constant 22 : index
    %768 = memref.load %arg1[%c1_433, %c22_434] : memref<3x27xf32, #tpu.memory_space<smem>>
    %769 = vector.broadcast %768 : f32 to vector<8x256xf32>
    %770 = arith.mulf %763, %769 : vector<8x256xf32>
    %771 = arith.addf %756, %770 : vector<8x256xf32>
    %c2_435 = arith.constant 2 : index
    %c22_436 = arith.constant 22 : index
    %772 = memref.load %arg1[%c2_435, %c22_436] : memref<3x27xf32, #tpu.memory_space<smem>>
    %773 = vector.broadcast %772 : f32 to vector<8x256xf32>
    %774 = arith.mulf %763, %773 : vector<8x256xf32>
    %775 = arith.addf %760, %774 : vector<8x256xf32>
    %c23_437 = arith.constant 23 : index
    %c0_438 = arith.constant 0 : index
    %c0_439 = arith.constant 0 : index
    %776 = vector.load %arg4[%c23_437, %c0_438, %c0_439] : memref<27x8x256xbf16, #tpu.memory_space<vmem>>, vector<1x8x256xbf16>
    %777 = vector.shape_cast %776 : vector<1x8x256xbf16> to vector<8x256xbf16>
    %778 = arith.extf %777 : vector<8x256xbf16> to vector<8x256xf32>
    %c0_440 = arith.constant 0 : index
    %c23_441 = arith.constant 23 : index
    %779 = memref.load %arg1[%c0_440, %c23_441] : memref<3x27xf32, #tpu.memory_space<smem>>
    %780 = vector.broadcast %779 : f32 to vector<8x256xf32>
    %781 = arith.mulf %778, %780 : vector<8x256xf32>
    %782 = arith.addf %767, %781 : vector<8x256xf32>
    %c1_442 = arith.constant 1 : index
    %c23_443 = arith.constant 23 : index
    %783 = memref.load %arg1[%c1_442, %c23_443] : memref<3x27xf32, #tpu.memory_space<smem>>
    %784 = vector.broadcast %783 : f32 to vector<8x256xf32>
    %785 = arith.mulf %778, %784 : vector<8x256xf32>
    %786 = arith.addf %771, %785 : vector<8x256xf32>
    %c2_444 = arith.constant 2 : index
    %c23_445 = arith.constant 23 : index
    %787 = memref.load %arg1[%c2_444, %c23_445] : memref<3x27xf32, #tpu.memory_space<smem>>
    %788 = vector.broadcast %787 : f32 to vector<8x256xf32>
    %789 = arith.mulf %778, %788 : vector<8x256xf32>
    %790 = arith.addf %775, %789 : vector<8x256xf32>
    %c24_446 = arith.constant 24 : index
    %c0_447 = arith.constant 0 : index
    %c0_448 = arith.constant 0 : index
    %791 = vector.load %arg4[%c24_446, %c0_447, %c0_448] : memref<27x8x256xbf16, #tpu.memory_space<vmem>>, vector<1x8x256xbf16>
    %792 = vector.shape_cast %791 : vector<1x8x256xbf16> to vector<8x256xbf16>
    %793 = arith.extf %792 : vector<8x256xbf16> to vector<8x256xf32>
    %c0_449 = arith.constant 0 : index
    %c24_450 = arith.constant 24 : index
    %794 = memref.load %arg1[%c0_449, %c24_450] : memref<3x27xf32, #tpu.memory_space<smem>>
    %795 = vector.broadcast %794 : f32 to vector<8x256xf32>
    %796 = arith.mulf %793, %795 : vector<8x256xf32>
    %797 = arith.addf %782, %796 : vector<8x256xf32>
    %c1_451 = arith.constant 1 : index
    %c24_452 = arith.constant 24 : index
    %798 = memref.load %arg1[%c1_451, %c24_452] : memref<3x27xf32, #tpu.memory_space<smem>>
    %799 = vector.broadcast %798 : f32 to vector<8x256xf32>
    %800 = arith.mulf %793, %799 : vector<8x256xf32>
    %801 = arith.addf %786, %800 : vector<8x256xf32>
    %c2_453 = arith.constant 2 : index
    %c24_454 = arith.constant 24 : index
    %802 = memref.load %arg1[%c2_453, %c24_454] : memref<3x27xf32, #tpu.memory_space<smem>>
    %803 = vector.broadcast %802 : f32 to vector<8x256xf32>
    %804 = arith.mulf %793, %803 : vector<8x256xf32>
    %805 = arith.addf %790, %804 : vector<8x256xf32>
    %c25_455 = arith.constant 25 : index
    %c0_456 = arith.constant 0 : index
    %c0_457 = arith.constant 0 : index
    %806 = vector.load %arg4[%c25_455, %c0_456, %c0_457] : memref<27x8x256xbf16, #tpu.memory_space<vmem>>, vector<1x8x256xbf16>
    %807 = vector.shape_cast %806 : vector<1x8x256xbf16> to vector<8x256xbf16>
    %808 = arith.extf %807 : vector<8x256xbf16> to vector<8x256xf32>
    %c0_458 = arith.constant 0 : index
    %c25_459 = arith.constant 25 : index
    %809 = memref.load %arg1[%c0_458, %c25_459] : memref<3x27xf32, #tpu.memory_space<smem>>
    %810 = vector.broadcast %809 : f32 to vector<8x256xf32>
    %811 = arith.mulf %808, %810 : vector<8x256xf32>
    %812 = arith.addf %797, %811 : vector<8x256xf32>
    %c1_460 = arith.constant 1 : index
    %c25_461 = arith.constant 25 : index
    %813 = memref.load %arg1[%c1_460, %c25_461] : memref<3x27xf32, #tpu.memory_space<smem>>
    %814 = vector.broadcast %813 : f32 to vector<8x256xf32>
    %815 = arith.mulf %808, %814 : vector<8x256xf32>
    %816 = arith.addf %801, %815 : vector<8x256xf32>
    %c2_462 = arith.constant 2 : index
    %c25_463 = arith.constant 25 : index
    %817 = memref.load %arg1[%c2_462, %c25_463] : memref<3x27xf32, #tpu.memory_space<smem>>
    %818 = vector.broadcast %817 : f32 to vector<8x256xf32>
    %819 = arith.mulf %808, %818 : vector<8x256xf32>
    %820 = arith.addf %805, %819 : vector<8x256xf32>
    %c26_464 = arith.constant 26 : index
    %c0_465 = arith.constant 0 : index
    %c0_466 = arith.constant 0 : index
    %821 = vector.load %arg4[%c26_464, %c0_465, %c0_466] : memref<27x8x256xbf16, #tpu.memory_space<vmem>>, vector<1x8x256xbf16>
    %822 = vector.shape_cast %821 : vector<1x8x256xbf16> to vector<8x256xbf16>
    %823 = arith.extf %822 : vector<8x256xbf16> to vector<8x256xf32>
    %c0_467 = arith.constant 0 : index
    %c26_468 = arith.constant 26 : index
    %824 = memref.load %arg1[%c0_467, %c26_468] : memref<3x27xf32, #tpu.memory_space<smem>>
    %825 = vector.broadcast %824 : f32 to vector<8x256xf32>
    %826 = arith.mulf %823, %825 : vector<8x256xf32>
    %827 = arith.addf %812, %826 : vector<8x256xf32>
    %c1_469 = arith.constant 1 : index
    %c26_470 = arith.constant 26 : index
    %828 = memref.load %arg1[%c1_469, %c26_470] : memref<3x27xf32, #tpu.memory_space<smem>>
    %829 = vector.broadcast %828 : f32 to vector<8x256xf32>
    %830 = arith.mulf %823, %829 : vector<8x256xf32>
    %831 = arith.addf %816, %830 : vector<8x256xf32>
    %c2_471 = arith.constant 2 : index
    %c26_472 = arith.constant 26 : index
    %832 = memref.load %arg1[%c2_471, %c26_472] : memref<3x27xf32, #tpu.memory_space<smem>>
    %833 = vector.broadcast %832 : f32 to vector<8x256xf32>
    %834 = arith.mulf %823, %833 : vector<8x256xf32>
    %835 = arith.addf %820, %834 : vector<8x256xf32>
    %cst_473 = arith.constant 0.000000e+00 : f32
    %836 = vector.broadcast %cst_473 : f32 to vector<8x256xf32>
    %837 = arith.maximumf %827, %836 : vector<8x256xf32>
    %cst_474 = arith.constant 0.000000e+00 : f32
    %838 = vector.broadcast %cst_474 : f32 to vector<8x256xf32>
    %839 = arith.maximumf %831, %838 : vector<8x256xf32>
    %cst_475 = arith.constant 0.000000e+00 : f32
    %840 = vector.broadcast %cst_475 : f32 to vector<8x256xf32>
    %841 = arith.maximumf %835, %840 : vector<8x256xf32>
    %842 = tpu.concatenate %837, %839, %841 in 1 : vector<8x256xf32>, vector<8x256xf32>, vector<8x256xf32> -> vector<8x768xf32>
    %c0_476 = arith.constant 0 : index
    %c0_477 = arith.constant 0 : index
    %843 = vector.load %arg5[%c0_476, %c0_477] : memref<768x8xf32, #tpu.memory_space<vmem>>, vector<768x8xf32>
    %cst_478 = arith.constant dense<0.000000e+00> : vector<8x8xf32>
    %844 = tpu.matmul %842, %843, %cst_478 {dimension_numbers = #tpu.dot_dimension_numbers<[1], [0], [0], [1], [0, 0, 1, 1], [], []>} : vector<8x768xf32>, vector<768x8xf32>, vector<8x8xf32> -> vector<8x8xf32>
    %c0_479 = arith.constant 0 : index
    %c0_480 = arith.constant 0 : index
    %845 = vector.load %arg6[%c0_479, %c0_480] : memref<1x8xf32, #tpu.memory_space<vmem>>, vector<1x8xf32>
    %846 = vector.broadcast %845 : vector<1x8xf32> to vector<8x8xf32>
    %847 = arith.addf %844, %846 : vector<8x8xf32>
    %cst_481 = arith.constant 0.000000e+00 : f32
    %848 = vector.broadcast %cst_481 : f32 to vector<8x8xf32>
    %849 = arith.maximumf %847, %848 : vector<8x8xf32>
    %c0_482 = arith.constant 0 : index
    %c0_483 = arith.constant 0 : index
    %850 = vector.load %arg7[%c0_482, %c0_483] : memref<16x2xf32, #tpu.memory_space<vmem>>, vector<8x2xf32>
    %cst_484 = arith.constant dense<0.000000e+00> : vector<8x2xf32>
    %851 = tpu.matmul %424, %850, %cst_484 {dimension_numbers = #tpu.dot_dimension_numbers<[1], [0], [0], [1], [0, 0, 1, 1], [], []>} : vector<8x8xf32>, vector<8x2xf32>, vector<8x2xf32> -> vector<8x2xf32>
    %c8_485 = arith.constant 8 : index
    %c0_486 = arith.constant 0 : index
    %852 = vector.load %arg7[%c8_485, %c0_486] : memref<16x2xf32, #tpu.memory_space<vmem>>, vector<8x2xf32>
    %cst_487 = arith.constant dense<0.000000e+00> : vector<8x2xf32>
    %853 = tpu.matmul %849, %852, %cst_487 {dimension_numbers = #tpu.dot_dimension_numbers<[1], [0], [0], [1], [0, 0, 1, 1], [], []>} : vector<8x8xf32>, vector<8x2xf32>, vector<8x2xf32> -> vector<8x2xf32>
    %854 = arith.addf %851, %853 : vector<8x2xf32>
    %c0_488 = arith.constant 0 : index
    %c0_489 = arith.constant 0 : index
    %855 = vector.load %arg8[%c0_488, %c0_489] : memref<1x2xf32, #tpu.memory_space<vmem>>, vector<1x2xf32>
    %856 = vector.broadcast %855 : vector<1x2xf32> to vector<8x2xf32>
    %857 = arith.addf %854, %856 : vector<8x2xf32>
    %cst_490 = arith.constant 0.000000e+00 : f32
    %858 = vector.broadcast %cst_490 : f32 to vector<8x2xf32>
    %859 = arith.maximumf %857, %858 : vector<8x2xf32>
    %c0_491 = arith.constant 0 : index
    %c0_492 = arith.constant 0 : index
    %860 = vector.load %arg9[%c0_491, %c0_492] : memref<8x2xf32, #tpu.memory_space<vmem>>, vector<8x2xf32>
    tpu.vector_store %arg9[%c0_491, %c0_492], %859 {strides = array<i32>} : memref<8x2xf32, #tpu.memory_space<vmem>>, vector<8x2xf32>,
    return
  }
  func.func @transform_0(%arg0: i32) -> (i32, i32) {
    %c0_i32 = arith.constant 0 : i32
    %c0_i32_0 = arith.constant 0 : i32
    %c0_i32_1 = arith.constant 0 : i32
    return %c0_i32, %c0_i32_0 : i32, i32
  }
  func.func @transform_1(%arg0: i32) -> i32 {
    %c0_i32 = arith.constant 0 : i32
    %c0_i32_0 = arith.constant 0 : i32
    return %c0_i32 : i32
  }
  func.func @transform_2(%arg0: i32) -> (i32, i32, i32) {
    %c0_i32 = arith.constant 0 : i32
    %c0_i32_0 = arith.constant 0 : i32
    %c0_i32_1 = arith.constant 0 : i32
    return %c0_i32, %arg0, %c0_i32_0 : i32, i32, i32
  }
  func.func @transform_3(%arg0: i32) -> (i32, i32, i32) {
    %c0_i32 = arith.constant 0 : i32
    %c0_i32_0 = arith.constant 0 : i32
    %c0_i32_1 = arith.constant 0 : i32
    return %c0_i32, %arg0, %c0_i32_0 : i32, i32, i32
  }
  func.func @transform_4(%arg0: i32) -> (i32, i32) {
    %c0_i32 = arith.constant 0 : i32
    %c0_i32_0 = arith.constant 0 : i32
    %c0_i32_1 = arith.constant 0 : i32
    return %c0_i32, %c0_i32_0 : i32, i32
  }
  func.func @transform_5(%arg0: i32) -> (i32, i32) {
    %c0_i32 = arith.constant 0 : i32
    %c0_i32_0 = arith.constant 0 : i32
    %c0_i32_1 = arith.constant 0 : i32
    return %c0_i32, %c0_i32_0 : i32, i32
  }
  func.func @transform_6(%arg0: i32) -> (i32, i32) {
    %c0_i32 = arith.constant 0 : i32
    %c0_i32_0 = arith.constant 0 : i32
    %c0_i32_1 = arith.constant 0 : i32
    return %c0_i32, %c0_i32_0 : i32, i32
  }
  func.func @transform_7(%arg0: i32) -> (i32, i32) {
    %c0_i32 = arith.constant 0 : i32
    %c0_i32_0 = arith.constant 0 : i32
    %c0_i32_1 = arith.constant 0 : i32
    return %c0_i32, %c0_i32_0 : i32, i32
  }
  func.func @transform_8(%arg0: i32) -> (i32, i32) {
    %c0_i32 = arith.constant 0 : i32
    %c0_i32_0 = arith.constant 0 : i32
    return %arg0, %c0_i32 : i32, i32
  }
}

</mosaic_0001>

<bundles_post_ra>
// kernel: tpu_custom_call.1
= control target key start
LH: loop header
LB: loop body
LE: loop exit
PB: predicated region body
PF: predicated region fallthrough
CT: control target
= control target key end

     0   :  { %13 = vsyncpa [#allocation3], 0  ;;  %s4562_s0 = inlined_call_operand.vmem [shape: f32[3,27], index: 0, kind: input, shape index: {}]   ;;  %s4563_s1 = inlined_call_operand.vmem [shape: f32[3], index: 1, kind: input, shape index: {}]   ;;  %s4564_s2 = inlined_call_operand.vmem [shape: bf16[27,8,256], index: 2, kind: input, shape index: {}]   ;;  %s4565_s3 = inlined_call_operand.vmem [shape: bf16[27,8,256], index: 3, kind: input, shape index: {}]   ;;  %s4566_s4 = inlined_call_operand.vmem [shape: f32[768,8], index: 4, kind: input, shape index: {}]   ;;  %s4567_s5 = inlined_call_operand.vmem [shape: f32[1,8], index: 5, kind: input, shape index: {}]   ;;  %s4568_s6 = inlined_call_operand.vmem [shape: f32[16,2], index: 6, kind: input, shape index: {}]   ;;  %s4569_s7 = inlined_call_operand.vmem [shape: f32[1,2], index: 7, kind: input, shape index: {}]   ;;  %s4570_s8 = inlined_call_operand.vmem [shape: f32[8,2], index: 8, kind: output, shape index: {}]  }
   0x1   :  { %s21_s29 = sshll.u32 %s4562_s0, 4  ;;  %s22_s29 = int_to_ptr.vmem [resolvable:$true] %s21_s29 }
   0x2   :  { %14 = vsyncpa [#allocation5], 0  ;;  %s31_s10 = sshll.u32 %s4563_s1, 4  ;;  %s2345_s11 = scalar_lea.vmem %s22_s29, 64  ;;  %s32_s10 = int_to_ptr.vmem [resolvable:$true] %s31_s10 }
   0x3   :  { %p2346_p0 = scmp.ne.s32.totalorder %s22_s29, %s2345_s11  ;;  %p2350_p1 = scmp.lt.s32.totalorder %s22_s29, %s22_s29 }
   0x4   :  { %p2351_p2 = scmp.lt.s32.totalorder %s2345_s11, %s2345_s11 }
   0x6   :  { %p2352_p3 = por %p2351_p2, %p2350_p1 }
   0x8   :  { %p2353_p4 = pnand %p2352_p3, %p2346_p0 }
   0xa   :  { %2356 = shalt.err (!%p2353_p4)
}
   0xb   :  { %s2373_s12 = smov [#allocation2]   ;;  %s2357_s13 = scalar_lea.vmem %s32_s10, 16 }
   0xc   :  { %24 = dma.vmem_to_smem %s22_s29, 64, %s2373_s12, [#allocation3]  }
   0xd   :  { %p2358_p5 = scmp.ne.s32.totalorder %s32_s10, %s2357_s13  ;;  %p2362_p6 = scmp.lt.s32.totalorder %s32_s10, %s32_s10 }
   0xe   :  { %p2363_p7 = scmp.lt.s32.totalorder %s2357_s13, %s2357_s13 }
  0x10   :  { %p2364_p8 = por %p2363_p7, %p2362_p6 }
  0x12   :  { %p2365_p9 = pnand %p2364_p8, %p2358_p5 }
  0x14   :  { %2368 = shalt.err (!%p2365_p9)
}
  0x15   :  { %s2374_s0 = smov [#allocation4]  }
  0x16   :  { %34 = dma.vmem_to_smem %s32_s10, 16, %s2374_s0, [#allocation5]  }
  0x17   :  { %2369 = dma.done.wait [#allocation3], 64  }
  0x18   :  { %2370 = vsyncadd [#allocation3], 4294967232 }
  0x19   :  { %2371 = dma.done.wait [#allocation5], 16  }
  0x1a   :  { %2372 = vsyncadd [#allocation5], 4294967280 }
  0x1b   :  { %53 = sfence }
  0x1c   :  { %v675_v0 = vld [vmem:[%s4566_s4 + $0x80] sm:$0xff]  ;;  %v676_v1 = vld [vmem:[%s4566_s4 + $0x88] sm:$0xff]  ;;  %v677_v11 = vld [vmem:[%s4566_s4 + $0x90] sm:$0xff]  ;;  %s2577_s1 = sld [smem:[#allocation4]]  ;;  %s2608_s27 = sld [smem:[#allocation2 + $0x1]]  ;;  %vm2376_vm0 = vmmov 0  }
  0x1d   :  { %v659_v2 = vld [vmem:[%s4566_s4] sm:$0xff]  ;;  %v2437_v3 = vpack.c.bf16 %v676_v1, %v675_v0  ;;  %v660_v4 = vld [vmem:[%s4566_s4 + $0x8] sm:$0xff]  ;;  %v678_v13 = vld [vmem:[%s4566_s4 + $0x98] sm:$0xff]  ;;  %s2594_s20 = sld [smem:[#allocation2]]  ;;  %s2616_s10 = sld [smem:[#allocation2 + $0x2]]  ;;  %vm1623_vm1 = vcmask 64512  }
  0x1e   :  { %v707_v5 = vld [vmem:[%s4566_s4 + $0x180] sm:$0xff]  ;;  %v708_v6 = vld [vmem:[%s4566_s4 + $0x188] sm:$0xff]  ;;  %v2448_v7 = vpack.c.bf16 %v660_v4, %v659_v2  ;;  %v661_v14 = vld [vmem:[%s4566_s4 + $0x10] sm:$0xff]  ;;  %v2475_v16 = vpack.c.bf16 %v678_v13, %v677_v11  ;;  %s2636_s16 = sld [smem:[#allocation2 + $0x3]]  ;;  %s2659_s9 = sld [smem:[#allocation2 + $0x4]]  ;;  %vm1779_vm2 = vcmask 15360  }
  0x1f   :  { %v2450_v8 = vpack.c.bf16 %v708_v6, %v707_v5  ;;  %v691_v9 = vld [vmem:[%s4566_s4 + $0x100] sm:$0xff]  ;;  %v692_v10 = vld [vmem:[%s4566_s4 + $0x108] sm:$0xff]  ;;  %2150 = vmatprep.subr.bf16.mxu0 %v2437_v3  ;;  %v662_v15 = vld [vmem:[%s4566_s4 + $0x18] sm:$0xff]  ;;  %s2676_s17 = sld [smem:[#allocation2 + $0x5]]  ;;  %s2700_s24 = sld [smem:[#allocation2 + $0x6]] }
  0x20   :  { %4945 = vst [vmem:[#allocation8_spill] sm:$0xff] %v2448_v7  ;;  %v2462_v12 = vpack.c.bf16 %v692_v10, %v691_v9  ;;  %2152 = vmatpush3.bf16.msra.mxu0 %v2448_v7  ;;  %4948 = vst [vmem:[#allocation11_spill] sm:$0xff] %v2475_v16  ;;  %v2477_v17 = vpack.c.bf16 %v662_v15, %v661_v14  ;;  %v709_v18 = vld [vmem:[%s4566_s4 + $0x190] sm:$0xff]  ;;  %v710_v19 = vld [vmem:[%s4566_s4 + $0x198] sm:$0xff]  ;;  %s2724_s11 = sld [smem:[#allocation2 + $0x7]]  ;;  %s2746_s18 = sld [smem:[#allocation2 + $0x8]] }
  0x21   :  { %4946 = vst [vmem:[#allocation9_spill] sm:$0xff] %v2450_v8  ;;  %2182 = vmatprep.subr.bf16.mxu1 %v2450_v8  ;;  %v693_v20 = vld [vmem:[%s4566_s4 + $0x110] sm:$0xff]  ;;  %v2489_v21 = vpack.c.bf16 %v710_v19, %v709_v18  ;;  %v694_v22 = vld [vmem:[%s4566_s4 + $0x118] sm:$0xff]  ;;  %v679_v23 = vld [vmem:[%s4566_s4 + $0xa0] sm:$0xff]  ;;  %2154 = vmatprep.subr.bf16.mxu0 %v2475_v16  ;;  %s2758_s19 = sld [smem:[#allocation2 + $0xa]]  ;;  %s2805_s14 = sld [smem:[#allocation2 + $0xd]] }
  0x22   :  { %4947 = vst [vmem:[#allocation10_spill] sm:$0xff] %v2462_v12  ;;  %4949 = vst [vmem:[#allocation12_spill] sm:$0xff] %v2477_v17  ;;  %2184 = vmatpush3.bf16.msra.mxu1 %v2462_v12  ;;  %v680_v24 = vld [vmem:[%s4566_s4 + $0xa8] sm:$0xff]  ;;  %v2501_v25 = vpack.c.bf16 %v694_v22, %v693_v20  ;;  %v663_v27 = vld [vmem:[%s4566_s4 + $0x20] sm:$0xff]  ;;  %v2674_v22 = vstv %s2577_s1  ;;  %s2886_s22 = sld [smem:[#allocation2 + $0x10]]  ;;  %s2926_s13 = sld [smem:[#allocation2 + $0x11]] }
  0x23   :  { %4950 = vst [vmem:[#allocation13_spill] sm:$0xff] %v2489_v21  ;;  %v2503_v26 = vpack.c.bf16 %v680_v24, %v679_v23  ;;  %v664_v28 = vld [vmem:[%s4566_s4 + $0x28] sm:$0xff]  ;;  %v711_v29 = vld [vmem:[%s4566_s4 + $0x1a0] sm:$0xff]  ;;  %2186 = vmatprep.subr.bf16.mxu1 %v2489_v21  ;;  %v681_v35 = vld [vmem:[%s4566_s4 + $0xb0] sm:$0xff]  ;;  %s2967_s21 = sld [smem:[#allocation2 + $0x14]]  ;;  %s3053_s0 = sld [smem:[#allocation4 + $0x1]] }
  0x24   :  { %4951 = vst [vmem:[#allocation14_spill] sm:$0xff] %v2501_v25  ;;  %v712_v30 = vld [vmem:[%s4566_s4 + $0x1a8] sm:$0xff]  ;;  %v695_v31 = vld [vmem:[%s4566_s4 + $0x120] sm:$0xff]  ;;  %2156 = vmatpush3.bf16.msra.mxu0 %v2477_v17  ;;  %v2525_v33 = vpack.c.bf16 %v664_v28, %v663_v27  ;;  %v682_v36 = vld [vmem:[%s4566_s4 + $0xb8] sm:$0xff]  ;;  %s3076_s15 = sld [smem:[#allocation2 + $0x83]]  ;;  %s3138_s1 = sld [smem:[#allocation2 + $0x86]] }
  0x25   :  { %4952 = vst [vmem:[#allocation15_spill] sm:$0xff] %v2503_v26  ;;  %v696_v32 = vld [vmem:[%s4566_s4 + $0x128] sm:$0xff]  ;;  %v2527_v34 = vpack.c.bf16 %v712_v30, %v711_v29  ;;  %v665_v37 = vld [vmem:[%s4566_s4 + $0x30] sm:$0xff]  ;;  %2158 = vmatprep.subr.bf16.mxu0 %v2503_v26  ;;  %v2542_v39 = vpack.c.bf16 %v682_v36, %v681_v35  ;;  %v666_v40 = vld [vmem:[%s4566_s4 + $0x38] sm:$0xff]  ;;  %v2693_v29 = vstv %s2594_s20  ;;  %s2780_s20 = sld [smem:[#allocation2 + $0xb]]  ;;  %s3146_s23 = sld [smem:[#allocation2 + $0x1a]] }
  0x26   :  { %4953 = vst [vmem:[#allocation16_spill] sm:$0xff] %v2525_v33  ;;  %2188 = vmatpush3.bf16.msra.mxu1 %v2501_v25  ;;  %v2540_v38 = vpack.c.bf16 %v696_v32, %v695_v31  ;;  %v713_v41 = vld [vmem:[%s4566_s4 + $0x1b0] sm:$0xff]  ;;  %v714_v42 = vld [vmem:[%s4566_s4 + $0x1b8] sm:$0xff]  ;;  %v683_v46 = vld [vmem:[%s4566_s4 + $0xc0] sm:$0xff]  ;;  %v2569_v48 = vpack.c.bf16 %v666_v40, %v665_v37  ;;  %v2712_v36 = vstv %s2608_s27  ;;  %s2807_s27 = sld [smem:[#allocation2 + $0xe]]  ;;  %s3158_s25 = sld [smem:[#allocation2 + $0x87]] }
  0x27   :  { %4954 = vst [vmem:[#allocation17_spill] sm:$0xff] %v2527_v34  ;;  %4956 = vst [vmem:[#allocation19_spill] sm:$0xff] %v2542_v39  ;;  %2190 = vmatprep.subr.bf16.mxu1 %v2527_v34  ;;  %v2554_v43 = vpack.c.bf16 %v714_v42, %v713_v41  ;;  %v697_v44 = vld [vmem:[%s4566_s4 + $0x130] sm:$0xff]  ;;  %v698_v45 = vld [vmem:[%s4566_s4 + $0x138] sm:$0xff]  ;;  %s3175_s28 = sld [smem:[#allocation2 + $0x88]]  ;;  %s3189_s29 = sld [smem:[#allocation2 + $0x89]] }
  0x28   :  { %4955 = vst [vmem:[#allocation18_spill] sm:$0xff] %v2540_v38  ;;  %v684_v47 = vld [vmem:[%s4566_s4 + $0xc8] sm:$0xff]  ;;  %2160 = vmatpush3.bf16.msra.mxu0 %v2525_v33  ;;  %4958 = vst [vmem:[#allocation21_spill] sm:$0xff] %v2569_v48  ;;  %v715_v49 = vld [vmem:[%s4566_s4 + $0x1c0] sm:$0xff]  ;;  %v2581_v51 = vpack.c.bf16 %v698_v45, %v697_v44  ;;  %s3399_s26 = sld [smem:[#allocation2 + $0x101]]  ;;  %s3443_s30 = sld [smem:[#allocation2 + $0x105]] }
  0x29   :  { %4957 = vst [vmem:[#allocation20_spill] sm:$0xff] %v2554_v43  ;;  %v716_v50 = vld [vmem:[%s4566_s4 + $0x1c8] sm:$0xff]  ;;  %2162 = vmatprep.subr.bf16.mxu0 %v2542_v39  ;;  %v2583_v52 = vpack.c.bf16 %v684_v47, %v683_v46  ;;  %v667_v53 = vld [vmem:[%s4566_s4 + $0x40] sm:$0xff]  ;;  %v685_v58 = vld [vmem:[%s4566_s4 + $0xd0] sm:$0xff]  ;;  %v2739_v46 = vstv %s2616_s10  ;;  %s2756_s10 = sld [smem:[#allocation2 + $0x9]]  ;;  %s3460_s12 = sld [smem:[#allocation2 + $0x106]] }
  0x2a   :  { %2192 = vmatpush3.bf16.msra.mxu1 %v2540_v38  ;;  %4959 = vst [vmem:[#allocation22_spill] sm:$0xff] %v2581_v51  ;;  %v668_v54 = vld [vmem:[%s4566_s4 + $0x48] sm:$0xff]  ;;  %v699_v55 = vld [vmem:[%s4566_s4 + $0x140] sm:$0xff]  ;;  %v2597_v56 = vpack.c.bf16 %v716_v50, %v715_v49  ;;  %v686_v59 = vld [vmem:[%s4566_s4 + $0xd8] sm:$0xff] }
  0x2b   :  { %4960 = vst [vmem:[#allocation23_spill] sm:$0xff] %v2583_v52  ;;  %2194 = vmatprep.subr.bf16.mxu1 %v2554_v43  ;;  %v700_v57 = vld [vmem:[%s4566_s4 + $0x148] sm:$0xff]  ;;  %v717_v60 = vld [vmem:[%s4566_s4 + $0x1d0] sm:$0xff]  ;;  %v718_v61 = vld [vmem:[%s4566_s4 + $0x1d8] sm:$0xff]  ;;  %v2619_v62 = vpack.c.bf16 %v668_v54, %v667_v53  ;;  %v2625_v0 = vpack.c.bf16 %v686_v59, %v685_v58 }
  0x2c   :  { %4961 = vst [vmem:[#allocation24_spill] sm:$0xff] %v2597_v56  ;;  %2164 = vmatpush3.bf16.msra.mxu0 %v2569_v48  ;;  %v2623_v63 = vpack.c.bf16 %v700_v57, %v699_v55  ;;  %v669_v1 = vld [vmem:[%s4566_s4 + $0x50] sm:$0xff]  ;;  %v670_v2 = vld [vmem:[%s4566_s4 + $0x58] sm:$0xff]  ;;  %v2639_v5 = vpack.c.bf16 %v718_v61, %v717_v60  ;;  %v687_v9 = vld [vmem:[%s4566_s4 + $0xe0] sm:$0xff]  ;;  %v2775_v60 = vstv %s2636_s16  ;;  %s2797_s16 = sld [smem:[#allocation2 + $0xc]] }
  0x2d   :  { %4962 = vst [vmem:[#allocation25_spill] sm:$0xff] %v2619_v62  ;;  %2166 = vmatprep.subr.bf16.mxu0 %v2583_v52  ;;  %4964 = vst [vmem:[#allocation27_spill] sm:$0xff] %v2625_v0  ;;  %v701_v4 = vld [vmem:[%s4566_s4 + $0x150] sm:$0xff]  ;;  %v702_v6 = vld [vmem:[%s4566_s4 + $0x158] sm:$0xff]  ;;  %v2662_v15 = vpack.c.bf16 %v670_v2, %v669_v1 }
  0x2e   :  { %2196 = vmatpush3.bf16.msra.mxu1 %v2581_v51  ;;  %4963 = vst [vmem:[#allocation26_spill] sm:$0xff] %v2623_v63  ;;  %4965 = vst [vmem:[#allocation28_spill] sm:$0xff] %v2639_v5  ;;  %v688_v10 = vld [vmem:[%s4566_s4 + $0xe8] sm:$0xff]  ;;  %v671_v11 = vld [vmem:[%s4566_s4 + $0x60] sm:$0xff]  ;;  %v2680_v23 = vpack.c.bf16 %v702_v6, %v701_v4  ;;  %v2884_v51 = vstv %s2807_s27  ;;  %s2939_s27 = sld [smem:[#allocation2 + $0x12]] }
  0x2f   :  { %2198 = vmatprep.subr.bf16.mxu1 %v2597_v56  ;;  %v719_v13 = vld [vmem:[%s4566_s4 + $0x1e0] sm:$0xff]  ;;  %v720_v14 = vld [vmem:[%s4566_s4 + $0x1e8] sm:$0xff]  ;;  %4966 = vst [vmem:[#allocation29_spill] sm:$0xff] %v2662_v15  ;;  %4967 = vst [vmem:[#allocation30_spill] sm:$0xff] %v2674_v22  ;;  %v2682_v24 = vpack.c.bf16 %v688_v10, %v687_v9 }
  0x30   :  { %2168 = vmatpush3.bf16.msra.mxu0 %v2619_v62  ;;  %v672_v18 = vld [vmem:[%s4566_s4 + $0x68] sm:$0xff]  ;;  %v703_v19 = vld [vmem:[%s4566_s4 + $0x160] sm:$0xff]  ;;  %4968 = vst [vmem:[#allocation31_spill] sm:$0xff] %v2680_v23  ;;  %v689_v27 = vld [vmem:[%s4566_s4 + $0xf0] sm:$0xff]  ;;  %v2703_v31 = vpack.c.bf16 %v720_v14, %v719_v13 }
  0x31   :  { %v704_v20 = vld [vmem:[%s4566_s4 + $0x168] sm:$0xff]  ;;  %2170 = vmatprep.subr.bf16.mxu0 %v2625_v0  ;;  %4969 = vst [vmem:[#allocation32_spill] sm:$0xff] %v2682_v24  ;;  %v2690_v28 = vld [vmem:[%s4564_s2] sm:$0xff]  ;;  %4970 = vst [vmem:[#allocation33_spill] sm:$0xff] %v2693_v29  ;;  %v2749_v49 = vpack.c.bf16 %v672_v18, %v671_v11  ;;  %v2800_v11 = vstv %s2659_s9  ;;  %s2955_s9 = sld [smem:[#allocation2 + $0x13]] }
  0x32   :  { %2200 = vmatpush3.bf16.msra.mxu1 %v2623_v63  ;;  %v2698_v30 = vld [vmem:[%s4564_s2 + $0x8] sm:$0xff]  ;;  %4971 = vst [vmem:[#allocation34_spill] sm:$0xff] %v2703_v31  ;;  %v690_v32 = vld [vmem:[%s4566_s4 + $0xf8] sm:$0xff]  ;;  %v2709_v35 = vunpack.c.h.bf16 %v2690_v28  ;;  %4973 = vst [vmem:[#allocation36_spill] sm:$0xff] %v2712_v36  ;;  %v2762_v54 = vpack.c.bf16 %v704_v20, %v703_v19  ;;  %v2866_v63 = vstv %s2797_s16  ;;  %s3206_s16 = sld [smem:[#allocation2 + $0x8a]] }
  0x33   :  { %2202 = vmatprep.subr.bf16.mxu1 %v2639_v5  ;;  %v2717_v37 = vld [vmem:[%s4564_s2 + $0x10] sm:$0xff]  ;;  %v2722_v40 = vld [vmem:[%s4564_s2 + $0x18] sm:$0xff]  ;;  %v2733_v44 = vunpack.c.h.bf16 %v2698_v30  ;;  %4976 = vst [vmem:[#allocation39_spill] sm:$0xff] %v2739_v46  ;;  %v2744_v47 = vld [vmem:[%s4564_s2 + $0x20] sm:$0xff]  ;;  %v2764_v55 = vpack.c.bf16 %v690_v32, %v689_v27  ;;  %v2821_v32 = vstv %s2676_s17  ;;  %v2875_v56 = vunpack.c.l.bf16 %v2698_v30  ;;  %s3300_s17 = sld [smem:[#allocation2 + $0x92]] }
  0x34   :  { %4972 = vst [vmem:[#allocation35_spill] sm:$0xff] %v2709_v35  ;;  %v721_v41 = vld [vmem:[%s4566_s4 + $0x1f0] sm:$0xff]  ;;  %v722_v42 = vld [vmem:[%s4566_s4 + $0x1f8] sm:$0xff]  ;;  %v2736_v45 = vunpack.c.h.bf16 %v2717_v37  ;;  %2172 = vmatpush3.bf16.msra.mxu0 %v2662_v15  ;;  %4977 = vst [vmem:[#allocation40_spill] sm:$0xff] %v2749_v49  ;;  %v66_v50 = vmul.f32 %v2693_v29, %v2709_v35  ;;  %v2754_v53 = vunpack.c.h.bf16 %v2722_v40  ;;  %v2795_v10 = vunpack.c.h.bf16 %v2744_v47 }
  0x35   :  { %4974 = vst [vmem:[#allocation37_spill] sm:$0xff] %v2733_v44  ;;  %2174 = vmatprep.subr.bf16.mxu0 %v2682_v24  ;;  %4979 = vst [vmem:[#allocation42_spill] sm:$0xff] %v2762_v54  ;;  %v673_v57 = vld [vmem:[%s4566_s4 + $0x70] sm:$0xff]  ;;  %v674_v58 = vld [vmem:[%s4566_s4 + $0x78] sm:$0xff]  ;;  %v88_v59 = vmul.f32 %v2712_v36, %v2733_v44  ;;  %v2783_v1 = vpack.c.bf16 %v722_v42, %v721_v41  ;;  %v2889_v43 = vunpack.c.l.bf16 %v2717_v37  ;;  %v2902_v25 = vunpack.c.l.bf16 %v2722_v40 }
  0x36   :  { %4975 = vst [vmem:[#allocation38_spill] sm:$0xff] %v2736_v45  ;;  %4978 = vst [vmem:[#allocation41_spill] sm:$0xff] %v2754_v53  ;;  %2204 = vmatpush3.bf16.msra.mxu1 %v2680_v23  ;;  %v1807_v61 = vld [vmem:[%s4564_s2 + $0x28] sm:$0xff]  ;;  %v705_v2 = vld [vmem:[%s4566_s4 + $0x170] sm:$0xff]  ;;  %v68_v6 = vadd.f32 %v66_v50, %v2674_v22  ;;  %v110_v9 = vmul.f32 %v2739_v46, %v2736_v45  ;;  %v2810_v14 = vpack.c.bf16 %v674_v58, %v673_v57 }
  0x37   :  { %4980 = vst [vmem:[#allocation43_spill] sm:$0xff] %v2764_v55  ;;  %4981 = vst [vmem:[#allocation44_spill] sm:$0xff] %v2775_v60  ;;  %2206 = vmatprep.subr.bf16.mxu1 %v2703_v31  ;;  %v706_v4 = vld [vmem:[%s4566_s4 + $0x178] sm:$0xff]  ;;  %v1811_v13 = vld [vmem:[%s4564_s2 + $0x30] sm:$0xff]  ;;  %v132_v19 = vmul.f32 %v2775_v60, %v2754_v53  ;;  %v2814_v20 = vunpack.c.h.bf16 %v1807_v61  ;;  %v154_v50 = vmul.f32 %v2800_v11, %v2795_v10  ;;  %v2832_v58 = vstv %s2700_s24  ;;  %s2978_s24 = sld [smem:[#allocation2 + $0x15]] }
  0x38   :  { %4982 = vst [vmem:[#allocation45_spill] sm:$0xff] %v2783_v1  ;;  %4983 = vst [vmem:[#allocation46_spill] sm:$0xff] %v2795_v10  ;;  %2176 = vmatpush3.bf16.msra.mxu0 %v2749_v49  ;;  %v90_v18 = vadd.f32 %v88_v59, %v68_v6  ;;  %v2818_v27 = vpack.c.bf16 %v706_v4, %v705_v2  ;;  %v1815_v41 = vld [vmem:[%s4564_s2 + $0x38] sm:$0xff]  ;;  %v2829_v57 = vunpack.c.h.bf16 %v1811_v13  ;;  %v2835_v59 = vstv %s2724_s11  ;;  %v1819_v2 = vld [vmem:[%s4564_s2 + $0x40] sm:$0xff]  ;;  %s3328_s11 = sld [smem:[#allocation2 + $0x95]] }
  0x39   :  { %4984 = vst [vmem:[#allocation47_spill] sm:$0xff] %v2800_v11  ;;  %4985 = vst [vmem:[#allocation48_spill] sm:$0xff] %v2810_v14  ;;  %2178 = vmatprep.subr.bf16.mxu0 %v2764_v55  ;;  %v176_v6 = vmul.f32 %v2821_v32, %v2814_v20  ;;  %v2856_v31 = vstv %s2758_s19  ;;  %v2863_v5 = vunpack.c.h.bf16 %v1819_v2  ;;  %v1831_v30 = vld [vmem:[%s4564_s2 + $0x58] sm:$0xff]  ;;  %v1835_v34 = vld [vmem:[%s4564_s2 + $0x60] sm:$0xff]  ;;  %v2905_v37 = vunpack.c.l.bf16 %v2744_v47  ;;  %s3119_s19 = sld [smem:[#allocation2 + $0x85]] }
  0x3a   :  { %4986 = vst [vmem:[#allocation49_spill] sm:$0xff] %v2814_v20  ;;  %2208 = vmatpush3.bf16.msra.mxu1 %v2762_v54  ;;  %4987 = vst [vmem:[#allocation50_spill] sm:$0xff] %v2818_v27  ;;  %v112_v42 = vadd.f32 %v110_v9, %v90_v18  ;;  %v2843_v9 = vunpack.c.h.bf16 %v1815_v41  ;;  %v2846_v18 = vstv %s2746_s18  ;;  %v2853_v54 = vstv %s2756_s10  ;;  %s2868_s18 = sld [smem:[#allocation2 + $0xf]]  ;;  %v1839_v21 = vld [vmem:[%s4564_s2 + $0x68] sm:$0xff]  ;;  %v1843_v40 = vld [vmem:[%s4564_s2 + $0x70] sm:$0xff]  ;;  %s2989_s10 = sld [smem:[#allocation2 + $0x16]] }
  0x3b   :  { %4988 = vst [vmem:[#allocation51_spill] sm:$0xff] %v2821_v32  ;;  %2210 = vmatprep.subr.bf16.mxu1 %v2783_v1  ;;  %4989 = vst [vmem:[#allocation52_spill] sm:$0xff] %v2829_v57  ;;  %v1823_v1 = vld [vmem:[%s4564_s2 + $0x48] sm:$0xff]  ;;  %v198_v23 = vmul.f32 %v2832_v58, %v2829_v57  ;;  %v242_v55 = vmul.f32 %v2846_v18, %v2863_v5  ;;  %v1847_v47 = vld [vmem:[%s4564_s2 + $0x78] sm:$0xff]  ;;  %v2949_v62 = vunpack.c.l.bf16 %v1835_v34  ;;  %v2951_v52 = vunpack.c.h.bf16 %v1843_v40 }
  0x3c   :  { %4990 = vst [vmem:[#allocation53_spill] sm:$0xff] %v2832_v58  ;;  %4991 = vst [vmem:[#allocation54_spill] sm:$0xff] %v2835_v59  ;;  %2180 = vmatpush3.bf16.msra.mxu0 %v2810_v14  ;;  %v134_v4 = vadd.f32 %v132_v19, %v112_v42  ;;  %v2859_v19 = vstv %s2780_s20  ;;  %v2893_v38 = vunpack.c.h.bf16 %v1823_v1  ;;  %v2914_v14 = vunpack.c.l.bf16 %v1815_v41  ;;  %v1859_v8 = vld [vmem:[%s4564_s2 + $0x90] sm:$0xff]  ;;  %s3401_s20 = sld [smem:[#allocation2 + $0x102]] }
  0x3d   :  { %4992 = vst [vmem:[#allocation55_spill] sm:$0xff] %v2843_v9  ;;  %4993 = vst [vmem:[#allocation56_spill] sm:$0xff] %v2846_v18  ;;  %v2934_v41 = vunpack.c.h.bf16 %v1835_v34  ;;  %v2953_v48 = vunpack.c.h.bf16 %v1847_v47  ;;  %v2982_v16 = vunpack.c.l.bf16 %v1843_v40  ;;  %v2984_v7 = vunpack.c.l.bf16 %v1847_v47 }
  0x3e   :  { %2212 = vmatpush3.bf16.msra.mxu1 %v2818_v27  ;;  %4994 = vst [vmem:[#allocation57_spill] sm:$0xff] %v2853_v54  ;;  %4995 = vst [vmem:[#allocation58_spill] sm:$0xff] %v2856_v31  ;;  %v156_v42 = vadd.f32 %v154_v50, %v134_v4  ;;  %v2872_v27 = vunpack.c.l.bf16 %v2690_v28  ;;  %v1827_v50 = vld [vmem:[%s4564_s2 + $0x50] sm:$0xff]  ;;  %v2881_v4 = vstv %s2805_s14  ;;  %v220_v28 = vmul.f32 %v2835_v59, %v2843_v9  ;;  %s3055_s14 = sld [smem:[#allocation2 + $0x80]] }
  0x3f   :  { %4996 = vst [vmem:[#allocation59_spill] sm:$0xff] %v2859_v19  ;;  %4997 = vst [vmem:[#allocation60_spill] sm:$0xff] %v2863_v5  ;;  %2246 = vmatprep.subr.bf16.mxu1 %v2437_v3  ;;  %v2918_v49 = vunpack.c.h.bf16 %v1827_v50  ;;  %v264_v15 = vmul.f32 %v2853_v54, %v2893_v38  ;;  %v2943_v0 = vunpack.c.l.bf16 %v1827_v50  ;;  %v330_v33 = vmul.f32 %v2866_v63, %v2934_v41 }
  0x40   :  { %4998 = vst [vmem:[#allocation61_spill] sm:$0xff] %v2866_v63  ;;  %4999 = vst [vmem:[#allocation62_spill] sm:$0xff] %v2872_v27  ;;  %v178_v3 = vadd.f32 %v176_v6, %v156_v42  ;;  %v2907_v6 = vunpack.c.l.bf16 %v1807_v61  ;;  %v2909_v42 = vunpack.c.l.bf16 %v1811_v13  ;;  %v2928_v61 = vunpack.c.l.bf16 %v1819_v2 }
  0x41   :  { %5000 = vst [vmem:[#allocation63_spill] sm:$0xff] %v2875_v56  ;;  %5001 = vst [vmem:[#allocation64_spill] sm:$0xff] %v2881_v4  ;;  %v2932_v13 = vunpack.c.h.bf16 %v1831_v30  ;;  %v2947_v2 = vunpack.c.l.bf16 %v1831_v30  ;;  %v1855_v30 = vld [vmem:[%s4564_s2 + $0x88] sm:$0xff] }
  0x42   :  { %5002 = vst [vmem:[#allocation65_spill] sm:$0xff] %v2884_v51  ;;  %5003 = vst [vmem:[#allocation66_spill] sm:$0xff] %v2889_v43  ;;  %v200_v12 = vadd.f32 %v198_v23, %v178_v3  ;;  %v2930_v23 = vunpack.c.l.bf16 %v1823_v1  ;;  %v1851_v3 = vld [vmem:[%s4564_s2 + $0x80] sm:$0xff]  ;;  %v2945_v1 = vunpack.c.h.bf16 %v1839_v21 }
  0x43   :  { %5004 = vst [vmem:[#allocation67_spill] sm:$0xff] %v2893_v38  ;;  %5005 = vst [vmem:[#allocation68_spill] sm:$0xff] %v2902_v25  ;;  %v2962_v50 = vunpack.c.h.bf16 %v1851_v3  ;;  %v308_v34 = vmul.f32 %v2859_v19, %v2932_v13  ;;  %v3001_v47 = vunpack.c.l.bf16 %v1851_v3  ;;  %v3012_v38 = vunpack.c.l.bf16 %v1855_v30  ;;  %v1867_v3 = vld [vmem:[%s4564_s2 + $0xa0] sm:$0xff] }
  0x44   :  { %5006 = vst [vmem:[#allocation69_spill] sm:$0xff] %v2905_v37  ;;  %5007 = vst [vmem:[#allocation70_spill] sm:$0xff] %v2907_v6  ;;  %v222_v24 = vadd.f32 %v220_v28, %v200_v12  ;;  %v286_v12 = vmul.f32 %v2856_v31, %v2918_v49  ;;  %v2960_v28 = vstv %s2868_s18  ;;  %v352_v17 = vmul.f32 %v2881_v4, %v2945_v1  ;;  %s3339_s18 = sld [smem:[#allocation2 + $0x96]] }
  0x45   :  { %5008 = vst [vmem:[#allocation71_spill] sm:$0xff] %v2909_v42  ;;  %5009 = vst [vmem:[#allocation72_spill] sm:$0xff] %v2914_v14  ;;  %v396_v40 = vmul.f32 %v2960_v28, %v2953_v48 }
  0x46   :  { %5010 = vst [vmem:[#allocation73_spill] sm:$0xff] %v2918_v49  ;;  %5011 = vst [vmem:[#allocation74_spill] sm:$0xff] %v2928_v61  ;;  %v244_v39 = vadd.f32 %v242_v55, %v222_v24  ;;  %v2973_v24 = vunpack.c.l.bf16 %v1839_v21  ;;  %v2976_v55 = vstv %s2886_s22  ;;  %v739_v21 = vld [vmem:[%s4566_s4 + $0x280] sm:$0xff]  ;;  %s3128_s22 = sld [smem:[#allocation2 + $0x19]] }
  0x47   :  { %5012 = vst [vmem:[#allocation75_spill] sm:$0xff] %v2930_v23  ;;  %5013 = vst [vmem:[#allocation76_spill] sm:$0xff] %v2932_v13  ;;  %v3010_v49 = vmul.f32 %v2976_v55, %v2962_v50 }
  0x48   :  { %5014 = vst [vmem:[#allocation77_spill] sm:$0xff] %v2934_v41  ;;  %5015 = vst [vmem:[#allocation78_spill] sm:$0xff] %v2943_v0  ;;  %v266_v26 = vadd.f32 %v264_v15, %v244_v39  ;;  %v740_v39 = vld [vmem:[%s4566_s4 + $0x288] sm:$0xff]  ;;  %v374_v15 = vmul.f32 %v2884_v51, %v2951_v52  ;;  %v1863_v41 = vld [vmem:[%s4564_s2 + $0x98] sm:$0xff] }
  0x49   :  { %5016 = vst [vmem:[#allocation79_spill] sm:$0xff] %v2945_v1  ;;  %5017 = vst [vmem:[#allocation80_spill] sm:$0xff] %v2947_v2  ;;  %v3003_v1 = vunpack.c.h.bf16 %v1855_v30  ;;  %v1871_v30 = vld [vmem:[%s4564_s2 + $0xa8] sm:$0xff] }
  0x4a   :  { %5018 = vst [vmem:[#allocation81_spill] sm:$0xff] %v2949_v62  ;;  %5019 = vst [vmem:[#allocation82_spill] sm:$0xff] %v2951_v52  ;;  %v288_v13 = vadd.f32 %v286_v12, %v266_v26  ;;  %v3015_v52 = vstv %s2926_s13  ;;  %v3027_v26 = vpack.c.bf16 %v740_v39, %v739_v21  ;;  %s3037_s13 = sld [smem:[#allocation2 + $0x17]]  ;;  %v87_v21 = vmul.f32 %v2712_v36, %v2875_v56 }
  0x4b   :  { %5020 = vst [vmem:[#allocation83_spill] sm:$0xff] %v2953_v48  ;;  %5021 = vst [vmem:[#allocation84_spill] sm:$0xff] %v2960_v28  ;;  %v3020_v48 = vunpack.c.l.bf16 %v1859_v8  ;;  %v3025_v28 = vstv %s2939_s27  ;;  %v3048_v39 = vstv %s2955_s9  ;;  %s3063_s27 = sld [smem:[#allocation2 + $0x81]]  ;;  %v3067_v56 = vunpack.c.h.bf16 %v1871_v30  ;;  %s3074_s9 = sld [smem:[#allocation2 + $0x82]] }
  0x4c   :  { %5022 = vst [vmem:[#allocation85_spill] sm:$0xff] %v2962_v50  ;;  %5023 = vst [vmem:[#allocation86_spill] sm:$0xff] %v2973_v24  ;;  %v310_v12 = vadd.f32 %v308_v34, %v288_v13  ;;  %v3029_v50 = vunpack.c.l.bf16 %v1863_v41  ;;  %v440_v13 = vmul.f32 %v3015_v52, %v3003_v1  ;;  %v3045_v34 = vunpack.c.h.bf16 %v1863_v41  ;;  %2214 = vmatprep.subr.bf16.mxu0 %v3027_v26 }
  0x4d   :  { %5024 = vst [vmem:[#allocation87_spill] sm:$0xff] %v2976_v55  ;;  %5025 = vst [vmem:[#allocation88_spill] sm:$0xff] %v3001_v47  ;;  %v3022_v47 = vunpack.c.h.bf16 %v1859_v8  ;;  %v65_v8 = vmul.f32 %v2693_v29, %v2872_v27  ;;  %v3058_v27 = vstv %s2967_s21  ;;  %v109_v41 = vmul.f32 %v2739_v46, %v2889_v43  ;;  %s3304_s21 = sld [smem:[#allocation2 + $0x93]] }
  0x4e   :  { %5026 = vst [vmem:[#allocation89_spill] sm:$0xff] %v3003_v1  ;;  %5027 = vst [vmem:[#allocation90_spill] sm:$0xff] %v3012_v38  ;;  %v1875_v38 = vld [vmem:[%s4564_s2 + $0xb0] sm:$0xff]  ;;  %v332_v29 = vadd.f32 %v330_v33, %v310_v12  ;;  %v3065_v1 = vunpack.c.l.bf16 %v1867_v3  ;;  %v3079_v12 = vstv %s2989_s10  ;;  %v484_v43 = vmul.f32 %v3048_v39, %v3045_v34  ;;  %s3117_s10 = sld [smem:[#allocation2 + $0x18]] }
  0x4f   :  { %5028 = vst [vmem:[#allocation91_spill] sm:$0xff] %v3015_v52  ;;  %5029 = vst [vmem:[#allocation92_spill] sm:$0xff] %v3020_v48  ;;  %v67_v36 = vadd.f32 %v65_v8, %v2674_v22  ;;  %v3070_v48 = vstv %s2978_s24  ;;  %v1879_v8 = vld [vmem:[%s4564_s2 + $0xb8] sm:$0xff]  ;;  %v462_v22 = vmul.f32 %v3025_v28, %v3022_v47  ;;  %s3096_s24 = sld [smem:[#allocation2 + $0x84]] }
  0x50   :  { %5030 = vst [vmem:[#allocation93_spill] sm:$0xff] %v3022_v47  ;;  %5031 = vst [vmem:[#allocation94_spill] sm:$0xff] %v3025_v28  ;;  %v354_v33 = vadd.f32 %v352_v17, %v332_v29  ;;  %v3094_v29 = vunpack.c.l.bf16 %v1871_v30  ;;  %v3136_v47 = vstv %s3055_s14  ;;  %s3251_s14 = sld [smem:[#allocation2 + $0x8e]] }
  0x51   :  { %5032 = vst [vmem:[#allocation95_spill] sm:$0xff] %v3027_v26  ;;  %5033 = vst [vmem:[#allocation96_spill] sm:$0xff] %v3029_v50  ;;  %v3050_v50 = vunpack.c.h.bf16 %v1867_v3  ;;  %v3072_v26 = vunpack.c.h.bf16 %v1875_v38  ;;  %v89_v46 = vadd.f32 %v87_v21, %v67_v36  ;;  %v131_v3 = vmul.f32 %v2775_v60, %v2902_v25  ;;  %v1883_v21 = vld [vmem:[%s4564_s2 + $0xc0] sm:$0xff] }
  0x52   :  { %5034 = vst [vmem:[#allocation97_spill] sm:$0xff] %v3045_v34  ;;  %5035 = vst [vmem:[#allocation98_spill] sm:$0xff] %v3048_v39  ;;  %v3098_v36 = vunpack.c.l.bf16 %v1875_v38  ;;  %v153_v34 = vmul.f32 %v2800_v11, %v2905_v37  ;;  %v3113_v38 = vunpack.c.l.bf16 %v1879_v8  ;;  %v175_v11 = vmul.f32 %v2821_v32, %v2907_v6 }
  0x53   :  { %5036 = vst [vmem:[#allocation99_spill] sm:$0xff] %v3050_v50  ;;  %5037 = vst [vmem:[#allocation100_spill] sm:$0xff] %v3058_v27  ;;  %v3092_v17 = vmul.f32 %v3058_v27, %v3050_v50  ;;  %v111_v60 = vadd.f32 %v109_v41, %v89_v46  ;;  %v3107_v50 = vmul.f32 %v3070_v48, %v3067_v56  ;;  %v3122_v41 = vstv %s3037_s13  ;;  %s3235_s13 = sld [smem:[#allocation2 + $0x8c]] }
  0x54   :  { %5038 = vst [vmem:[#allocation101_spill] sm:$0xff] %v3065_v1  ;;  %5039 = vst [vmem:[#allocation102_spill] sm:$0xff] %v3067_v56  ;;  %v376_v1 = vadd.f32 %v374_v15, %v354_v33  ;;  %v3111_v30 = vmul.f32 %v3079_v12, %v3072_v26  ;;  %v3115_v15 = vunpack.c.h.bf16 %v1879_v8  ;;  %v197_v8 = vmul.f32 %v2832_v58, %v2909_v42 }
  0x55   :  { %5040 = vst [vmem:[#allocation103_spill] sm:$0xff] %v3070_v48  ;;  %5041 = vst [vmem:[#allocation104_spill] sm:$0xff] %v3072_v26  ;;  %v133_v33 = vadd.f32 %v131_v3, %v111_v60  ;;  %v3126_v26 = vunpack.c.l.bf16 %v1883_v21  ;;  %v3133_v56 = vstv %s3053_s0  ;;  %v3144_v3 = vstv %s3063_s27  ;;  %s3249_s0 = sld [smem:[#allocation2 + $0x8d]]  ;;  %s3277_s27 = sld [smem:[#allocation2 + $0x8f]] }
  0x56   :  { %5042 = vst [vmem:[#allocation105_spill] sm:$0xff] %v3079_v12  ;;  %5043 = vst [vmem:[#allocation106_spill] sm:$0xff] %v3094_v29  ;;  %v398_v46 = vadd.f32 %v396_v40, %v376_v1  ;;  %v72_v40 = vmul.f32 %v3136_v47, %v2709_v35  ;;  %v219_v58 = vmul.f32 %v2835_v59, %v2914_v14  ;;  %v3153_v42 = vstv %s3074_s9  ;;  %s3281_s9 = sld [smem:[#allocation2 + $0x90]] }
  0x57   :  { %5044 = vst [vmem:[#allocation107_spill] sm:$0xff] %v3098_v36  ;;  %5045 = vst [vmem:[#allocation108_spill] sm:$0xff] %v3115_v15  ;;  %v155_v60 = vadd.f32 %v153_v34, %v133_v33  ;;  %v94_v32 = vmul.f32 %v3144_v3, %v2733_v44  ;;  %v3156_v6 = vstv %s3076_s15  ;;  %v1887_v34 = vld [vmem:[%s4564_s2 + $0xc8] sm:$0xff]  ;;  %v116_v59 = vmul.f32 %v3153_v42, %v2736_v45  ;;  %s3283_s15 = sld [smem:[#allocation2 + $0x91]] }
  0x58   :  { %5046 = vst [vmem:[#allocation109_spill] sm:$0xff] %v3122_v41  ;;  %5047 = vst [vmem:[#allocation110_spill] sm:$0xff] %v3133_v56  ;;  %v420_v1 = vadd.f32 %v3010_v49, %v398_v46  ;;  %v74_v33 = vadd.f32 %v72_v40, %v3133_v56  ;;  %v572_v44 = vmul.f32 %v3122_v41, %v3115_v15  ;;  %v3168_v35 = vunpack.c.h.bf16 %v1883_v21 }
  0x59   :  { %5048 = vst [vmem:[#allocation111_spill] sm:$0xff] %v3136_v47  ;;  %5049 = vst [vmem:[#allocation112_spill] sm:$0xff] %v3144_v3  ;;  %v177_v46 = vadd.f32 %v175_v11, %v155_v60  ;;  %v241_v14 = vmul.f32 %v2846_v18, %v2928_v61  ;;  %v138_v40 = vmul.f32 %v3156_v6, %v2754_v53  ;;  %v3180_v45 = vstv %s3117_s10  ;;  %s3341_s10 = sld [smem:[#allocation2 + $0x97]] }
  0x5a   :  { %5050 = vst [vmem:[#allocation113_spill] sm:$0xff] %v3153_v42  ;;  %5051 = vst [vmem:[#allocation114_spill] sm:$0xff] %v3156_v6  ;;  %v442_v49 = vadd.f32 %v440_v13, %v420_v1  ;;  %v3173_v13 = vstv %s3096_s24  ;;  %v96_v60 = vadd.f32 %v94_v32, %v74_v33  ;;  %v3182_v15 = vunpack.c.l.bf16 %v1887_v34  ;;  %s3318_s24 = sld [smem:[#allocation2 + $0x94]] }
  0x5b   :  { %5052 = vst [vmem:[#allocation115_spill] sm:$0xff] %v3168_v35  ;;  %5053 = vst [vmem:[#allocation116_spill] sm:$0xff] %v3173_v13  ;;  %v199_v11 = vadd.f32 %v197_v8, %v177_v46  ;;  %v263_v21 = vmul.f32 %v2853_v54, %v2930_v23  ;;  %v3187_v18 = vstv %s3119_s19  ;;  %v3196_v46 = vunpack.c.h.bf16 %v1887_v34  ;;  %s3348_s19 = sld [smem:[#allocation2 + $0x98]] }
  0x5c   :  { %v464_v1 = vadd.f32 %v462_v22, %v442_v49  ;;  %5054 = vst [vmem:[#allocation117_spill] sm:$0xff] %v3180_v45  ;;  %5055 = vst [vmem:[#allocation118_spill] sm:$0xff] %v3187_v18  ;;  %v1891_v22 = vld [vmem:[%s4564_s2 + $0xd0] sm:$0xff]  ;;  %v118_v8 = vadd.f32 %v116_v59, %v96_v60  ;;  %v160_v49 = vmul.f32 %v3173_v13, %v2795_v10  ;;  %v3199_v33 = vstv %s3128_s22  ;;  %s3221_s2 = sld [smem:[#allocation2 + $0x8b]]  ;;  %s3358_s22 = sld [smem:[#allocation2 + $0x99]] }
  0x5d   :  { %v221_v32 = vadd.f32 %v219_v58, %v199_v11  ;;  %5056 = vst [vmem:[#allocation119_spill] sm:$0xff] %v3196_v46  ;;  %5057 = vst [vmem:[#allocation120_spill] sm:$0xff] %v3199_v33  ;;  %v285_v54 = vmul.f32 %v2856_v31, %v2943_v0  ;;  %v3204_v53 = vstv %s3138_s1  ;;  %v182_v59 = vmul.f32 %v3187_v18, %v2814_v20  ;;  %s3374_s1 = sld [smem:[#allocation2 + $0x9a]] }
  0x5e   :  { %v486_v61 = vadd.f32 %v484_v43, %v464_v1  ;;  %5058 = vst [vmem:[#allocation121_spill] sm:$0xff] %v3204_v53  ;;  %v140_v58 = vadd.f32 %v138_v40, %v118_v8  ;;  %v3211_v11 = vunpack.c.h.bf16 %v1891_v22  ;;  %v3214_v34 = vstv %s3146_s23  ;;  %s3388_s23 = sld [smem:[#allocation4 + $0x2]] }
  0x5f   :  { %v243_v1 = vadd.f32 %v241_v14, %v221_v32  ;;  %5060 = vst [vmem:[#allocation123_spill] sm:$0xff] %v3214_v34  ;;  %v307_v60 = vmul.f32 %v2859_v19, %v2947_v2  ;;  %v3219_v31 = vstv %s3158_s25  ;;  %v594_v40 = vmul.f32 %v3180_v45, %v3168_v35  ;;  %s3390_s25 = sld [smem:[#allocation2 + $0x100]] }
  0x60   :  { %v508_v43 = vadd.f32 %v3092_v17, %v486_v61  ;;  %5059 = vst [vmem:[#allocation122_spill] sm:$0xff] %v3211_v11  ;;  %5061 = vst [vmem:[#allocation124_spill] sm:$0xff] %v3219_v31  ;;  %v162_v14 = vadd.f32 %v160_v49, %v140_v58  ;;  %v204_v17 = vmul.f32 %v3204_v53, %v2829_v57  ;;  %v3228_v32 = vunpack.c.l.bf16 %v1891_v22 }
  0x61   :  { %v265_v61 = vadd.f32 %v263_v21, %v243_v1  ;;  %v329_v8 = vmul.f32 %v2866_v63, %v2949_v62  ;;  %v3233_v19 = vstv %s3175_s28  ;;  %v226_v49 = vmul.f32 %v3219_v31, %v2843_v9  ;;  %s3417_s28 = sld [smem:[#allocation2 + $0x103]] }
  0x62   :  { %v530_v10 = vadd.f32 %v3107_v50, %v508_v43  ;;  %5062 = vst [vmem:[#allocation125_spill] sm:$0xff] %v3233_v19  ;;  %v184_v21 = vadd.f32 %v182_v59, %v162_v14  ;;  %v616_v1 = vmul.f32 %v3199_v33, %v3196_v46  ;;  %v638_v22 = vmul.f32 %v3214_v34, %v3211_v11  ;;  %v5064_v14 = vld [vmem:[#allocation84_spill] sm:$0xff] }
  0x63   :  { %v287_v43 = vadd.f32 %v285_v54, %v265_v61  ;;  %v351_v58 = vmul.f32 %v2881_v4, %v2973_v24  ;;  %v3247_v63 = vstv %s3189_s29  ;;  %v248_v59 = vmul.f32 %v3233_v19, %v2863_v5  ;;  %v5065_v4 = vld [vmem:[#allocation88_spill] sm:$0xff]  ;;  %s3425_s29 = sld [smem:[#allocation2 + $0x104]] }
  0x64   :  { %v552_v50 = vadd.f32 %v3111_v30, %v530_v10  ;;  %5063 = vst [vmem:[#allocation126_spill] sm:$0xff] %v3247_v63  ;;  %v206_v30 = vadd.f32 %v204_v17, %v184_v21  ;;  %v373_v61 = vmul.f32 %v2884_v51, %v2982_v16  ;;  %v395_v9 = vmul.f32 %v5064_v14, %v2984_v7  ;;  %v5068_v17 = vld [vmem:[#allocation90_spill] sm:$0xff]  ;;  %v5070_v51 = vld [vmem:[#allocation96_spill] sm:$0xff] }
  0x65   :  { %v309_v10 = vadd.f32 %v307_v60, %v287_v43  ;;  %v417_v57 = vmul.f32 %v2976_v55, %v5065_v4  ;;  %v3262_v20 = vstv %s3206_s16  ;;  %v5069_v43 = vld [vmem:[#allocation92_spill] sm:$0xff]  ;;  %v3272_v14 = vmul.f32 %v3048_v39, %v5070_v51  ;;  %s3475_s16 = sld [smem:[#allocation2 + $0x107]] }
  0x66   :  { %v574_v54 = vadd.f32 %v572_v44, %v552_v50  ;;  %5066 = vst [vmem:[#allocation88_spill] sm:$0xff] %v3262_v20  ;;  %v228_v11 = vadd.f32 %v226_v49, %v206_v30  ;;  %v5067_v44 = vld [vmem:[#allocation67_spill] sm:$0xff]  ;;  %v439_v50 = vmul.f32 %v3015_v52, %v5068_v17  ;;  %v461_v21 = vmul.f32 %v3025_v28, %v5069_v43  ;;  %v5073_v30 = vld [vmem:[#allocation101_spill] sm:$0xff] }
  0x67   :  { %v331_v62 = vadd.f32 %v329_v8, %v309_v10  ;;  %v270_v60 = vmul.f32 %v3247_v63, %v5067_v44  ;;  %v3275_v55 = vstv %s3221_s2  ;;  %v3287_v39 = vmul.f32 %v3058_v27, %v5073_v30  ;;  %v5079_v44 = vld [vmem:[#allocation63_spill] sm:$0xff] }
  0x68   :  { %v596_v24 = vadd.f32 %v594_v40, %v574_v54  ;;  %5071 = vst [vmem:[#allocation90_spill] sm:$0xff] %v3275_v55  ;;  %v250_v49 = vadd.f32 %v248_v59, %v228_v11  ;;  %v5072_v54 = vld [vmem:[#allocation73_spill] sm:$0xff]  ;;  %v3291_v28 = vmul.f32 %v3070_v48, %v3094_v29  ;;  %v5075_v59 = vld [vmem:[#allocation76_spill] sm:$0xff]  ;;  %v3307_v27 = vstv %s3249_s0 }
  0x69   :  { %v353_v8 = vadd.f32 %v351_v58, %v331_v62  ;;  %v292_v10 = vmul.f32 %v3262_v20, %v5072_v54  ;;  %v3295_v62 = vmul.f32 %v3079_v12, %v3098_v36  ;;  %v314_v52 = vmul.f32 %v3275_v55, %v5075_v59  ;;  %5076 = vst [vmem:[#allocation96_spill] sm:$0xff] %v3307_v27  ;;  %v5078_v54 = vld [vmem:[#allocation62_spill] sm:$0xff] }
  0x6a   :  { %v618_v40 = vadd.f32 %v616_v1, %v596_v24  ;;  %v3298_v24 = vstv %s3235_s13  ;;  %v272_v58 = vadd.f32 %v270_v60, %v250_v49  ;;  %v3310_v48 = vstv %s3251_s14 }
  0x6b   :  { %5074 = vst [vmem:[#allocation92_spill] sm:$0xff] %v3298_v24  ;;  %v375_v1 = vadd.f32 %v373_v61, %v353_v8  ;;  %5077 = vst [vmem:[#allocation101_spill] sm:$0xff] %v3310_v48  ;;  %v71_v12 = vmul.f32 %v3136_v47, %v5078_v54  ;;  %v93_v36 = vmul.f32 %v3144_v3, %v5079_v44  ;;  %v5080_v61 = vld [vmem:[#allocation77_spill] sm:$0xff]  ;;  %v3365_v47 = vstv %s3300_s17  ;;  %s3825_s17 = sld [smem:[#allocation2 + $0x117]] }
  0x6c   :  { %v640_v11 = vadd.f32 %v638_v22, %v618_v40  ;;  %v294_v22 = vadd.f32 %v292_v10, %v272_v58  ;;  %v336_v60 = vmul.f32 %v3298_v24, %v5080_v61  ;;  %v3322_v40 = vmul.f32 %v3122_v41, %v3113_v38  ;;  %v5082_v41 = vld [vmem:[#allocation79_spill] sm:$0xff]  ;;  %5087 = vst [vmem:[#allocation127_spill] sm:$0xff] %v3365_v47 }
  0x6d   :  { %v397_v5 = vadd.f32 %v395_v9, %v375_v1  ;;  %v3326_v8 = vmul.f32 %v3180_v45, %v3126_v26  ;;  %v73_v49 = vadd.f32 %v71_v12, %v3133_v56  ;;  %v5081_v9 = vld [vmem:[#allocation66_spill] sm:$0xff]  ;;  %v3335_v1 = vmul.f32 %v3199_v33, %v3182_v15 }
  0x6e   :  { %v654_v29 = vmax.f32 %v640_v11, 0.0  ;;  %v115_v10 = vmul.f32 %v3153_v42, %v5081_v9  ;;  %v316_v58 = vadd.f32 %v314_v52, %v294_v22  ;;  %v358_v45 = vmul.f32 %v3307_v27, %v5082_v41  ;;  %v5083_v12 = vld [vmem:[#allocation82_spill] sm:$0xff] }
  0x6f   :  { %v419_v11 = vadd.f32 %v417_v57, %v397_v5  ;;  %v380_v56 = vmul.f32 %v3310_v48, %v5083_v12  ;;  %v3346_v42 = vstv %s3277_s27  ;;  %v95_v5 = vadd.f32 %v93_v36, %v73_v49  ;;  %s3497_s27 = sld [smem:[#allocation2 + $0x108]] }
  0x70   :  { %826 = vmatprep.mubr.f32.mxu0 %v654_v29  ;;  %5084 = vst [vmem:[#allocation76_spill] sm:$0xff] %v3346_v42  ;;  %v137_v57 = vmul.f32 %v3156_v6, %v2902_v25  ;;  %v338_v29 = vadd.f32 %v336_v60, %v316_v58  ;;  %v3353_v22 = vstv %s3281_s9  ;;  %v3356_v33 = vstv %s3283_s15  ;;  %v5088_v60 = vld [vmem:[#allocation83_spill] sm:$0xff]  ;;  %v5090_v6 = vld [vmem:[#allocation85_spill] sm:$0xff]  ;;  %s3686_s9 = sld [smem:[#allocation2 + $0x111]]  ;;  %s3688_s15 = sld [smem:[#allocation2 + $0x112]] }
  0x71   :  { %v441_v52 = vadd.f32 %v439_v50, %v419_v11  ;;  %5085 = vst [vmem:[#allocation62_spill] sm:$0xff] %v3353_v22  ;;  %5086 = vst [vmem:[#allocation63_spill] sm:$0xff] %v3356_v33  ;;  %v3362_v3 = vmul.f32 %v3214_v34, %v3228_v32  ;;  %v117_v12 = vadd.f32 %v115_v10, %v95_v5  ;;  %v3372_v58 = vstv %s3304_s21  ;;  %v5091_v25 = vld [vmem:[#allocation89_spill] sm:$0xff]  ;;  %v5092_v5 = vld [vmem:[#allocation70_spill] sm:$0xff] }
  0x72   :  { %v159_v36 = vmul.f32 %v3173_v13, %v2905_v37  ;;  %v360_v50 = vadd.f32 %v358_v45, %v338_v29  ;;  %v402_v11 = vmul.f32 %v3346_v42, %v5088_v60  ;;  %5089 = vst [vmem:[#allocation128_spill] sm:$0xff] %v3372_v58  ;;  %v424_v34 = vmul.f32 %v3353_v22, %v5090_v6  ;;  %v5093_v29 = vld [vmem:[#allocation93_spill] sm:$0xff]  ;;  %v5100_v6 = vld [vmem:[#allocation99_spill] sm:$0xff] }
  0x73   :  { %v463_v49 = vadd.f32 %v461_v21, %v441_v52  ;;  %v446_v41 = vmul.f32 %v3356_v33, %v5091_v25  ;;  %v139_v10 = vadd.f32 %v137_v57, %v117_v12  ;;  %v181_v21 = vmul.f32 %v3187_v18, %v5092_v5  ;;  %v5095_v25 = vld [vmem:[#allocation97_spill] sm:$0xff]  ;;  %v5097_v5 = vld [vmem:[#allocation71_spill] sm:$0xff] }
  0x74   :  { %v382_v52 = vadd.f32 %v380_v56, %v360_v50  ;;  %v468_v13 = vmul.f32 %v3365_v47, %v5093_v29  ;;  %v3386_v60 = vstv %s3318_s24  ;;  %v490_v12 = vmul.f32 %v3372_v58, %v5095_v25  ;;  %s3515_s24 = sld [smem:[#allocation2 + $0x109]] }
  0x75   :  { %v485_v45 = vadd.f32 %v3272_v14, %v463_v49  ;;  %5094 = vst [vmem:[#allocation129_spill] sm:$0xff] %v3386_v60  ;;  %v3395_v57 = vstv %s3328_s11  ;;  %v161_v18 = vadd.f32 %v159_v36, %v139_v10  ;;  %v203_v56 = vmul.f32 %v3204_v53, %v5097_v5  ;;  %v5102_v10 = vld [vmem:[#allocation72_spill] sm:$0xff] }
  0x76   :  { %5096 = vst [vmem:[#allocation130_spill] sm:$0xff] %v3395_v57  ;;  %v404_v49 = vadd.f32 %v402_v11, %v382_v52  ;;  %v3405_v50 = vstv %s3339_s18  ;;  %v3408_v29 = vstv %s3341_s10  ;;  %v512_v25 = vmul.f32 %v3386_v60, %v5100_v6  ;;  %v5103_v11 = vld [vmem:[#allocation102_spill] sm:$0xff]  ;;  %v5105_v6 = vld [vmem:[#allocation104_spill] sm:$0xff]  ;;  %s3844_s18 = sld [smem:[#allocation2 + $0x118]] }
  0x77   :  { %v507_v14 = vadd.f32 %v3287_v39, %v485_v45  ;;  %5098 = vst [vmem:[#allocation131_spill] sm:$0xff] %v3405_v50  ;;  %5099 = vst [vmem:[#allocation132_spill] sm:$0xff] %v3408_v29  ;;  %v3413_v37 = vstv %s3348_s19  ;;  %v183_v36 = vadd.f32 %v181_v21, %v161_v18  ;;  %v225_v53 = vmul.f32 %v3219_v31, %v5102_v10  ;;  %v5106_v18 = vld [vmem:[#allocation108_spill] sm:$0xff]  ;;  %v5107_v10 = vld [vmem:[#allocation74_spill] sm:$0xff] }
  0x78   :  { %5101 = vst [vmem:[#allocation133_spill] sm:$0xff] %v3413_v37  ;;  %v426_v39 = vadd.f32 %v424_v34, %v404_v49  ;;  %v534_v45 = vmul.f32 %v3395_v57, %v5103_v11  ;;  %v3423_v52 = vstv %s3358_s22  ;;  %v556_v9 = vmul.f32 %v3405_v50, %v5105_v6  ;;  %s3532_s22 = sld [smem:[#allocation2 + $0x10a]] }
  0x79   :  { %v529_v5 = vadd.f32 %v3291_v28, %v507_v14  ;;  %5104 = vst [vmem:[#allocation134_spill] sm:$0xff] %v3423_v52  ;;  %v3431_v21 = vmul.f32 %v3408_v29, %v5106_v18  ;;  %v205_v31 = vadd.f32 %v203_v56, %v183_v36  ;;  %v247_v28 = vmul.f32 %v3233_v19, %v5107_v10 }
  0x7a   :  { %v448_v14 = vadd.f32 %v446_v41, %v426_v39  ;;  %v3438_v49 = vmul.f32 %v3413_v37, %v3168_v35  ;;  %v3441_v11 = vstv %s3374_s1  ;;  %v3447_v18 = vmul.f32 %v3423_v52, %v3196_v46  ;;  %v5111_v46 = vld [vmem:[#allocation35_spill] sm:$0xff] }
  0x7b   :  { %v551_v34 = vadd.f32 %v3295_v62, %v529_v5  ;;  %5108 = vst [vmem:[#allocation135_spill] sm:$0xff] %v3441_v11  ;;  %v227_v56 = vadd.f32 %v225_v53, %v205_v31  ;;  %v269_v36 = vmul.f32 %v3247_v63, %v2930_v23  ;;  %v291_v41 = vmul.f32 %v3262_v20, %v2943_v0 }
  0x7c   :  { %v470_v5 = vadd.f32 %v468_v13, %v448_v14  ;;  %v3455_v39 = vstv %s3388_s23  ;;  %v3458_v19 = vstv %s3390_s25  ;;  %v3465_v53 = vstv %s3399_s26  ;;  %s3651_s26 = sld [smem:[#allocation2 + $0x10f]] }
  0x7d   :  { %v573_v62 = vadd.f32 %v3322_v40, %v551_v34  ;;  %5109 = vst [vmem:[#allocation136_spill] sm:$0xff] %v3455_v39  ;;  %5110 = vst [vmem:[#allocation137_spill] sm:$0xff] %v3458_v19  ;;  %v249_v35 = vadd.f32 %v247_v28, %v227_v56  ;;  %v78_v31 = vmul.f32 %v3458_v19, %v5111_v46  ;;  %v3468_v63 = vstv %s3401_s20  ;;  %v5114_v34 = vld [vmem:[#allocation37_spill] sm:$0xff]  ;;  %v723_v46 = vld [vmem:[%s4566_s4 + $0x200] sm:$0xff]  ;;  %s3552_s20 = sld [smem:[#allocation2 + $0x10b]] }
  0x7e   :  { %5112 = vst [vmem:[#allocation35_spill] sm:$0xff] %v3465_v53  ;;  %5113 = vst [vmem:[#allocation138_spill] sm:$0xff] %v3468_v63  ;;  %v492_v40 = vadd.f32 %v490_v12, %v470_v5  ;;  %v313_v13 = vmul.f32 %v3275_v55, %v2947_v2  ;;  %v100_v14 = vmul.f32 %v3465_v53, %v5114_v34  ;;  %v724_v28 = vld [vmem:[%s4566_s4 + $0x208] sm:$0xff]  ;;  %v5115_v12 = vld [vmem:[#allocation38_spill] sm:$0xff]  ;;  %v3487_v5 = vstv %s3417_s28 }
  0x7f   :  { %v595_v20 = vadd.f32 %v3326_v8, %v573_v62  ;;  %v271_v56 = vadd.f32 %v269_v36, %v249_v35  ;;  %v80_v8 = vadd.f32 %v78_v31, %v3455_v39  ;;  %v122_v62 = vmul.f32 %v3468_v63, %v5115_v12  ;;  %5116 = vst [vmem:[#allocation37_spill] sm:$0xff] %v3487_v5  ;;  %v5117_v2 = vld [vmem:[#allocation122_spill] sm:$0xff]  ;;  %v5119_v36 = vld [vmem:[#allocation81_spill] sm:$0xff] }
  0x80   :  { %v514_v55 = vadd.f32 %v512_v25, %v492_v40  ;;  %v3492_v6 = vmul.f32 %v3441_v11, %v5117_v2  ;;  %v3495_v0 = vstv %s3425_s29  ;;  %v335_v31 = vmul.f32 %v3298_v24, %v5119_v36  ;;  %v741_v12 = vld [vmem:[%s4566_s4 + $0x290] sm:$0xff]  ;;  %v742_v25 = vld [vmem:[%s4566_s4 + $0x298] sm:$0xff] }
  0x81   :  { %v617_v34 = vadd.f32 %v3335_v1, %v595_v20  ;;  %5118 = vst [vmem:[#allocation38_spill] sm:$0xff] %v3495_v0  ;;  %v293_v35 = vadd.f32 %v291_v41, %v271_v56  ;;  %v102_v20 = vadd.f32 %v100_v14, %v80_v8  ;;  %v5120_v1 = vld [vmem:[#allocation41_spill] sm:$0xff]  ;;  %v3510_v41 = vpack.c.bf16 %v724_v28, %v723_v46  ;;  %v5123_v36 = vld [vmem:[#allocation86_spill] sm:$0xff] }
  0x82   :  { %v144_v40 = vmul.f32 %v3487_v5, %v5120_v1  ;;  %v536_v23 = vadd.f32 %v534_v45, %v514_v55  ;;  %v3513_v56 = vstv %s3443_s30  ;;  %v357_v10 = vmul.f32 %v3307_v27, %v5123_v36  ;;  %v5124_v39 = vld [vmem:[#allocation46_spill] sm:$0xff]  ;;  %v5127_v46 = vld [vmem:[#allocation49_spill] sm:$0xff]  ;;  %s3746_s30 = sld [smem:[#allocation2 + $0x116]] }
  0x83   :  { %v639_v2 = vadd.f32 %v3362_v3, %v617_v34  ;;  %5121 = vst [vmem:[#allocation41_spill] sm:$0xff] %v3510_v41  ;;  %5122 = vst [vmem:[#allocation139_spill] sm:$0xff] %v3513_v56  ;;  %v315_v24 = vadd.f32 %v313_v13, %v293_v35  ;;  %v124_v63 = vadd.f32 %v122_v62, %v102_v20  ;;  %v725_v55 = vld [vmem:[%s4566_s4 + $0x210] sm:$0xff]  ;;  %v726_v3 = vld [vmem:[%s4566_s4 + $0x218] sm:$0xff]  ;;  %v3530_v45 = vstv %s3460_s12 }
  0x84   :  { %v166_v14 = vmul.f32 %v3495_v0, %v5124_v39  ;;  %v558_v61 = vadd.f32 %v556_v9, %v536_v23  ;;  %v3521_v1 = vpack.c.bf16 %v742_v25, %v741_v12  ;;  %5126 = vst [vmem:[#allocation46_spill] sm:$0xff] %v3530_v45  ;;  %v743_v23 = vld [vmem:[%s4566_s4 + $0x2a0] sm:$0xff]  ;;  %v744_v9 = vld [vmem:[%s4566_s4 + $0x2a8] sm:$0xff]  ;;  %v188_v28 = vmul.f32 %v3513_v56, %v5127_v46 }
  0x85   :  { %v653_v8 = vmax.f32 %v639_v2, 0.0  ;;  %v337_v13 = vadd.f32 %v335_v31, %v315_v24  ;;  %v379_v2 = vmul.f32 %v3310_v48, %v2982_v16  ;;  %v146_v39 = vadd.f32 %v144_v40, %v124_v63  ;;  %v5130_v25 = vld [vmem:[#allocation52_spill] sm:$0xff]  ;;  %v5193_v48 = vld [vmem:[#allocation78_spill] sm:$0xff] }
  0x86   :  { %5125 = vst [vmem:[#allocation86_spill] sm:$0xff] %v3521_v1  ;;  %v580_v62 = vadd.f32 %v3431_v21, %v558_v61  ;;  %v401_v24 = vmul.f32 %v3346_v42, %v2984_v7  ;;  %v423_v34 = vmul.f32 %v3353_v22, %v5065_v4  ;;  %v3550_v35 = vstv %s3475_s16  ;;  %s3574_s16 = sld [smem:[#allocation2 + $0x10c]] }
  0x87   :  { %827 = vmatmul.mubr.f32.vlgmr.msra.gmra.mrb[0].mxu0 %v653_v8  ;;  %5128 = vst [vmem:[#allocation49_spill] sm:$0xff] %v3550_v35  ;;  %v359_v63 = vadd.f32 %v357_v10, %v337_v13  ;;  %v3555_v31 = vpack.c.bf16 %v726_v3, %v725_v55  ;;  %v168_v12 = vadd.f32 %v166_v14, %v146_v39  ;;  %v727_v10 = vld [vmem:[%s4566_s4 + $0x220] sm:$0xff]  ;;  %v728_v14 = vld [vmem:[%s4566_s4 + $0x228] sm:$0xff]  ;;  %v3572_v8 = vstv %s3497_s27  ;;  %v745_v3 = vld [vmem:[%s4566_s4 + $0x2b0] sm:$0xff]  ;;  %s3596_s27 = sld [smem:[#allocation2 + $0x10d]] }
  0x88   :  { %2216 = vmatpush3.bf16.msra.mxu0 %v3510_v41  ;;  %v210_v61 = vmul.f32 %v3530_v45, %v5130_v25  ;;  %v602_v21 = vadd.f32 %v3438_v49, %v580_v62  ;;  %v445_v20 = vmul.f32 %v3356_v33, %v5068_v17  ;;  %v3563_v40 = vpack.c.bf16 %v744_v9, %v743_v23  ;;  %v746_v13 = vld [vmem:[%s4566_s4 + $0x2b8] sm:$0xff] }
  0x89   :  { %5129 = vst [vmem:[#allocation140_spill] sm:$0xff] %v3555_v31  ;;  %2218 = vmatprep.subr.bf16.mxu0 %v3521_v1  ;;  %5132 = vst [vmem:[#allocation141_spill] sm:$0xff] %v3572_v8  ;;  %v381_v49 = vadd.f32 %v379_v2, %v359_v63  ;;  %v467_v55 = vmul.f32 %v3365_v47, %v5069_v43  ;;  %v190_v23 = vadd.f32 %v188_v28, %v168_v12  ;;  %v5133_v9 = vld [vmem:[#allocation55_spill] sm:$0xff]  ;;  %v5137_v1 = vld [vmem:[#allocation106_spill] sm:$0xff] }
  0x8a   :  { %5131 = vst [vmem:[#allocation52_spill] sm:$0xff] %v3563_v40  ;;  %v232_v39 = vmul.f32 %v3550_v35, %v5133_v9  ;;  %v624_v46 = vadd.f32 %v3447_v18, %v602_v21  ;;  %v489_v2 = vmul.f32 %v3372_v58, %v5070_v51  ;;  %v3591_v62 = vmul.f32 %v3386_v60, %v5073_v30  ;;  %v5136_v9 = vld [vmem:[#allocation60_spill] sm:$0xff]  ;;  %v5151_v47 = vld [vmem:[#allocation77_spill] sm:$0xff] }
  0x8b   :  { %v3594_v63 = vstv %s3515_s24  ;;  %v403_v25 = vadd.f32 %v401_v24, %v381_v49  ;;  %v3599_v28 = vpack.c.bf16 %v728_v14, %v727_v10  ;;  %v212_v12 = vadd.f32 %v210_v61, %v190_v23  ;;  %v729_v24 = vld [vmem:[%s4566_s4 + $0x230] sm:$0xff]  ;;  %v730_v61 = vld [vmem:[%s4566_s4 + $0x238] sm:$0xff]  ;;  %s3620_s24 = sld [smem:[#allocation2 + $0x10e]] }
  0x8c   :  { %5134 = vst [vmem:[#allocation55_spill] sm:$0xff] %v3594_v63  ;;  %2220 = vmatpush3.bf16.msra.mxu0 %v3555_v31  ;;  %v254_v18 = vmul.f32 %v3572_v8, %v5136_v9  ;;  %v646_v21 = vadd.f32 %v3492_v6, %v624_v46  ;;  %v3606_v41 = vmul.f32 %v3395_v57, %v5137_v1  ;;  %v3618_v10 = vstv %s3532_s22  ;;  %v5140_v14 = vld [vmem:[#allocation107_spill] sm:$0xff]  ;;  %v731_v31 = vld [vmem:[%s4566_s4 + $0x240] sm:$0xff]  ;;  %v5144_v57 = vld [vmem:[#allocation73_spill] sm:$0xff]  ;;  %s3864_s22 = sld [smem:[#allocation2 + $0x11a]] }
  0x8d   :  { %5135 = vst [vmem:[#allocation142_spill] sm:$0xff] %v3599_v28  ;;  %2222 = vmatprep.subr.bf16.mxu0 %v3563_v40  ;;  %v3609_v60 = vpack.c.bf16 %v746_v13, %v745_v3  ;;  %5139 = vst [vmem:[#allocation106_spill] sm:$0xff] %v3618_v10  ;;  %v425_v6 = vadd.f32 %v423_v34, %v403_v25  ;;  %v3624_v49 = vmul.f32 %v3405_v50, %v5140_v14  ;;  %v747_v3 = vld [vmem:[%s4566_s4 + $0x2c0] sm:$0xff]  ;;  %v748_v13 = vld [vmem:[%s4566_s4 + $0x2c8] sm:$0xff] }
  0x8e   :  { %v234_v23 = vadd.f32 %v232_v39, %v212_v12  ;;  %v5141_v46 = vld [vmem:[#allocation67_spill] sm:$0xff]  ;;  %v656_v40 = vmax.f32 %v646_v21, 0.0  ;;  %v3636_v34 = vmul.f32 %v3408_v29, %v3113_v38  ;;  %v3640_v25 = vmul.f32 %v3413_v37, %v3126_v26  ;;  %v732_v39 = vld [vmem:[%s4566_s4 + $0x248] sm:$0xff]  ;;  %v749_v37 = vld [vmem:[%s4566_s4 + $0x2d0] sm:$0xff] }
  0x8f   :  { %5138 = vst [vmem:[#allocation60_spill] sm:$0xff] %v3609_v60  ;;  %v276_v9 = vmul.f32 %v3594_v63, %v5141_v46  ;;  %v3649_v12 = vstv %s3552_s20  ;;  %v447_v21 = vadd.f32 %v445_v20, %v425_v6  ;;  %v3654_v46 = vpack.c.bf16 %v730_v61, %v729_v24  ;;  %v750_v29 = vld [vmem:[%s4566_s4 + $0x2d8] sm:$0xff]  ;;  %s3664_s20 = sld [smem:[#allocation2 + $0x110]] }
  0x90   :  { %5142 = vst [vmem:[#allocation107_spill] sm:$0xff] %v3649_v12  ;;  %2224 = vmatpush3.bf16.msra.mxu0 %v3599_v28  ;;  %v256_v50 = vadd.f32 %v254_v18, %v234_v23  ;;  %v298_v58 = vmul.f32 %v3618_v10, %v5144_v57  ;;  %896 = vmatprep.mubr.f32.mxu1 %v656_v40  ;;  %v733_v57 = vld [vmem:[%s4566_s4 + $0x250] sm:$0xff]  ;;  %v734_v40 = vld [vmem:[%s4566_s4 + $0x258] sm:$0xff]  ;;  %v3684_v18 = vstv %s3574_s16  ;;  %s3700_s16 = sld [smem:[#allocation2 + $0x113]] }
  0x91   :  { %5143 = vst [vmem:[#allocation67_spill] sm:$0xff] %v3654_v46  ;;  %v3668_v20 = vmul.f32 %v3423_v52, %v3182_v15  ;;  %v3672_v24 = vmul.f32 %v3441_v11, %v3228_v32  ;;  %2226 = vmatprep.subr.bf16.mxu0 %v3609_v60  ;;  %v3675_v61 = vpack.c.bf16 %v748_v13, %v747_v3  ;;  %5146 = vst [vmem:[#allocation143_spill] sm:$0xff] %v3684_v18  ;;  %v751_v3 = vld [vmem:[%s4566_s4 + $0x2e0] sm:$0xff]  ;;  %v752_v13 = vld [vmem:[%s4566_s4 + $0x2e8] sm:$0xff] }
  0x92   :  { %v469_v6 = vadd.f32 %v467_v55, %v447_v21  ;;  %v3690_v23 = vpack.c.bf16 %v732_v39, %v731_v31  ;;  %v278_v60 = vadd.f32 %v276_v9, %v256_v50  ;;  %v320_v28 = vmul.f32 %v3649_v12, %v5075_v59  ;;  %v735_v31 = vld [vmem:[%s4566_s4 + $0x260] sm:$0xff]  ;;  %v736_v55 = vld [vmem:[%s4566_s4 + $0x268] sm:$0xff]  ;;  %v754_v21 = vld [vmem:[%s4566_s4 + $0x2f8] sm:$0xff] }
  0x93   :  { %5145 = vst [vmem:[#allocation73_spill] sm:$0xff] %v3675_v61  ;;  %v3702_v11 = vpack.c.bf16 %v750_v29, %v749_v37  ;;  %v3711_v39 = vstv %s3596_s27  ;;  %v77_v50 = vmul.f32 %v3458_v19, %v5078_v54  ;;  %v99_v59 = vmul.f32 %v3465_v53, %v5079_v44  ;;  %v753_v29 = vld [vmem:[%s4566_s4 + $0x2f0] sm:$0xff]  ;;  %s3734_s27 = sld [smem:[#allocation2 + $0x114]]  ;;  %v5190_v53 = vld [vmem:[#allocation39_spill] sm:$0xff] }
  0x94   :  { %5147 = vst [vmem:[#allocation144_spill] sm:$0xff] %v3690_v23  ;;  %5149 = vst [vmem:[#allocation146_spill] sm:$0xff] %v3711_v39  ;;  %v491_v9 = vadd.f32 %v489_v2, %v469_v6  ;;  %2228 = vmatpush3.bf16.msra.mxu0 %v3654_v46  ;;  %v3718_v37 = vpack.c.bf16 %v734_v40, %v733_v57  ;;  %v300_v52 = vadd.f32 %v298_v58, %v278_v60  ;;  %v5154_v57 = vld [vmem:[#allocation136_spill] sm:$0xff]  ;;  %v5155_v6 = vld [vmem:[#allocation66_spill] sm:$0xff] }
  0x95   :  { %5148 = vst [vmem:[#allocation145_spill] sm:$0xff] %v3702_v11  ;;  %v342_v54 = vmul.f32 %v3684_v18, %v5151_v47  ;;  %2230 = vmatprep.subr.bf16.mxu0 %v3675_v61  ;;  %v3729_v44 = vpack.c.bf16 %v752_v13, %v751_v3  ;;  %v3732_v2 = vstv %s3620_s24  ;;  %v79_v40 = vadd.f32 %v77_v50, %v5154_v57  ;;  %v5156_v46 = vld [vmem:[#allocation138_spill] sm:$0xff]  ;;  %v5158_v47 = vld [vmem:[#allocation79_spill] sm:$0xff]  ;;  %s3744_s24 = sld [smem:[#allocation2 + $0x115]]  ;;  %v5161_v61 = vld [vmem:[#allocation68_spill] sm:$0xff] }
  0x96   :  { %5150 = vst [vmem:[#allocation147_spill] sm:$0xff] %v3718_v37  ;;  %5153 = vst [vmem:[#allocation148_spill] sm:$0xff] %v3732_v2  ;;  %v121_v33 = vmul.f32 %v5156_v46, %v5155_v6  ;;  %v513_v22 = vadd.f32 %v3591_v62, %v491_v9  ;;  %v3740_v60 = vpack.c.bf16 %v736_v55, %v735_v31  ;;  %v3751_v50 = vstv %s3651_s26  ;;  %v738_v31 = vld [vmem:[%s4566_s4 + $0x278] sm:$0xff]  ;;  %v5162_v9 = vld [vmem:[#allocation82_spill] sm:$0xff] }
  0x97   :  { %5152 = vst [vmem:[#allocation77_spill] sm:$0xff] %v3729_v44  ;;  %v322_v58 = vadd.f32 %v320_v28, %v300_v52  ;;  %v364_v3 = vmul.f32 %v3711_v39, %v5158_v47  ;;  %v3748_v13 = vpack.c.bf16 %v754_v21, %v753_v29  ;;  %5160 = vst [vmem:[#allocation149_spill] sm:$0xff] %v3751_v50  ;;  %v737_v28 = vld [vmem:[%s4566_s4 + $0x270] sm:$0xff]  ;;  %v3766_v29 = vstv %s3664_s20  ;;  %v5166_v21 = vld [vmem:[#allocation69_spill] sm:$0xff] }
  0x98   :  { %5157 = vst [vmem:[#allocation66_spill] sm:$0xff] %v3740_v60  ;;  %v101_v6 = vadd.f32 %v99_v59, %v79_v40  ;;  %v143_v62 = vmul.f32 %v3487_v5, %v5161_v61  ;;  %v535_v52 = vadd.f32 %v3606_v41, %v513_v22  ;;  %2232 = vmatpush3.bf16.msra.mxu0 %v3690_v23  ;;  %5163 = vst [vmem:[#allocation68_spill] sm:$0xff] %v3766_v29  ;;  %v5167_v5 = vld [vmem:[#allocation83_spill] sm:$0xff]  ;;  %v5171_v57 = vld [vmem:[#allocation70_spill] sm:$0xff] }
  0x99   :  { %5159 = vst [vmem:[#allocation79_spill] sm:$0xff] %v3748_v13  ;;  %v344_v55 = vadd.f32 %v342_v54, %v322_v58  ;;  %v386_v59 = vmul.f32 %v3732_v2, %v5162_v9  ;;  %2234 = vmatprep.subr.bf16.mxu0 %v3702_v11  ;;  %v3770_v61 = vstv %s3686_s9  ;;  %v3773_v22 = vstv %s3688_s15  ;;  %v5170_v11 = vld [vmem:[#allocation85_spill] sm:$0xff] }
  0x9a   :  { %5164 = vst [vmem:[#allocation82_spill] sm:$0xff] %v3770_v61  ;;  %5165 = vst [vmem:[#allocation150_spill] sm:$0xff] %v3773_v22  ;;  %v123_v41 = vadd.f32 %v121_v33, %v101_v6  ;;  %v165_v40 = vmul.f32 %v3495_v0, %v5166_v21  ;;  %v557_v47 = vadd.f32 %v3624_v49, %v535_v52  ;;  %v3781_v58 = vstv %s3700_s16  ;;  %v5173_v52 = vld [vmem:[#allocation93_spill] sm:$0xff]  ;;  %s3846_s16 = sld [smem:[#allocation2 + $0x119]] }
  0x9b   :  { %v366_v23 = vadd.f32 %v364_v3, %v344_v55  ;;  %v408_v54 = vmul.f32 %v3751_v50, %v5167_v5  ;;  %5168 = vst [vmem:[#allocation69_spill] sm:$0xff] %v3781_v58  ;;  %v3783_v9 = vpack.c.bf16 %v738_v31, %v737_v28  ;;  %v430_v42 = vmul.f32 %v3766_v29, %v5170_v11  ;;  %v5172_v3 = vld [vmem:[#allocation89_spill] sm:$0xff]  ;;  %v3798_v11 = vld [vmem:[%s4565_s3] sm:$0xff]  ;;  %v5176_v55 = vld [vmem:[#allocation71_spill] sm:$0xff] }
  0x9c   :  { %v145_v46 = vadd.f32 %v143_v62, %v123_v41  ;;  %v187_v33 = vmul.f32 %v3513_v56, %v5171_v57  ;;  %v579_v6 = vadd.f32 %v3636_v34, %v557_v47  ;;  %2236 = vmatpush3.bf16.msra.mxu0 %v3718_v37  ;;  %v452_v5 = vmul.f32 %v3770_v61, %v5172_v3  ;;  %v3803_v57 = vld [vmem:[%s4565_s3 + $0x8] sm:$0xff]  ;;  %v3816_v41 = vld [vmem:[%s4565_s3 + $0x10] sm:$0xff]  ;;  %v5187_v56 = vld [vmem:[#allocation75_spill] sm:$0xff] }
  0x9d   :  { %5169 = vst [vmem:[#allocation83_spill] sm:$0xff] %v3783_v9  ;;  %v388_v49 = vadd.f32 %v386_v59, %v366_v23  ;;  %v474_v28 = vmul.f32 %v3773_v22, %v5173_v52  ;;  %2238 = vmatprep.subr.bf16.mxu0 %v3729_v44  ;;  %v5174_v34 = vld [vmem:[#allocation97_spill] sm:$0xff]  ;;  %v3809_v62 = vstv %s3734_s27  ;;  %v209_v59 = vmul.f32 %v3530_v45, %v5176_v55  ;;  %v5179_v44 = vld [vmem:[#allocation72_spill] sm:$0xff] }
  0x9e   :  { %v496_v23 = vmul.f32 %v3781_v58, %v5174_v34  ;;  %5175 = vst [vmem:[#allocation85_spill] sm:$0xff] %v3809_v62  ;;  %v167_v31 = vadd.f32 %v165_v40, %v145_v46  ;;  %v601_v21 = vadd.f32 %v3640_v25, %v579_v6  ;;  %v3820_v3 = vstv %s3744_s24  ;;  %v3838_v25 = vld [vmem:[%s4565_s3 + $0x18] sm:$0xff] }
  0x9f   :  { %v410_v47 = vadd.f32 %v408_v54, %v388_v49  ;;  %5177 = vst [vmem:[#allocation70_spill] sm:$0xff] %v3820_v3  ;;  %v3823_v52 = vstv %s3746_s30  ;;  %v231_v46 = vmul.f32 %v3550_v35, %v5179_v44  ;;  %v3830_v40 = vunpack.c.h.bf16 %v3798_v11 }
  0xa0   :  { %5178 = vst [vmem:[#allocation89_spill] sm:$0xff] %v3823_v52  ;;  %v189_v34 = vadd.f32 %v187_v33, %v167_v31  ;;  %v3833_v55 = vunpack.c.h.bf16 %v3803_v57  ;;  %v623_v54 = vadd.f32 %v3668_v20, %v601_v21  ;;  %2240 = vmatpush3.bf16.msra.mxu0 %v3740_v60  ;;  %v5182_v33 = vld [vmem:[#allocation99_spill] sm:$0xff]  ;;  %v3849_v44 = vunpack.c.h.bf16 %v3816_v41  ;;  %v3854_v31 = vld [vmem:[%s4565_s3 + $0x20] sm:$0xff]  ;;  %v5184_v21 = vld [vmem:[#allocation74_spill] sm:$0xff] }
  0xa1   :  { %5180 = vst [vmem:[#allocation93_spill] sm:$0xff] %v3830_v40  ;;  %v432_v6 = vadd.f32 %v430_v42, %v410_v47  ;;  %v518_v49 = vmul.f32 %v3809_v62, %v5182_v33  ;;  %2242 = vmatprep.subr.bf16.mxu0 %v3748_v13  ;;  %v253_v42 = vmul.f32 %v3572_v8, %v5184_v21  ;;  %v5185_v47 = vld [vmem:[#allocation33_spill] sm:$0xff]  ;;  %v5186_v60 = vld [vmem:[#allocation36_spill] sm:$0xff]  ;;  %v3869_v13 = vunpack.c.h.bf16 %v3838_v25  ;;  %v5189_v21 = vld [vmem:[#allocation30_spill] sm:$0xff] }
  0xa2   :  { %5181 = vst [vmem:[#allocation97_spill] sm:$0xff] %v3833_v55  ;;  %5183 = vst [vmem:[#allocation71_spill] sm:$0xff] %v3849_v44  ;;  %v211_v20 = vadd.f32 %v209_v59, %v189_v34  ;;  %v977_v33 = vmul.f32 %v3830_v40, %v5185_v47  ;;  %v993_v37 = vmul.f32 %v3833_v55, %v5186_v60  ;;  %v3874_v59 = vld [vmem:[%s4565_s3 + $0x28] sm:$0xff] }
  0xa3   :  { %v645_v35 = vadd.f32 %v3672_v24, %v623_v54  ;;  %v454_v45 = vadd.f32 %v452_v5, %v432_v6  ;;  %v275_v0 = vmul.f32 %v3594_v63, %v5187_v56  ;;  %5188 = vst [vmem:[#allocation72_spill] sm:$0xff] %v3869_v13  ;;  %v1009_v24 = vmul.f32 %v3849_v44, %v5190_v53  ;;  %v5192_v6 = vld [vmem:[#allocation102_spill] sm:$0xff]  ;;  %v5195_v44 = vld [vmem:[#allocation44_spill] sm:$0xff]  ;;  %v5206_v55 = vld [vmem:[#allocation81_spill] sm:$0xff] }
  0xa4   :  { %v233_v34 = vadd.f32 %v231_v46, %v211_v20  ;;  %v979_v8 = vadd.f32 %v977_v33, %v5189_v21  ;;  %v3880_v5 = vunpack.c.h.bf16 %v3854_v31  ;;  %2244 = vmatpush3.bf16.msra.mxu0 %v3783_v9  ;;  %v540_v63 = vmul.f32 %v3820_v3, %v5192_v6  ;;  %v3890_v46 = vld [vmem:[%s4565_s3 + $0x30] sm:$0xff]  ;;  %v5194_v33 = vld [vmem:[#allocation9_spill] sm:$0xff] }
  0xa5   :  { %v655_v54 = vmax.f32 %v645_v35, 0.0  ;;  %v476_v56 = vadd.f32 %v474_v28, %v454_v45  ;;  %v297_v19 = vmul.f32 %v3618_v10, %v5193_v48  ;;  %2278 = vmatprep.subr.bf16.mxu0 %v5194_v33  ;;  %v1025_v35 = vmul.f32 %v3869_v13, %v5195_v44  ;;  %v5197_v48 = vld [vmem:[#allocation104_spill] sm:$0xff] }
  0xa6   :  { %5191 = vst [vmem:[#allocation99_spill] sm:$0xff] %v3880_v5  ;;  %v255_v20 = vadd.f32 %v253_v42, %v233_v34  ;;  %v995_v27 = vadd.f32 %v993_v37, %v979_v8  ;;  %v3896_v45 = vunpack.c.h.bf16 %v3874_v59  ;;  %v562_v6 = vmul.f32 %v3823_v52, %v5197_v48  ;;  %v5199_v10 = vld [vmem:[#allocation80_spill] sm:$0xff]  ;;  %v3908_v8 = vld [vmem:[%s4565_s3 + $0x38] sm:$0xff] }
  0xa7   :  { %897 = vmatmul.mubr.f32.vlgmr.msra.gmra.mrb[0].mxu1 %v655_v54  ;;  %v498_v28 = vadd.f32 %v496_v23, %v476_v56  ;;  %v3901_v9 = vstv %s3825_s17  ;;  %v319_v42 = vmul.f32 %v3649_v12, %v5199_v10  ;;  %v5200_v37 = vld [vmem:[#allocation8_spill] sm:$0xff]  ;;  %v5201_v54 = vld [vmem:[#allocation47_spill] sm:$0xff]  ;;  %v3914_v56 = vunpack.c.h.bf16 %v3890_v46 }
  0xa8   :  { %5196 = vst [vmem:[#allocation74_spill] sm:$0xff] %v3896_v45  ;;  %5198 = vst [vmem:[#allocation33_spill] sm:$0xff] %v3901_v9  ;;  %2248 = vmatpush3.bf16.msra.mxu1 %v5200_v37  ;;  %v277_v34 = vadd.f32 %v275_v0, %v255_v20  ;;  %v1011_v33 = vadd.f32 %v1009_v24, %v995_v27  ;;  %v1041_v23 = vmul.f32 %v3880_v5, %v5201_v54  ;;  %v5203_v48 = vld [vmem:[#allocation11_spill] sm:$0xff]  ;;  %v3928_v0 = vld [vmem:[%s4565_s3 + $0x40] sm:$0xff] }
  0xa9   :  { %5202 = vst [vmem:[#allocation36_spill] sm:$0xff] %v3914_v56  ;;  %2250 = vmatprep.subr.bf16.mxu1 %v5203_v48  ;;  %v520_v13 = vadd.f32 %v518_v49, %v498_v28  ;;  %v3918_v10 = vstv %s3844_s18  ;;  %v3921_v12 = vstv %s3846_s16  ;;  %v341_v40 = vmul.f32 %v3684_v18, %v5206_v55  ;;  %v5207_v20 = vld [vmem:[#allocation51_spill] sm:$0xff]  ;;  %v5209_v28 = vld [vmem:[#allocation108_spill] sm:$0xff]  ;;  %v5212_v18 = vld [vmem:[#allocation53_spill] sm:$0xff] }
  0xaa   :  { %5204 = vst [vmem:[#allocation75_spill] sm:$0xff] %v3918_v10  ;;  %5205 = vst [vmem:[#allocation30_spill] sm:$0xff] %v3921_v12  ;;  %v299_v27 = vadd.f32 %v297_v19, %v277_v34  ;;  %v1027_v24 = vadd.f32 %v1025_v35, %v1011_v33  ;;  %v1057_v37 = vmul.f32 %v3896_v45, %v5207_v20  ;;  %v3933_v48 = vunpack.c.h.bf16 %v3908_v8  ;;  %v3945_v19 = vld [vmem:[%s4565_s3 + $0x48] sm:$0xff]  ;;  %v5211_v35 = vld [vmem:[#allocation12_spill] sm:$0xff] }
  0xab   :  { %v542_v49 = vadd.f32 %v540_v63, %v520_v13  ;;  %v584_v5 = vmul.f32 %v3901_v9, %v5209_v28  ;;  %v3938_v54 = vstv %s3864_s22  ;;  %v363_v55 = vmul.f32 %v3711_v39, %v5123_v36  ;;  %v5213_v28 = vld [vmem:[#allocation15_spill] sm:$0xff] }
  0xac   :  { %5208 = vst [vmem:[#allocation39_spill] sm:$0xff] %v3933_v48  ;;  %5210 = vst [vmem:[#allocation102_spill] sm:$0xff] %v3938_v54  ;;  %2252 = vmatpush3.bf16.msra.mxu1 %v5211_v35  ;;  %v321_v34 = vadd.f32 %v319_v42, %v299_v27  ;;  %v1043_v33 = vadd.f32 %v1041_v23, %v1027_v24  ;;  %v1073_v63 = vmul.f32 %v3914_v56, %v5212_v18  ;;  %v5214_v20 = vld [vmem:[#allocation115_spill] sm:$0xff]  ;;  %v3961_v42 = vld [vmem:[%s4565_s3 + $0x50] sm:$0xff] }
  0xad   :  { %v3951_v13 = vunpack.c.h.bf16 %v3928_v0  ;;  %2254 = vmatprep.subr.bf16.mxu1 %v5213_v28  ;;  %v564_v45 = vadd.f32 %v562_v6, %v542_v49  ;;  %v606_v36 = vmul.f32 %v3918_v10, %v5214_v20  ;;  %v385_v39 = vmul.f32 %v3732_v2, %v2982_v16  ;;  %v5215_v24 = vld [vmem:[#allocation54_spill] sm:$0xff]  ;;  %v5216_v49 = vld [vmem:[#allocation119_spill] sm:$0xff] }
  0xae   :  { %v343_v23 = vadd.f32 %v341_v40, %v321_v34  ;;  %v1059_v27 = vadd.f32 %v1057_v37, %v1043_v33  ;;  %v1089_v35 = vmul.f32 %v3933_v48, %v5215_v24  ;;  %v3966_v56 = vunpack.c.h.bf16 %v3945_v19  ;;  %v5217_v28 = vld [vmem:[#allocation122_spill] sm:$0xff]  ;;  %v3977_v40 = vld [vmem:[%s4565_s3 + $0x58] sm:$0xff]  ;;  %v5218_v37 = vld [vmem:[#allocation16_spill] sm:$0xff] }
  0xaf   :  { %v586_v6 = vadd.f32 %v584_v5, %v564_v45  ;;  %v628_v20 = vmul.f32 %v3921_v12, %v5216_v49  ;;  %v650_v16 = vmul.f32 %v3938_v54, %v5217_v28  ;;  %v407_v2 = vmul.f32 %v3751_v50, %v2984_v7  ;;  %v5219_v48 = vld [vmem:[#allocation56_spill] sm:$0xff]  ;;  %v5221_v49 = vld [vmem:[#allocation19_spill] sm:$0xff] }
  0xb0   :  { %2256 = vmatpush3.bf16.msra.mxu1 %v5218_v37  ;;  %v365_v34 = vadd.f32 %v363_v55, %v343_v23  ;;  %v1075_v33 = vadd.f32 %v1073_v63, %v1059_v27  ;;  %v1105_v5 = vmul.f32 %v3951_v13, %v5219_v48  ;;  %v3983_v45 = vunpack.c.h.bf16 %v3961_v42  ;;  %v3995_v55 = vld [vmem:[%s4565_s3 + $0x60] sm:$0xff]  ;;  %v5222_v27 = vld [vmem:[#allocation57_spill] sm:$0xff] }
  0xb1   :  { %2258 = vmatprep.subr.bf16.mxu1 %v5221_v49  ;;  %v608_v28 = vadd.f32 %v606_v36, %v586_v6  ;;  %v429_v7 = vmul.f32 %v3766_v29, %v5065_v4  ;;  %v451_v50 = vmul.f32 %v3770_v61, %v5068_v17  ;;  %v473_v37 = vmul.f32 %v3773_v22, %v5069_v43  ;;  %v5251_v61 = vld [vmem:[#allocation87_spill] sm:$0xff] }
  0xb2   :  { %5220 = vst [vmem:[#allocation78_spill] sm:$0xff] %v3983_v45  ;;  %v387_v63 = vadd.f32 %v385_v39, %v365_v34  ;;  %v1091_v23 = vadd.f32 %v1089_v35, %v1075_v33  ;;  %v1121_v49 = vmul.f32 %v3966_v56, %v5222_v27  ;;  %v4000_v36 = vunpack.c.h.bf16 %v3977_v40  ;;  %v4013_v39 = vld [vmem:[%s4565_s3 + $0x68] sm:$0xff] }
  0xb3   :  { %v630_v4 = vadd.f32 %v628_v20, %v608_v28  ;;  %v495_v17 = vmul.f32 %v3781_v58, %v5070_v51  ;;  %v517_v43 = vmul.f32 %v3809_v62, %v5073_v30  ;;  %v4008_v6 = vmul.f32 %v3820_v3, %v5137_v1  ;;  %v5224_v35 = vld [vmem:[#allocation21_spill] sm:$0xff]  ;;  %v5225_v20 = vld [vmem:[#allocation58_spill] sm:$0xff]  ;;  %v5227_v30 = vld [vmem:[#allocation23_spill] sm:$0xff] }
  0xb4   :  { %5223 = vst [vmem:[#allocation9_spill] sm:$0xff] %v4000_v36  ;;  %2260 = vmatpush3.bf16.msra.mxu1 %v5224_v35  ;;  %v409_v34 = vadd.f32 %v407_v2, %v387_v63  ;;  %v1107_v33 = vadd.f32 %v1105_v5, %v1091_v23  ;;  %v1137_v28 = vmul.f32 %v3983_v45, %v5225_v20  ;;  %v4019_v51 = vunpack.c.h.bf16 %v3995_v55  ;;  %v1909_v5 = vld [vmem:[%s4565_s3 + $0x70] sm:$0xff]  ;;  %v5228_v35 = vld [vmem:[#allocation59_spill] sm:$0xff]  ;;  %v5285_v45 = vld [vmem:[#allocation72_spill] sm:$0xff] }
  0xb5   :  { %2262 = vmatprep.subr.bf16.mxu1 %v5227_v30  ;;  %v652_v62 = vadd.f32 %v650_v16, %v630_v4  ;;  %v4024_v1 = vmul.f32 %v3823_v52, %v5140_v14  ;;  %v4028_v3 = vmul.f32 %v3901_v9, %v3113_v38  ;;  %v4032_v2 = vmul.f32 %v3918_v10, %v3126_v26 }
  0xb6   :  { %5226 = vst [vmem:[#allocation44_spill] sm:$0xff] %v4019_v51  ;;  %v431_v63 = vadd.f32 %v429_v7, %v409_v34  ;;  %v1123_v23 = vadd.f32 %v1121_v49, %v1107_v33  ;;  %v1153_v16 = vmul.f32 %v4000_v36, %v5228_v35  ;;  %v4040_v14 = vunpack.c.h.bf16 %v4013_v39  ;;  %v1910_v7 = vld [vmem:[%s4565_s3 + $0x78] sm:$0xff]  ;;  %v5230_v49 = vld [vmem:[#allocation25_spill] sm:$0xff] }
  0xb7   :  { %v658_v4 = vmax.f32 %v652_v62, 0.0  ;;  %v4044_v38 = vmul.f32 %v3921_v12, %v3182_v15  ;;  %v4048_v26 = vmul.f32 %v3938_v54, %v3228_v32  ;;  %v4051_v30 = vunpack.c.l.bf16 %v3798_v11  ;;  %v5231_v62 = vld [vmem:[#allocation61_spill] sm:$0xff]  ;;  %v1911_v32 = vld [vmem:[%s4565_s3 + $0x80] sm:$0xff]  ;;  %v5233_v54 = vld [vmem:[#allocation27_spill] sm:$0xff] }
  0xb8   :  { %5229 = vst [vmem:[#allocation104_spill] sm:$0xff] %v4040_v14  ;;  %2264 = vmatpush3.bf16.msra.mxu1 %v5230_v49  ;;  %v453_v34 = vadd.f32 %v451_v50, %v431_v63  ;;  %v1139_v33 = vadd.f32 %v1137_v28, %v1123_v23  ;;  %v1169_v10 = vmul.f32 %v4019_v51, %v5231_v62  ;;  %v4059_v15 = vunpack.c.h.bf16 %v1909_v5  ;;  %v5235_v49 = vld [vmem:[#allocation64_spill] sm:$0xff] }
  0xb9   :  { %2266 = vmatprep.subr.bf16.mxu1 %v5233_v54  ;;  %966 = vmatprep.mubr.f32.mxu0 %v658_v4  ;;  %v4066_v11 = vunpack.c.l.bf16 %v3803_v57  ;;  %v4069_v12 = vunpack.c.l.bf16 %v3816_v41  ;;  %v4072_v50 = vunpack.c.l.bf16 %v3838_v25  ;;  %v4075_v28 = vunpack.c.l.bf16 %v3854_v31  ;;  %v1912_v57 = vld [vmem:[%s4565_s3 + $0x88] sm:$0xff]  ;;  %v5259_v51 = vld [vmem:[#allocation48_spill] sm:$0xff] }
  0xba   :  { %5232 = vst [vmem:[#allocation80_spill] sm:$0xff] %v4059_v15  ;;  %v475_v63 = vadd.f32 %v473_v37, %v453_v34  ;;  %v1155_v23 = vadd.f32 %v1153_v16, %v1139_v33  ;;  %v1185_v9 = vmul.f32 %v4040_v14, %v5235_v49  ;;  %v4079_v52 = vunpack.c.h.bf16 %v1910_v7  ;;  %v5241_v37 = vld [vmem:[#allocation29_spill] sm:$0xff] }
  0xbb   :  { %5234 = vst [vmem:[#allocation8_spill] sm:$0xff] %v4075_v28  ;;  %v4085_v41 = vunpack.c.l.bf16 %v3874_v59  ;;  %v4088_v25 = vunpack.c.l.bf16 %v3890_v46  ;;  %v4091_v31 = vunpack.c.l.bf16 %v3908_v8  ;;  %v4093_v54 = vunpack.c.h.bf16 %v1911_v32  ;;  %v5243_v33 = vld [vmem:[#allocation65_spill] sm:$0xff]  ;;  %v1913_v59 = vld [vmem:[%s4565_s3 + $0x90] sm:$0xff]  ;;  %v5244_v46 = vld [vmem:[#allocation32_spill] sm:$0xff] }
  0xbc   :  { %5236 = vst [vmem:[#allocation11_spill] sm:$0xff] %v4079_v52  ;;  %2268 = vmatpush3.bf16.msra.mxu1 %v5241_v37  ;;  %v497_v16 = vadd.f32 %v495_v17, %v475_v63  ;;  %v4097_v4 = vunpack.c.l.bf16 %v3928_v0  ;;  %v1171_v34 = vadd.f32 %v1169_v10, %v1155_v23  ;;  %v1201_v58 = vmul.f32 %v4059_v15, %v5243_v33  ;;  %v5249_v23 = vld [vmem:[#allocation84_spill] sm:$0xff] }
  0xbd   :  { %5237 = vst [vmem:[#allocation81_spill] sm:$0xff] %v4085_v41  ;;  %5238 = vst [vmem:[#allocation108_spill] sm:$0xff] %v4088_v25  ;;  %2270 = vmatprep.subr.bf16.mxu1 %v5244_v46  ;;  %v4106_v8 = vunpack.c.l.bf16 %v3945_v19  ;;  %v4109_v22 = vunpack.c.l.bf16 %v3961_v42  ;;  %v4112_v17 = vunpack.c.l.bf16 %v3977_v40  ;;  %v4114_v0 = vunpack.c.h.bf16 %v1912_v57  ;;  %v1914_v46 = vld [vmem:[%s4565_s3 + $0x98] sm:$0xff] }
  0xbe   :  { %5239 = vst [vmem:[#allocation12_spill] sm:$0xff] %v4091_v31  ;;  %5240 = vst [vmem:[#allocation53_spill] sm:$0xff] %v4093_v54  ;;  %v519_v10 = vadd.f32 %v517_v43, %v497_v16  ;;  %v1187_v63 = vadd.f32 %v1185_v9, %v1171_v34  ;;  %v1217_v37 = vmul.f32 %v4079_v52, %v5249_v23  ;;  %v4124_v42 = vunpack.c.l.bf16 %v3995_v55  ;;  %v5253_v43 = vld [vmem:[#allocation40_spill] sm:$0xff] }
  0xbf   :  { %5242 = vst [vmem:[#allocation15_spill] sm:$0xff] %v4097_v4  ;;  %5245 = vst [vmem:[#allocation115_spill] sm:$0xff] %v4106_v8  ;;  %v976_v19 = vmul.f32 %v4051_v30, %v5185_v47  ;;  %v1233_v40 = vmul.f32 %v4093_v54, %v5251_v61  ;;  %v4128_v29 = vunpack.c.h.bf16 %v1913_v59  ;;  %v992_v9 = vmul.f32 %v4066_v11, %v5186_v60  ;;  %v1915_v47 = vld [vmem:[%s4565_s3 + $0xa0] sm:$0xff]  ;;  %v5254_v54 = vld [vmem:[#allocation43_spill] sm:$0xff] }
  0xc0   :  { %5246 = vst [vmem:[#allocation54_spill] sm:$0xff] %v4109_v22  ;;  %5247 = vst [vmem:[#allocation119_spill] sm:$0xff] %v4112_v17  ;;  %2272 = vmatpush3.bf16.msra.mxu1 %v5253_v43  ;;  %v541_v16 = vadd.f32 %v4008_v6, %v519_v10  ;;  %v1203_v34 = vadd.f32 %v1201_v58, %v1187_v63  ;;  %v1008_v52 = vmul.f32 %v4069_v12, %v5190_v53  ;;  %v5255_v43 = vld [vmem:[#allocation91_spill] sm:$0xff] }
  0xc1   :  { %5248 = vst [vmem:[#allocation122_spill] sm:$0xff] %v4114_v0  ;;  %5250 = vst [vmem:[#allocation16_spill] sm:$0xff] %v4124_v42  ;;  %v978_v55 = vadd.f32 %v976_v19, %v5189_v21  ;;  %2274 = vmatprep.subr.bf16.mxu1 %v5254_v54  ;;  %v4142_v15 = vunpack.c.l.bf16 %v4013_v39  ;;  %v4144_v60 = vunpack.c.l.bf16 %v1909_v5  ;;  %v1249_v6 = vmul.f32 %v4114_v0, %v5255_v43  ;;  %v1916_v21 = vld [vmem:[%s4565_s3 + $0xa8] sm:$0xff]  ;;  %v5257_v19 = vld [vmem:[#allocation94_spill] sm:$0xff] }
  0xc2   :  { %5252 = vst [vmem:[#allocation56_spill] sm:$0xff] %v4128_v29  ;;  %v4148_v58 = vunpack.c.h.bf16 %v1914_v46  ;;  %v563_v10 = vadd.f32 %v4024_v1, %v541_v16  ;;  %v1219_v63 = vadd.f32 %v1217_v37, %v1203_v34  ;;  %v1024_v54 = vmul.f32 %v4072_v50, %v5195_v44  ;;  %v5260_v44 = vld [vmem:[#allocation47_spill] sm:$0xff] }
  0xc3   :  { %v994_v53 = vadd.f32 %v992_v9, %v978_v55  ;;  %v4156_v39 = vunpack.c.l.bf16 %v1910_v7  ;;  %v4158_v5 = vunpack.c.l.bf16 %v1911_v32  ;;  %v1265_v0 = vmul.f32 %v4128_v29, %v5257_v19  ;;  %v1917_v9 = vld [vmem:[%s4565_s3 + $0xb0] sm:$0xff] }
  0xc4   :  { %5256 = vst [vmem:[#allocation19_spill] sm:$0xff] %v4148_v58  ;;  %v4162_v14 = vunpack.c.h.bf16 %v1915_v47  ;;  %2276 = vmatpush3.bf16.msra.mxu1 %v5259_v51  ;;  %v585_v1 = vadd.f32 %v4028_v3, %v563_v10  ;;  %v1235_v37 = vadd.f32 %v1233_v40, %v1219_v63  ;;  %v1040_v7 = vmul.f32 %v4075_v28, %v5260_v44  ;;  %v5263_v55 = vld [vmem:[#allocation98_spill] sm:$0xff]  ;;  %v5265_v51 = vld [vmem:[#allocation95_spill] sm:$0xff]  ;;  %v5269_v44 = vld [vmem:[#allocation100_spill] sm:$0xff] }
  0xc5   :  { %v1010_v16 = vadd.f32 %v1008_v52, %v994_v53  ;;  %v4171_v32 = vunpack.c.l.bf16 %v1912_v57  ;;  %v4173_v34 = vunpack.c.l.bf16 %v1913_v59  ;;  %v1281_v29 = vmul.f32 %v4148_v58, %v5263_v55  ;;  %2310 = vmatprep.subr.bf16.mxu1 %v5265_v51  ;;  %v1918_v52 = vld [vmem:[%s4565_s3 + $0xb8] sm:$0xff] }
  0xc6   :  { %5258 = vst [vmem:[#allocation57_spill] sm:$0xff] %v4162_v14  ;;  %v4177_v36 = vunpack.c.h.bf16 %v1916_v21  ;;  %v607_v3 = vadd.f32 %v4032_v2, %v585_v1  ;;  %v1251_v40 = vadd.f32 %v1249_v6, %v1235_v37  ;;  %v5266_v63 = vld [vmem:[#allocation51_spill] sm:$0xff]  ;;  %v4186_v59 = vunpack.c.l.bf16 %v1914_v46  ;;  %v1919_v1 = vld [vmem:[%s4565_s3 + $0xc0] sm:$0xff] }
  0xc7   :  { %5261 = vst [vmem:[#allocation21_spill] sm:$0xff] %v4171_v32  ;;  %5262 = vst [vmem:[#allocation58_spill] sm:$0xff] %v4173_v34  ;;  %v1026_v10 = vadd.f32 %v1024_v54, %v1010_v16  ;;  %v1056_v57 = vmul.f32 %v4085_v41, %v5266_v63  ;;  %v4188_v53 = vunpack.c.l.bf16 %v1915_v47  ;;  %v1297_v58 = vmul.f32 %v4162_v14, %v5269_v44  ;;  %v5271_v46 = vld [vmem:[#allocation103_spill] sm:$0xff]  ;;  %v5274_v14 = vld [vmem:[#allocation93_spill] sm:$0xff] }
  0xc8   :  { %5264 = vst [vmem:[#allocation23_spill] sm:$0xff] %v4177_v36  ;;  %5267 = vst [vmem:[#allocation59_spill] sm:$0xff] %v4186_v59  ;;  %v4192_v28 = vunpack.c.h.bf16 %v1917_v9  ;;  %v629_v2 = vadd.f32 %v4044_v38, %v607_v3  ;;  %v1267_v6 = vadd.f32 %v1265_v0, %v1251_v40  ;;  %v1072_v37 = vmul.f32 %v4088_v25, %v5212_v18  ;;  %v5273_v63 = vld [vmem:[#allocation111_spill] sm:$0xff]  ;;  %v5275_v41 = vld [vmem:[#allocation112_spill] sm:$0xff] }
  0xc9   :  { %5268 = vst [vmem:[#allocation25_spill] sm:$0xff] %v4188_v53  ;;  %v1042_v54 = vadd.f32 %v1040_v7, %v1026_v10  ;;  %v1313_v47 = vmul.f32 %v4177_v36, %v5271_v46  ;;  %v4202_v16 = vunpack.c.h.bf16 %v1918_v52  ;;  %v1088_v51 = vmul.f32 %v4091_v31, %v5215_v24  ;;  %v5276_v7 = vld [vmem:[#allocation97_spill] sm:$0xff]  ;;  %v5279_v24 = vld [vmem:[#allocation110_spill] sm:$0xff] }
  0xca   :  { %5270 = vst [vmem:[#allocation61_spill] sm:$0xff] %v4192_v28  ;;  %v981_v38 = vmul.f32 %v5274_v14, %v5273_v63  ;;  %v651_v0 = vadd.f32 %v4048_v26, %v629_v2  ;;  %v1283_v3 = vadd.f32 %v1281_v29, %v1267_v6  ;;  %v997_v10 = vmul.f32 %v5276_v7, %v5275_v41  ;;  %v5277_v53 = vld [vmem:[#allocation105_spill] sm:$0xff]  ;;  %v5281_v14 = vld [vmem:[#allocation71_spill] sm:$0xff] }
  0xcb   :  { %5272 = vst [vmem:[#allocation27_spill] sm:$0xff] %v4202_v16  ;;  %v1058_v40 = vadd.f32 %v1056_v57, %v1042_v54  ;;  %v1329_v18 = vmul.f32 %v4192_v28, %v5277_v53  ;;  %v4213_v25 = vunpack.c.h.bf16 %v1919_v1  ;;  %v1920_v36 = vld [vmem:[%s4565_s3 + $0xc8] sm:$0xff]  ;;  %v4224_v57 = vld [vmem:[%s4565_s3 + $0xd0] sm:$0xff]  ;;  %v1104_v6 = vmul.f32 %v4097_v4, %v5219_v48 }
  0xcc   :  { %v983_v31 = vadd.f32 %v981_v38, %v5279_v24  ;;  %v5280_v46 = vld [vmem:[#allocation113_spill] sm:$0xff]  ;;  %v657_v26 = vmax.f32 %v651_v0, 0.0  ;;  %v1299_v29 = vadd.f32 %v1297_v58, %v1283_v3  ;;  %v4228_v54 = vunpack.c.l.bf16 %v1916_v21  ;;  %v5284_v53 = vld [vmem:[#allocation114_spill] sm:$0xff] }
  0xcd   :  { %5278 = vst [vmem:[#allocation64_spill] sm:$0xff] %v4213_v25  ;;  %v1013_v44 = vmul.f32 %v5281_v14, %v5280_v46  ;;  %v1074_v2 = vadd.f32 %v1072_v37, %v1058_v40  ;;  %v5283_v28 = vld [vmem:[#allocation109_spill] sm:$0xff]  ;;  %v1029_v14 = vmul.f32 %v5285_v45, %v5284_v53  ;;  %v4234_v0 = vunpack.c.h.bf16 %v1920_v36  ;;  %v5289_v21 = vld [vmem:[#allocation10_spill] sm:$0xff] }
  0xce   :  { %5282 = vst [vmem:[#allocation29_spill] sm:$0xff] %v4228_v54  ;;  %v1345_v7 = vmul.f32 %v4202_v16, %v5283_v28  ;;  %v999_v38 = vadd.f32 %v997_v10, %v983_v31  ;;  %967 = vmatmul.mubr.f32.vlgmr.msra.gmra.mrb[2].mxu0 %v657_v26  ;;  %v1315_v58 = vadd.f32 %v1313_v47, %v1299_v29  ;;  %v4238_v40 = vunpack.c.l.bf16 %v1917_v9  ;;  %v5290_v31 = vld [vmem:[#allocation116_spill] sm:$0xff]  ;;  %v5291_v10 = vld [vmem:[#allocation99_spill] sm:$0xff]  ;;  %v5292_v26 = vld [vmem:[#allocation117_spill] sm:$0xff] }
  0xcf   :  { %5286 = vst [vmem:[#allocation65_spill] sm:$0xff] %v4234_v0  ;;  %v1090_v3 = vadd.f32 %v1088_v51, %v1074_v2  ;;  %v1120_v37 = vmul.f32 %v4106_v8, %v5222_v27  ;;  %v4241_v48 = vunpack.c.h.bf16 %v4224_v57  ;;  %2280 = vmatpush3.bf16.msra.mxu0 %v5289_v21  ;;  %v1045_v4 = vmul.f32 %v5291_v10, %v5290_v31  ;;  %v5293_v27 = vld [vmem:[#allocation13_spill] sm:$0xff]  ;;  %v5296_v21 = vld [vmem:[#allocation118_spill] sm:$0xff]  ;;  %v5298_v10 = vld [vmem:[#allocation120_spill] sm:$0xff] }
  0xd0   :  { %5287 = vst [vmem:[#allocation32_spill] sm:$0xff] %v4238_v40  ;;  %v1015_v16 = vadd.f32 %v1013_v44, %v999_v38  ;;  %v1331_v45 = vadd.f32 %v1329_v18, %v1315_v58  ;;  %v1361_v47 = vmul.f32 %v4213_v25, %v5292_v26  ;;  %v1136_v51 = vmul.f32 %v4109_v22, %v5225_v20  ;;  %v5297_v44 = vld [vmem:[#allocation74_spill] sm:$0xff]  ;;  %v5300_v20 = vld [vmem:[#allocation123_spill] sm:$0xff] }
  0xd1   :  { %5288 = vst [vmem:[#allocation84_spill] sm:$0xff] %v4241_v48  ;;  %v1106_v29 = vadd.f32 %v1104_v6, %v1090_v3  ;;  %2282 = vmatprep.subr.bf16.mxu0 %v5293_v27  ;;  %v4251_v9 = vunpack.c.l.bf16 %v1918_v52  ;;  %v4253_v2 = vunpack.c.l.bf16 %v1919_v1  ;;  %v1061_v38 = vmul.f32 %v5297_v44, %v5296_v21  ;;  %v5301_v27 = vld [vmem:[#allocation14_spill] sm:$0xff] }
  0xd2   :  { %v1031_v8 = vadd.f32 %v1029_v14, %v1015_v16  ;;  %v1347_v28 = vadd.f32 %v1345_v7, %v1331_v45  ;;  %v1377_v18 = vmul.f32 %v4234_v0, %v5298_v10  ;;  %v1152_v6 = vmul.f32 %v4112_v17, %v5228_v35  ;;  %v5302_v14 = vld [vmem:[#allocation121_spill] sm:$0xff]  ;;  %v5303_v16 = vld [vmem:[#allocation36_spill] sm:$0xff]  ;;  %v5306_v0 = vld [vmem:[#allocation39_spill] sm:$0xff] }
  0xd3   :  { %5294 = vst [vmem:[#allocation87_spill] sm:$0xff] %v4251_v9  ;;  %5295 = vst [vmem:[#allocation40_spill] sm:$0xff] %v4253_v2  ;;  %v1122_v58 = vadd.f32 %v1120_v37, %v1106_v29  ;;  %v4261_v3 = vunpack.c.l.bf16 %v1920_v36  ;;  %v1393_v52 = vmul.f32 %v4241_v48, %v5300_v20  ;;  %2284 = vmatpush3.bf16.msra.mxu0 %v5301_v27  ;;  %v5304_v35 = vld [vmem:[#allocation17_spill] sm:$0xff]  ;;  %v5305_v29 = vld [vmem:[#allocation124_spill] sm:$0xff] }
  0xd4   :  { %v1047_v1 = vadd.f32 %v1045_v4, %v1031_v8  ;;  %v1077_v25 = vmul.f32 %v5303_v16, %v5302_v14  ;;  %v1363_v44 = vadd.f32 %v1361_v47, %v1347_v28  ;;  %v1168_v7 = vmul.f32 %v4124_v42, %v5231_v62  ;;  %2286 = vmatprep.subr.bf16.mxu0 %v5304_v35 }
  0xd5   :  { %5299 = vst [vmem:[#allocation43_spill] sm:$0xff] %v4261_v3  ;;  %v1138_v45 = vadd.f32 %v1136_v51, %v1122_v58  ;;  %v1184_v37 = vmul.f32 %v4142_v15, %v5235_v49  ;;  %v1093_v48 = vmul.f32 %v5306_v0, %v5305_v29  ;;  %v980_v4 = vmul.f32 %v4051_v30, %v5273_v63  ;;  %v5307_v51 = vld [vmem:[#allocation18_spill] sm:$0xff]  ;;  %v5308_v58 = vld [vmem:[#allocation125_spill] sm:$0xff] }
  0xd6   :  { %v1063_v36 = vadd.f32 %v1061_v38, %v1047_v1  ;;  %v996_v8 = vmul.f32 %v4066_v11, %v5275_v41  ;;  %v1379_v28 = vadd.f32 %v1377_v18, %v1363_v44  ;;  %v1200_v62 = vmul.f32 %v4144_v60, %v5243_v33 }
  0xd7   :  { %v1154_v47 = vadd.f32 %v1152_v6, %v1138_v45  ;;  %v1216_v49 = vmul.f32 %v4156_v39, %v5249_v23  ;;  %2288 = vmatpush3.bf16.msra.mxu0 %v5307_v51  ;;  %v1109_v27 = vmul.f32 %v3951_v13, %v5308_v58  ;;  %v982_v1 = vadd.f32 %v980_v4, %v5279_v24  ;;  %v5309_v23 = vld [vmem:[#allocation20_spill] sm:$0xff] }
  0xd8   :  { %v1079_v38 = vadd.f32 %v1077_v25, %v1063_v36  ;;  %v1012_v63 = vmul.f32 %v4069_v12, %v5280_v46  ;;  %v1395_v41 = vadd.f32 %v1393_v52, %v1379_v28  ;;  %v1232_v18 = vmul.f32 %v4158_v5, %v5251_v61  ;;  %2290 = vmatprep.subr.bf16.mxu0 %v5309_v23  ;;  %v5310_v25 = vld [vmem:[#allocation126_spill] sm:$0xff]  ;;  %v5312_v4 = vld [vmem:[#allocation88_spill] sm:$0xff] }
  0xd9   :  { %v1170_v44 = vadd.f32 %v1168_v7, %v1154_v47  ;;  %v1248_v33 = vmul.f32 %v4171_v32, %v5255_v43  ;;  %v1125_v45 = vmul.f32 %v3966_v56, %v5310_v25  ;;  %v998_v35 = vadd.f32 %v996_v8, %v982_v1  ;;  %v5311_v7 = vld [vmem:[#allocation22_spill] sm:$0xff]  ;;  %v5314_v8 = vld [vmem:[#allocation8_spill] sm:$0xff] }
  0xda   :  { %v1095_v6 = vadd.f32 %v1093_v48, %v1079_v38  ;;  %v1028_v24 = vmul.f32 %v4072_v50, %v5284_v53  ;;  %v1405_v36 = vmax.f32 %v1395_v41, 0.0  ;;  %v1264_v52 = vmul.f32 %v4173_v34, %v5257_v19  ;;  %v5313_v48 = vld [vmem:[#allocation78_spill] sm:$0xff]  ;;  %v5316_v38 = vld [vmem:[#allocation100_spill] sm:$0xff]  ;;  %v5317_v19 = vld [vmem:[#allocation25_spill] sm:$0xff] }
  0xdb   :  { %v1186_v46 = vadd.f32 %v1184_v37, %v1170_v44  ;;  %v1280_v61 = vmul.f32 %v4186_v59, %v5263_v55  ;;  %2292 = vmatpush3.bf16.msra.mxu0 %v5311_v7  ;;  %v1141_v28 = vmul.f32 %v5313_v48, %v5312_v4  ;;  %v1014_v47 = vadd.f32 %v1012_v63, %v998_v35  ;;  %v5318_v41 = vld [vmem:[#allocation103_spill] sm:$0xff]  ;;  %v5319_v44 = vld [vmem:[#allocation24_spill] sm:$0xff]  ;;  %v5320_v23 = vld [vmem:[#allocation90_spill] sm:$0xff] }
  0xdc   :  { %v1111_v43 = vadd.f32 %v1109_v27, %v1095_v6  ;;  %v1044_v51 = vmul.f32 %v5314_v8, %v5290_v31  ;;  %v4308_v53 = vunpack.c.l.bf16 %v4224_v57  ;;  %1474 = vmatprep.mubr.f32.mxu1 %v1405_v36  ;;  %v1296_v1 = vmul.f32 %v5317_v19, %v5316_v38  ;;  %2294 = vmatprep.subr.bf16.mxu0 %v5319_v44  ;;  %v5321_v6 = vld [vmem:[#allocation9_spill] sm:$0xff]  ;;  %v5339_v19 = vld [vmem:[#allocation35_spill] sm:$0xff]  ;;  %v5348_v34 = vld [vmem:[#allocation62_spill] sm:$0xff] }
  0xdd   :  { %v1202_v37 = vadd.f32 %v1200_v62, %v1186_v46  ;;  %v1312_v55 = vmul.f32 %v4228_v54, %v5318_v41  ;;  %v1157_v63 = vmul.f32 %v5321_v6, %v5320_v23  ;;  %v1030_v35 = vadd.f32 %v1028_v24, %v1014_v47  ;;  %v5322_v31 = vld [vmem:[#allocation81_spill] sm:$0xff]  ;;  %v5326_v41 = vld [vmem:[#allocation92_spill] sm:$0xff] }
  0xde   :  { %5315 = vst [vmem:[#allocation91_spill] sm:$0xff] %v4308_v53  ;;  %v1127_v27 = vadd.f32 %v1125_v45, %v1111_v43  ;;  %v1060_v7 = vmul.f32 %v5322_v31, %v5296_v21  ;;  %v5323_v59 = vld [vmem:[#allocation105_spill] sm:$0xff]  ;;  %v4327_v38 = vmul.f32 %v4253_v2, %v5292_v26  ;;  %v5325_v45 = vld [vmem:[#allocation26_spill] sm:$0xff]  ;;  %v5327_v24 = vld [vmem:[#allocation44_spill] sm:$0xff] }
  0xdf   :  { %v1218_v57 = vadd.f32 %v1216_v49, %v1202_v37  ;;  %v1328_v62 = vmul.f32 %v4238_v40, %v5323_v59  ;;  %v5324_v36 = vld [vmem:[#allocation109_spill] sm:$0xff]  ;;  %2296 = vmatpush3.bf16.msra.mxu0 %v5325_v45  ;;  %v1173_v47 = vmul.f32 %v5327_v24, %v5326_v41  ;;  %v1046_v44 = vadd.f32 %v1044_v51, %v1030_v35  ;;  %v5328_v21 = vld [vmem:[#allocation108_spill] sm:$0xff]  ;;  %v5341_v24 = vld [vmem:[#allocation31_spill] sm:$0xff] }
  0xe0   :  { %v4323_v46 = vmul.f32 %v4251_v9, %v5324_v36  ;;  %v1143_v43 = vadd.f32 %v1141_v28, %v1127_v27  ;;  %v1076_v49 = vmul.f32 %v5328_v21, %v5302_v14  ;;  %v4336_v59 = vmul.f32 %v4261_v3, %v5298_v10  ;;  %v5330_v26 = vld [vmem:[#allocation28_spill] sm:$0xff]  ;;  %v5334_v14 = vld [vmem:[#allocation137_spill] sm:$0xff] }
  0xe1   :  { %v1234_v37 = vadd.f32 %v1232_v18, %v1218_v57  ;;  %v4340_v36 = vmul.f32 %v4308_v53, %v5300_v20  ;;  %2298 = vmatprep.subr.bf16.mxu0 %v5330_v26  ;;  %v5331_v45 = vld [vmem:[#allocation96_spill] sm:$0xff]  ;;  %v1062_v9 = vadd.f32 %v1060_v7, %v1046_v44  ;;  %v5335_v18 = vld [vmem:[#allocation93_spill] sm:$0xff]  ;;  %v5338_v20 = vld [vmem:[#allocation15_spill] sm:$0xff] }
  0xe2   :  { %v5332_v28 = vld [vmem:[#allocation104_spill] sm:$0xff]  ;;  %v1159_v2 = vadd.f32 %v1157_v63, %v1143_v43  ;;  %v985_v57 = vmul.f32 %v5335_v18, %v5334_v14  ;;  %v5336_v10 = vld [vmem:[#allocation101_spill] sm:$0xff]  ;;  %v1108_v53 = vmul.f32 %v5338_v20, %v5308_v58 }
  0xe3   :  { %5329 = vst [vmem:[#allocation94_spill] sm:$0xff] %v4340_v36  ;;  %v1189_v27 = vmul.f32 %v5332_v28, %v5331_v45  ;;  %v5333_v51 = vld [vmem:[#allocation12_spill] sm:$0xff]  ;;  %v1250_v40 = vadd.f32 %v1248_v33, %v1234_v37  ;;  %v5340_v26 = vld [vmem:[#allocation97_spill] sm:$0xff]  ;;  %2300 = vmatpush3.bf16.msra.mxu0 %v5341_v24  ;;  %v1078_v7 = vadd.f32 %v1076_v49, %v1062_v9  ;;  %v5345_v33 = vld [vmem:[#allocation34_spill] sm:$0xff] }
  0xe4   :  { %v1092_v35 = vmul.f32 %v5333_v51, %v5305_v29  ;;  %v5337_v3 = vld [vmem:[#allocation80_spill] sm:$0xff]  ;;  %v1001_v21 = vmul.f32 %v5340_v26, %v5339_v19  ;;  %v1175_v63 = vadd.f32 %v1173_v47, %v1159_v2  ;;  %v5343_v29 = vld [vmem:[#allocation138_spill] sm:$0xff]  ;;  %v5344_v51 = vld [vmem:[#allocation71_spill] sm:$0xff]  ;;  %2302 = vmatprep.subr.bf16.mxu0 %v5345_v33 }
  0xe5   :  { %v1205_v54 = vmul.f32 %v5337_v3, %v5336_v10  ;;  %v5342_v43 = vld [vmem:[#allocation136_spill] sm:$0xff]  ;;  %v1017_v28 = vmul.f32 %v5344_v51, %v5343_v29  ;;  %v1266_v18 = vadd.f32 %v1264_v52, %v1250_v40  ;;  %v5347_v3 = vld [vmem:[#allocation11_spill] sm:$0xff]  ;;  %v5349_v58 = vld [vmem:[#allocation53_spill] sm:$0xff] }
  0xe6   :  { %v987_v44 = vadd.f32 %v985_v57, %v5342_v43  ;;  %v5346_v37 = vld [vmem:[#allocation76_spill] sm:$0xff]  ;;  %v1237_v20 = vmul.f32 %v5349_v58, %v5348_v34  ;;  %v5350_v26 = vld [vmem:[#allocation115_spill] sm:$0xff]  ;;  %v1191_v24 = vadd.f32 %v1189_v27, %v1175_v63  ;;  %v1094_v2 = vadd.f32 %v1092_v35, %v1078_v7  ;;  %v5351_v47 = vld [vmem:[#allocation37_spill] sm:$0xff] }
  0xe7   :  { %v1221_v31 = vmul.f32 %v5347_v3, %v5346_v37  ;;  %v1124_v6 = vmul.f32 %v5350_v26, %v5310_v25  ;;  %v5352_v49 = vld [vmem:[#allocation72_spill] sm:$0xff]  ;;  %v1282_v8 = vadd.f32 %v1280_v61, %v1266_v18  ;;  %v5353_v51 = vld [vmem:[#allocation63_spill] sm:$0xff]  ;;  %v5354_v40 = vld [vmem:[#allocation122_spill] sm:$0xff]  ;;  %v1140_v3 = vmul.f32 %v4109_v22, %v5312_v4 }
  0xe8   :  { %v1003_v9 = vadd.f32 %v1001_v21, %v987_v44  ;;  %v1033_v57 = vmul.f32 %v5352_v49, %v5351_v47  ;;  %v1253_v52 = vmul.f32 %v5354_v40, %v5353_v51  ;;  %v5355_v33 = vld [vmem:[#allocation127_spill] sm:$0xff]  ;;  %v5356_v32 = vld [vmem:[#allocation56_spill] sm:$0xff]  ;;  %v5357_v58 = vld [vmem:[#allocation42_spill] sm:$0xff]  ;;  %v1207_v48 = vadd.f32 %v1205_v54, %v1191_v24 }
  0xe9   :  { %v1269_v36 = vmul.f32 %v5356_v32, %v5355_v33  ;;  %2304 = vmatpush3.bf16.msra.mxu0 %v5357_v58  ;;  %v1110_v25 = vadd.f32 %v1108_v53, %v1094_v2  ;;  %v5358_v35 = vld [vmem:[#allocation38_spill] sm:$0xff]  ;;  %v5359_v21 = vld [vmem:[#allocation99_spill] sm:$0xff]  ;;  %v1298_v7 = vadd.f32 %v1296_v1, %v1282_v8  ;;  %v5360_v44 = vld [vmem:[#allocation45_spill] sm:$0xff]  ;;  %v1156_v4 = vmul.f32 %v4112_v17, %v5320_v23 }
  0xea   :  { %v1019_v27 = vadd.f32 %v1017_v28, %v1003_v9  ;;  %v1049_v63 = vmul.f32 %v5359_v21, %v5358_v35  ;;  %2306 = vmatprep.subr.bf16.mxu0 %v5360_v44  ;;  %v5361_v61 = vld [vmem:[#allocation128_spill] sm:$0xff]  ;;  %v5362_v18 = vld [vmem:[#allocation19_spill] sm:$0xff]  ;;  %v5363_v40 = vld [vmem:[#allocation129_spill] sm:$0xff]  ;;  %v1223_v22 = vadd.f32 %v1221_v31, %v1207_v48 }
  0xeb   :  { %v1285_v49 = vmul.f32 %v5362_v18, %v5361_v61  ;;  %v5364_v26 = vld [vmem:[#allocation57_spill] sm:$0xff]  ;;  %v1126_v58 = vadd.f32 %v1124_v6, %v1110_v25  ;;  %v5365_v53 = vld [vmem:[#allocation139_spill] sm:$0xff]  ;;  %v5366_v28 = vld [vmem:[#allocation74_spill] sm:$0xff]  ;;  %v1314_v2 = vadd.f32 %v1312_v55, %v1298_v7  ;;  %v1172_v18 = vmul.f32 %v4124_v42, %v5326_v41 }
  0xec   :  { %v1301_v32 = vmul.f32 %v5364_v26, %v5363_v40  ;;  %v1035_v54 = vadd.f32 %v1033_v57, %v1019_v27  ;;  %v1065_v24 = vmul.f32 %v5366_v28, %v5365_v53  ;;  %v5367_v9 = vld [vmem:[#allocation130_spill] sm:$0xff]  ;;  %v5368_v8 = vld [vmem:[#allocation23_spill] sm:$0xff]  ;;  %v5370_v44 = vld [vmem:[#allocation61_spill] sm:$0xff]  ;;  %v1239_v40 = vadd.f32 %v1237_v20, %v1223_v22 }
  0xed   :  { %v1317_v1 = vmul.f32 %v5368_v8, %v5367_v9  ;;  %v5369_v21 = vld [vmem:[#allocation131_spill] sm:$0xff]  ;;  %v5371_v26 = vld [vmem:[#allocation50_spill] sm:$0xff]  ;;  %v1142_v23 = vadd.f32 %v1140_v3, %v1126_v58  ;;  %v1330_v57 = vadd.f32 %v1328_v62, %v1314_v2  ;;  %v5373_v25 = vld [vmem:[#allocation132_spill] sm:$0xff] }
  0xee   :  { %v1333_v33 = vmul.f32 %v5370_v44, %v5369_v21  ;;  %2308 = vmatpush3.bf16.msra.mxu0 %v5371_v26  ;;  %v1051_v48 = vadd.f32 %v1049_v63, %v1035_v54  ;;  %v5372_v6 = vld [vmem:[#allocation46_spill] sm:$0xff]  ;;  %v5374_v55 = vld [vmem:[#allocation27_spill] sm:$0xff]  ;;  %v5375_v7 = vld [vmem:[#allocation133_spill] sm:$0xff]  ;;  %v1188_v44 = vmul.f32 %v4142_v15, %v5331_v45  ;;  %v1255_v17 = vadd.f32 %v1253_v52, %v1239_v40 }
  0xef   :  { %v1081_v31 = vmul.f32 %v5303_v16, %v5372_v6  ;;  %v1349_v27 = vmul.f32 %v5374_v55, %v5373_v25  ;;  %v5376_v28 = vld [vmem:[#allocation64_spill] sm:$0xff]  ;;  %v1158_v41 = vadd.f32 %v1156_v4, %v1142_v23  ;;  %v5377_v26 = vld [vmem:[#allocation49_spill] sm:$0xff]  ;;  %v1346_v3 = vadd.f32 %v4323_v46, %v1330_v57  ;;  %v5385_v57 = vld [vmem:[#allocation107_spill] sm:$0xff] }
  0xf0   :  { %v1365_v8 = vmul.f32 %v5376_v28, %v5375_v7  ;;  %v1067_v42 = vadd.f32 %v1065_v24, %v1051_v48  ;;  %v1097_v22 = vmul.f32 %v5306_v0, %v5377_v26  ;;  %v1204_v16 = vmul.f32 %v4144_v60, %v5336_v10  ;;  %v5378_v62 = vld [vmem:[#allocation141_spill] sm:$0xff] }
  0xf1   :  { %v1113_v20 = vmul.f32 %v3951_v13, %v5378_v62  ;;  %v984_v63 = vmul.f32 %v4051_v30, %v5334_v14  ;;  %v1271_v58 = vadd.f32 %v1269_v36, %v1255_v17  ;;  %v1174_v54 = vadd.f32 %v1172_v18, %v1158_v41  ;;  %v5379_v30 = vld [vmem:[#allocation55_spill] sm:$0xff]  ;;  %v5382_v18 = vld [vmem:[#allocation94_spill] sm:$0xff]  ;;  %v5383_v2 = vld [vmem:[#allocation21_spill] sm:$0xff] }
  0xf2   :  { %v1083_v45 = vadd.f32 %v1081_v31, %v1067_v42  ;;  %v1000_v40 = vmul.f32 %v4066_v11, %v5339_v19  ;;  %v1362_v52 = vadd.f32 %v4327_v38, %v1346_v3  ;;  %v1220_v0 = vmul.f32 %v4156_v39, %v5346_v37  ;;  %v5380_v37 = vld [vmem:[#allocation106_spill] sm:$0xff]  ;;  %v5387_v41 = vld [vmem:[#allocation127_spill] sm:$0xff] }
  0xf3   :  { %v986_v46 = vadd.f32 %v984_v63, %v5342_v43  ;;  %v1016_v10 = vmul.f32 %v4069_v12, %v5343_v29  ;;  %v1287_v13 = vadd.f32 %v1285_v49, %v1271_v58  ;;  %v1190_v4 = vadd.f32 %v1188_v44, %v1174_v54  ;;  %v5381_v12 = vld [vmem:[#allocation78_spill] sm:$0xff] }
  0xf4   :  { %v1099_v24 = vadd.f32 %v1097_v22, %v1083_v45  ;;  %v1129_v17 = vmul.f32 %v3966_v56, %v5379_v30  ;;  %v1378_v42 = vadd.f32 %v4336_v59, %v1362_v52  ;;  %v1236_v11 = vmul.f32 %v4158_v5, %v5348_v34  ;;  %v5384_v59 = vld [vmem:[#allocation8_spill] sm:$0xff]  ;;  %v5388_v22 = vld [vmem:[#allocation58_spill] sm:$0xff]  ;;  %v5390_v45 = vld [vmem:[#allocation143_spill] sm:$0xff] }
  0xf5   :  { %v1002_v19 = vadd.f32 %v1000_v40, %v986_v46  ;;  %v1032_v38 = vmul.f32 %v4072_v50, %v5351_v47  ;;  %v1303_v36 = vadd.f32 %v1301_v32, %v1287_v13  ;;  %v1206_v14 = vadd.f32 %v1204_v16, %v1190_v4  ;;  %v5386_v50 = vld [vmem:[#allocation9_spill] sm:$0xff]  ;;  %v5391_v40 = vld [vmem:[#allocation44_spill] sm:$0xff]  ;;  %v5394_v46 = vld [vmem:[#allocation59_spill] sm:$0xff] }
  0xf6   :  { %v1115_v43 = vadd.f32 %v1113_v20, %v1099_v24  ;;  %v1145_v29 = vmul.f32 %v5381_v12, %v5380_v37  ;;  %v1394_v49 = vadd.f32 %v5382_v18, %v1378_v42  ;;  %v1252_v56 = vmul.f32 %v5383_v2, %v5353_v51  ;;  %v5389_v20 = vld [vmem:[#allocation81_spill] sm:$0xff]  ;;  %v5395_v4 = vld [vmem:[#allocation108_spill] sm:$0xff] }
  0xf7   :  { %v1018_v44 = vadd.f32 %v1016_v10, %v1002_v19  ;;  %v1048_v23 = vmul.f32 %v5384_v59, %v5358_v35  ;;  %v1319_v34 = vadd.f32 %v1317_v1, %v1303_v36  ;;  %v1222_v48 = vadd.f32 %v1220_v0, %v1206_v14  ;;  %v5392_v1 = vld [vmem:[#allocation134_spill] sm:$0xff]  ;;  %v5393_v52 = vld [vmem:[#allocation65_spill] sm:$0xff]  ;;  %v5398_v19 = vld [vmem:[#allocation104_spill] sm:$0xff] }
  0xf8   :  { %v1131_v31 = vadd.f32 %v1129_v17, %v1115_v43  ;;  %v1161_v32 = vmul.f32 %v5386_v50, %v5385_v57  ;;  %v1404_v47 = vmax.f32 %v1394_v49, 0.0  ;;  %v1268_v3 = vmul.f32 %v5388_v22, %v5387_v41  ;;  %v5396_v17 = vld [vmem:[#allocation41_spill] sm:$0xff]  ;;  %v5399_v36 = vld [vmem:[#allocation86_spill] sm:$0xff]  ;;  %v5400_v14 = vld [vmem:[#allocation135_spill] sm:$0xff] }
  0xf9   :  { %v1034_v16 = vadd.f32 %v1032_v38, %v1018_v44  ;;  %v1064_v63 = vmul.f32 %v5389_v20, %v5365_v53  ;;  %v1335_v58 = vadd.f32 %v1333_v33, %v1319_v34  ;;  %v1238_v51 = vadd.f32 %v1236_v11, %v1222_v48  ;;  %v5397_v11 = vld [vmem:[#allocation146_spill] sm:$0xff]  ;;  %v5401_v43 = vld [vmem:[#allocation84_spill] sm:$0xff]  ;;  %v5403_v18 = vld [vmem:[#allocation25_spill] sm:$0xff] }
  0xfa   :  { %v1147_v54 = vadd.f32 %v1145_v29, %v1131_v31  ;;  %v1177_v35 = vmul.f32 %v5391_v40, %v5390_v45  ;;  %1475 = vmatmul.mubr.f32.vlgmr.msra.gmra.mrb[2].mxu1 %v1404_v47  ;;  %v1381_v0 = vmul.f32 %v5393_v52, %v5392_v1  ;;  %v1284_v10 = vmul.f32 %v5394_v46, %v5361_v61  ;;  %v5402_v29 = vld [vmem:[#allocation129_spill] sm:$0xff]  ;;  %v5404_v44 = vld [vmem:[#allocation12_spill] sm:$0xff]  ;;  %v5408_v47 = vld [vmem:[#allocation15_spill] sm:$0xff] }
  0xfb   :  { %v1050_v13 = vadd.f32 %v1048_v23, %v1034_v16  ;;  %v1080_v24 = vmul.f32 %v5395_v4, %v5372_v6  ;;  %2312 = vmatpush3.bf16.msra.mxu1 %v5396_v17  ;;  %v1351_v53 = vadd.f32 %v1349_v27, %v1335_v58  ;;  %v1254_v33 = vadd.f32 %v1252_v56, %v1238_v51  ;;  %v5405_v56 = vld [vmem:[#allocation148_spill] sm:$0xff]  ;;  %v5407_v31 = vld [vmem:[#allocation29_spill] sm:$0xff] }
  0xfc   :  { %v1163_v42 = vadd.f32 %v1161_v32, %v1147_v54  ;;  %v1193_v38 = vmul.f32 %v5398_v19, %v5397_v11  ;;  %2314 = vmatprep.subr.bf16.mxu1 %v5399_v36  ;;  %v1397_v12 = vmul.f32 %v5401_v43, %v5400_v14  ;;  %v1300_v61 = vmul.f32 %v5403_v18, %v5402_v29  ;;  %v5406_v34 = vld [vmem:[#allocation80_spill] sm:$0xff]  ;;  %v5410_v51 = vld [vmem:[#allocation149_spill] sm:$0xff]  ;;  %v5418_v19 = vld [vmem:[#allocation54_spill] sm:$0xff] }
  0xfd   :  { %v1066_v49 = vadd.f32 %v1064_v63, %v1050_v13  ;;  %v1096_v6 = vmul.f32 %v5404_v44, %v5377_v26  ;;  %v1367_v59 = vadd.f32 %v1365_v8, %v1351_v53  ;;  %v1270_v23 = vadd.f32 %v1268_v3, %v1254_v33  ;;  %v5409_v16 = vld [vmem:[#allocation140_spill] sm:$0xff]  ;;  %v5411_v26 = vld [vmem:[#allocation11_spill] sm:$0xff]  ;;  %v5416_v53 = vld [vmem:[#allocation53_spill] sm:$0xff] }
  0xfe   :  { %v1179_v27 = vadd.f32 %v1177_v35, %v1163_v42  ;;  %v1209_v48 = vmul.f32 %v5406_v34, %v5405_v56  ;;  %v1316_v50 = vmul.f32 %v5407_v31, %v5367_v9  ;;  %v1112_v41 = vmul.f32 %v5408_v47, %v5378_v62  ;;  %v5412_v3 = vld [vmem:[#allocation52_spill] sm:$0xff]  ;;  %v5414_v9 = vld [vmem:[#allocation115_spill] sm:$0xff]  ;;  %v5419_v36 = vld [vmem:[#allocation142_spill] sm:$0xff] }
  0xff   :  { %v1082_v32 = vadd.f32 %v1080_v24, %v1066_v49  ;;  %2316 = vmatpush3.bf16.msra.mxu1 %v5409_v16  ;;  %v1383_v20 = vadd.f32 %v1381_v0, %v1367_v59  ;;  %v1286_v63 = vadd.f32 %v1284_v10, %v1270_v23  ;;  %v1225_v8 = vmul.f32 %v5411_v26, %v5410_v51  ;;  %v5413_v54 = vld [vmem:[#allocation32_spill] sm:$0xff]  ;;  %v5417_v10 = vld [vmem:[#allocation87_spill] sm:$0xff]  ;;  %v5420_v44 = vld [vmem:[#allocation82_spill] sm:$0xff] }
 0x100   :  { %v1195_v58 = vadd.f32 %v1193_v38, %v1179_v27  ;;  %2318 = vmatprep.subr.bf16.mxu1 %v5412_v3  ;;  %v1332_v40 = vmul.f32 %v5413_v54, %v5369_v21  ;;  %v1128_v13 = vmul.f32 %v5414_v9, %v5379_v30  ;;  %v5415_v17 = vld [vmem:[#allocation68_spill] sm:$0xff]  ;;  %v1348_v33 = vmul.f32 %v5417_v10, %v5373_v25  ;;  %v5421_v30 = vld [vmem:[#allocation122_spill] sm:$0xff]  ;;  %v5423_v59 = vld [vmem:[#allocation119_spill] sm:$0xff] }
 0x101   :  { %v1098_v35 = vadd.f32 %v1096_v6, %v1082_v32  ;;  %v1399_v4 = vadd.f32 %v1397_v12, %v1383_v20  ;;  %v1302_v24 = vadd.f32 %v1300_v61, %v1286_v63  ;;  %v1241_v0 = vmul.f32 %v5416_v53, %v5415_v17  ;;  %v5422_v61 = vld [vmem:[#allocation60_spill] sm:$0xff]  ;;  %v5428_v20 = vld [vmem:[#allocation67_spill] sm:$0xff]  ;;  %v5435_v53 = vld [vmem:[#allocation57_spill] sm:$0xff] }
 0x102   :  { %v1211_v62 = vadd.f32 %v1209_v48, %v1195_v58  ;;  %v1144_v38 = vmul.f32 %v5418_v19, %v5380_v37  ;;  %v1257_v12 = vmul.f32 %v5421_v30, %v5420_v44  ;;  %v1160_v23 = vmul.f32 %v5423_v59, %v5385_v57  ;;  %v5424_v27 = vld [vmem:[#allocation40_spill] sm:$0xff]  ;;  %v5425_v48 = vld [vmem:[#allocation150_spill] sm:$0xff]  ;;  %v5429_v58 = vld [vmem:[#allocation43_spill] sm:$0xff] }
 0x103   :  { %v1114_v42 = vadd.f32 %v1112_v41, %v1098_v35  ;;  %2320 = vmatpush3.bf16.msra.mxu1 %v5419_v36  ;;  %v1407_v21 = vmax.f32 %v1399_v4, 0.0  ;;  %v1318_v29 = vadd.f32 %v1316_v50, %v1302_v24  ;;  %v1364_v34 = vmul.f32 %v5424_v27, %v5375_v7  ;;  %v5426_v32 = vld [vmem:[#allocation56_spill] sm:$0xff]  ;;  %v5431_v3 = vld [vmem:[#allocation19_spill] sm:$0xff]  ;;  %v5432_v35 = vld [vmem:[#allocation73_spill] sm:$0xff] }
 0x104   :  { %v1227_v49 = vadd.f32 %v1225_v8, %v1211_v62  ;;  %2322 = vmatprep.subr.bf16.mxu1 %v5422_v61  ;;  %v1273_v47 = vmul.f32 %v5426_v32, %v5425_v48  ;;  %v5427_v41 = vld [vmem:[#allocation16_spill] sm:$0xff]  ;;  %v1380_v26 = vmul.f32 %v5429_v58, %v5392_v1  ;;  %v5430_v8 = vld [vmem:[#allocation69_spill] sm:$0xff]  ;;  %v1192_v9 = vmul.f32 %v4142_v15, %v5397_v11  ;;  %v5433_v4 = vld [vmem:[#allocation91_spill] sm:$0xff] }
 0x105   :  { %v1130_v6 = vadd.f32 %v1128_v13, %v1114_v42  ;;  %1544 = vmatprep.mubr.f32.mxu0 %v1407_v21  ;;  %v1334_v25 = vadd.f32 %v1332_v40, %v1318_v29  ;;  %v1176_v16 = vmul.f32 %v5427_v41, %v5390_v45  ;;  %v1289_v40 = vmul.f32 %v5431_v3, %v5430_v8  ;;  %v5434_v62 = vld [vmem:[#allocation85_spill] sm:$0xff]  ;;  %v5436_v42 = vld [vmem:[#allocation144_spill] sm:$0xff]  ;;  %v5437_v36 = vld [vmem:[#allocation70_spill] sm:$0xff] }
 0x106   :  { %v1243_v37 = vadd.f32 %v1241_v0, %v1227_v49  ;;  %v1396_v45 = vmul.f32 %v5433_v4, %v5400_v14  ;;  %v1305_v0 = vmul.f32 %v5435_v53, %v5434_v62  ;;  %v1208_v1 = vmul.f32 %v4144_v60, %v5405_v56  ;;  %v5438_v21 = vld [vmem:[#allocation23_spill] sm:$0xff]  ;;  %v5439_v15 = vld [vmem:[#allocation145_spill] sm:$0xff]  ;;  %v5449_v3 = vld [vmem:[#allocation102_spill] sm:$0xff] }
 0x107   :  { %v1146_v50 = vadd.f32 %v1144_v38, %v1130_v6  ;;  %2324 = vmatpush3.bf16.msra.mxu1 %v5428_v20  ;;  %v1350_v63 = vadd.f32 %v1348_v33, %v1334_v25  ;;  %v1321_v29 = vmul.f32 %v5438_v21, %v5437_v36  ;;  %v1224_v14 = vmul.f32 %v4156_v39, %v5410_v51  ;;  %v5441_v61 = vld [vmem:[#allocation61_spill] sm:$0xff]  ;;  %v5442_v56 = vld [vmem:[#allocation147_spill] sm:$0xff] }
 0x108   :  { %v1259_v57 = vadd.f32 %v1257_v12, %v1243_v37  ;;  %2326 = vmatprep.subr.bf16.mxu1 %v5432_v35  ;;  %v5440_v12 = vld [vmem:[#allocation89_spill] sm:$0xff]  ;;  %v1240_v60 = vmul.f32 %v4158_v5, %v5415_v17  ;;  %v1256_v39 = vmul.f32 %v5383_v2, %v5420_v44  ;;  %v1272_v5 = vmul.f32 %v5388_v22, %v5425_v48  ;;  %v5446_v17 = vld [vmem:[#allocation66_spill] sm:$0xff]  ;;  %v5450_v48 = vld [vmem:[#allocation83_spill] sm:$0xff] }
 0x109   :  { %v1162_v7 = vadd.f32 %v1160_v23, %v1146_v50  ;;  %v1366_v13 = vadd.f32 %v1364_v34, %v1350_v63  ;;  %v1337_v6 = vmul.f32 %v5441_v61, %v5440_v12  ;;  %v5443_v34 = vld [vmem:[#allocation33_spill] sm:$0xff]  ;;  %v5445_v50 = vld [vmem:[#allocation75_spill] sm:$0xff]  ;;  %v5447_v63 = vld [vmem:[#allocation30_spill] sm:$0xff]  ;;  %v1288_v2 = vmul.f32 %v5394_v46, %v5430_v8 }
 0x10a   :  { %v1275_v24 = vadd.f32 %v1273_v47, %v1259_v57  ;;  %v1353_v37 = vmul.f32 %v5374_v55, %v5443_v34  ;;  %v5444_v32 = vld [vmem:[#allocation77_spill] sm:$0xff]  ;;  %v1369_v41 = vmul.f32 %v5376_v28, %v5445_v50  ;;  %v1385_v55 = vmul.f32 %v5393_v52, %v5447_v63 }
 0x10b   :  { %v1178_v33 = vadd.f32 %v1176_v16, %v1162_v7  ;;  %2328 = vmatpush3.bf16.msra.mxu1 %v5436_v42  ;;  %v1382_v19 = vadd.f32 %v1380_v26, %v1366_v13  ;;  %v5448_v26 = vld [vmem:[#allocation79_spill] sm:$0xff]  ;;  %v1401_v28 = vmul.f32 %v5401_v43, %v5449_v3  ;;  %v1304_v22 = vmul.f32 %v5403_v18, %v5434_v62 }
 0x10c   :  { %v1291_v38 = vadd.f32 %v1289_v40, %v1275_v24  ;;  %2330 = vmatprep.subr.bf16.mxu1 %v5439_v15  ;;  %v1320_v52 = vmul.f32 %v5407_v31, %v5437_v36  ;;  %v1336_v46 = vmul.f32 %v5413_v54, %v5440_v12  ;;  %v1352_v43 = vmul.f32 %v5417_v10, %v5443_v34  ;;  %v1621_v10 = vld [vmem:[%s4568_s6] sm:$0xff] }
 0x10d   :  { %v1194_v11 = vadd.f32 %v1192_v9, %v1178_v33  ;;  %v1398_v49 = vadd.f32 %v1396_v45, %v1382_v19  ;;  %v1368_v18 = vmul.f32 %v5424_v27, %v5445_v50  ;;  %v1384_v53 = vmul.f32 %v5429_v58, %v5447_v63 }
 0x10e   :  { %v1307_v30 = vadd.f32 %v1305_v0, %v1291_v38  ;;  %v1400_v0 = vmul.f32 %v5433_v4, %v5449_v3  ;;  %v2375_v42 = vmov 0.0   ;;  %v1895_v4 = vld [vmem:[%s4567_s5] ss:$0 sm:$0xff] }
 0x10f   :  { %v1210_v59 = vadd.f32 %v1208_v1, %v1194_v11  ;;  %2332 = vmatpush3.bf16.msra.mxu1 %v5442_v56  ;;  %v1406_v23 = vmax.f32 %v1398_v49, 0.0  ;;  %2139 = vmatprep.subr.mxu0 %v2375_v42  ;;  %v1622_v11 = vld [vmem:[%s4568_s6 + $0x8] sm:$0xff] }
 0x110   :  { %v1323_v25 = vadd.f32 %v1321_v29, %v1307_v30  ;;  %2334 = vmatprep.subr.bf16.mxu1 %v5444_v32 }
 0x111   :  { %v1226_v47 = vadd.f32 %v1224_v14, %v1210_v59  ;;  %1545 = vmatmul.mubr.f32.vlgmr.msra.gmra.mrb[4].mxu0 %v1406_v23 }
 0x112   :  { %v1339_v51 = vadd.f32 %v1337_v6, %v1323_v25  ;;  %2141 = vmatprep.mubr.msk.f32.mxu0 %vm2376_vm0, %v2375_v42  ;;  %2140 = vmatpush3.msra.mxu0 %v1622_v11 }
 0x113   :  { %v1242_v16 = vadd.f32 %v1240_v60, %v1226_v47  ;;  %2336 = vmatpush3.bf16.msra.mxu1 %v5446_v17  ;;  %v1924_v17 = vld [vmem:[%s4569_s7] ss:$0 sm:$0xff] }
 0x114   :  { %v1355_v20 = vadd.f32 %v1353_v37, %v1339_v51  ;;  %2338 = vmatprep.subr.bf16.mxu1 %v5448_v26 }
 0x115   :  { %v1258_v57 = vadd.f32 %v1256_v39, %v1242_v16 }
 0x116   :  { %v1371_v44 = vadd.f32 %v1369_v41, %v1355_v20 }
 0x117   :  { %v1274_v40 = vadd.f32 %v1272_v5, %v1258_v57  ;;  %2340 = vmatpush3.bf16.msra.mxu1 %v5450_v48 }
 0x118   :  { %v1387_v35 = vadd.f32 %v1385_v55, %v1371_v44  ;;  %2144 = vmatprep.subr.mxu1 %v2375_v42 }
 0x119   :  { %v1290_v7 = vadd.f32 %v1288_v2, %v1274_v40 }
 0x11a   :  { %v1403_v9 = vadd.f32 %v1401_v28, %v1387_v35 }
 0x11b   :  { %v1306_v13 = vadd.f32 %v1304_v22, %v1290_v7 }
 0x11c   :  { %v1409_v8 = vmax.f32 %v1403_v9, 0.0 }
 0x11d   :  { %v1322_v45 = vadd.f32 %v1320_v52, %v1306_v13 }
 0x11e   :  { %1614 = vmatprep.mubr.f32.mxu1 %v1409_v8 }
 0x11f   :  { %v1338_v24 = vadd.f32 %v1336_v46, %v1322_v45 }
 0x121   :  { %v1354_v62 = vadd.f32 %v1352_v43, %v1338_v24 }
 0x123   :  { %v1370_v31 = vadd.f32 %v1368_v18, %v1354_v62 }
 0x125   :  { %v1386_v33 = vadd.f32 %v1384_v53, %v1370_v31 }
 0x127   :  { %v1402_v54 = vadd.f32 %v1400_v0, %v1386_v33 }
 0x129   :  { %v1408_v1 = vmax.f32 %v1402_v54, 0.0 }
 0x12b   :  { %1615 = vmatmul.mubr.f32.vlgmr.msra.gmra.mrb[4].mxu1 %v1408_v1 }
 0x12c   :  { %2146 = vmatprep.mubr.msk.f32.mxu1 %vm2376_vm0, %v2375_v42  ;;  %2145 = vmatpush3.msra.mxu1 %v1621_v10 }
 0x15a   :  { %v1957_v27 = vpop.f32.mrb[0].mxu0 }
 0x15b   :  { %v1958_v58 = vpop.f32.mrb[1].mxu0 }
 0x15c   :  { %v1959_v19 = vadd.f32 %v1958_v58, %v1957_v27 }
 0x15e   :  { %v829_v38 = vadd.f32 %v1959_v19, %v1895_v4 }
 0x17a   :  { %v1992_v36 = vpop.f32.mrb[0].mxu1 }
 0x17b   :  { %v1993_v21 = vpop.f32.mrb[1].mxu1 }
 0x17c   :  { %v1994_v29 = vadd.f32 %v1993_v21, %v1992_v36 }
 0x17e   :  { %v899_v15 = vadd.f32 %v1994_v29, %v829_v38 }
 0x1a1   :  { %v2027_v14 = vpop.f32.mrb[2].mxu0 }
 0x1a2   :  { %v2028_v49 = vpop.f32.mrb[3].mxu0 }
 0x1a3   :  { %v2029_v30 = vadd.f32 %v2028_v49, %v2027_v14 }
 0x1a5   :  { %v969_v12 = vadd.f32 %v2029_v30, %v899_v15 }
 0x1a7   :  { %v972_v61 = vmax.f32 %v969_v12, 0.0 }
 0x1a9   :  { %2147 = vmatmul.mubr.msk.f32.vlgmr.msra.gmra.mrb[6].mxu1 %vm1623_vm1, %v972_v61 }
 0x1cd   :  { %v2062_v6 = vpop.f32.mrb[2].mxu1 }
 0x1ce   :  { %v2063_v59 = vpop.f32.mrb[3].mxu1 }
 0x1cf   :  { %v2064_v60 = vadd.f32 %v2063_v59, %v2062_v6 }
 0x1d1   :  { %v1477_v25 = vadd.f32 %v2064_v60, %v1895_v4 }
 0x1e4   :  { %v2097_v56 = vpop.f32.mrb[4].mxu0 }
 0x1e5   :  { %v2098_v23 = vpop.f32.mrb[5].mxu0 }
 0x1e6   :  { %v2099_v34 = vadd.f32 %v2098_v23, %v2097_v56 }
 0x1e8   :  { %v1547_v37 = vadd.f32 %v2099_v34, %v1477_v25 }
 0x1fe   :  { %v2132_v32 = vpop.f32.mrb[4].mxu1 }
 0x1ff   :  { %v2133_v47 = vpop.f32.mrb[5].mxu1 }
 0x200   :  { %v2134_v39 = vadd.f32 %v2133_v47, %v2132_v32 }
 0x202   :  { %v1617_v51 = vadd.f32 %v2134_v39, %v1547_v37 }
 0x204   :  { %v1620_v50 = vmax.f32 %v1617_v51, 0.0 }
 0x206   :  { %2142 = vmatmul.mubr.msk.f32.vlgmr.msra.gmra.mrb[6].mxu0 %vm1623_vm1, %v1620_v50 }
 0x27c   :  { %v1766_v41 = vpop.f32.mrb[6].mxu1 }
 0x27d   :  { %v2148_v16 = vpop.f32.mrb[7].mxu1 }
 0x2d9   :  { %v1693_v5 = vpop.f32.mrb[6].mxu0 }
 0x2da   :  { %v1767_v20 = vadd.f32 %v1766_v41, %v1693_v5  ;;  %v2143_v63 = vpop.f32.mrb[7].mxu0 }
 0x2dc   :  { %v1777_v55 = vadd.f32 %v1924_v17, %v1767_v20 }
 0x2de   :  { %v1778_v26 = vmax.f32 %v1777_v55, 0.0 }
 0x2e0   :  { %1780 = vst.msk [vmem:[%s4570_s8] sm:$0xff] %vm1779_vm2, %v1778_v26 }
 0x2e1   :  { %1785 = vsyncpa [#allocation3], 1 }
 0x2e2   :  { %1786 = vsyncpa [#allocation5], 1 }

</bundles_post_ra>
